<compile_context>
chip_gen: v5e
topology: v5e:2x2
jax: 0.10.0
libtpu: 0.0.40
codegen_flags: <defaults>
</compile_context>

<pallas_src>
import functools

import jax
import jax.numpy as jnp
from jax import lax
from jax.experimental import pallas as pl
from jax.experimental.pallas import tpu as pltpu


def _conv_stats_kernel(x_ref, halo_ref, w_ref, y_ref, sum_ref, sq_ref, *,
                       block_rows, width, cin, cout):
    """Fused (2x-nearest upsample + 3x3 conv) as 4 sub-pixel convs + partial BN stats.

    x_ref    : (block_rows, width+2, cin)        bf16  activated, zero-padded rows
    halo_ref : (2, width+2, cin)                 bf16  the next 2 padded rows
    w_ref    : (2, 2, 4*cin, cout)               bf16  folded sub-pixel weights
    y_ref    : (2, 2, cout, block_rows*width)    bf16  channel-major conv output
    sum_ref, sq_ref : (1, cout) f32              per-tile sum / sum of squares
    """
    # Only 2 extra rows are stitched on (the review's halo fix).
    xt = jnp.concatenate([x_ref[...], halo_ref[...]], axis=0)   # (block_rows+2, W+2, cin)

    tile_sum = jnp.zeros((1, cout), jnp.float32)
    tile_sq = jnp.zeros((1, cout), jnp.float32)

    for s in range(2):
        for t in range(2):
            # One matmul per sub-pixel: the 4 taps are concatenated on the channel
            # (lane) axis -> contraction depth K = 4*cin (fills the MXU).
            lhs = jnp.concatenate(
                [xt[s + ri:s + ri + block_rows, t + cj:t + cj + width, :]
                 for ri in range(2) for cj in range(2)],
                axis=-1).reshape(block_rows * width, 4 * cin)
            y_st = jnp.dot(lhs, w_ref[s, t, :, :],
                           preferred_element_type=jnp.float32)   # (rows, cout) f32

            # One-pass BN partials (sum + sumsq) in f32.
            tile_sum = tile_sum + jnp.sum(y_st, axis=0, keepdims=True)
            tile_sq = tile_sq + jnp.sum(y_st * y_st, axis=0, keepdims=True)

            # Channel-major store: lane dim = block_rows*width (multiple of 128)
            # -> unmasked, lane-dense stores and contiguous HBM DMA.
            y_ref[s, t, :, :] = y_st.T.astype(jnp.bfloat16)

    sum_ref[...] = tile_sum
    sq_ref[...] = tile_sq


def _pick_block_rows(H, W, cin, cout, budget_bytes):
    """Largest divisor of H whose estimated per-step VMEM fits the budget and whose
    conv-output block keeps a 128-multiple lane dim (unless it spans all of H*W)."""
    Wp = W + 2

    def est(th):
        in_blk = th * Wp * cin * 2                       # bf16 input block
        halo = 2 * Wp * cin * 2
        y_blk = 4 * cout * th * W * 2                    # bf16 conv-out block
        temps = ((th + 2) * Wp * cin * 2                 # stitched xt copy
                 + 2 * th * W * 4 * cin * 2              # concatenated matmul LHS
                 + 2 * th * W * cout * 4)                # f32 matmul result + transpose
        return 2 * (in_blk + halo + y_blk) + temps       # x2: double buffering

    divisors = [d for d in range(1, H + 1) if H % d == 0]
    cands = [d for d in divisors if d >= 2 and ((d * W) % 128 == 0 or d == H)]
    if not cands:
        cands = [H]
    fits = [d for d in cands if est(d) <= budget_bytes]
    if fits:
        return max(fits)
    # TODO(synk): pad H to a multiple of a VMEM-sized tile and mask the padded rows
    # out of the BN statistics instead of this smallest-divisor fallback.
    return min(cands)


def gblock_forward(x_nchw, w1, b1, gamma, beta, *, eps=1e-5):
    N, Cin, H, W = x_nchw.shape
    Cout = w1.shape[0]
    # Conv bias is exactly cancelled by training-mode BatchNorm (batch-mean subtraction).
    del b1

    # ---- generation-aware VMEM budget (v5e/v6e: 128 MiB, v7x: 64 MiB per core) ----
    try:
        vmem_cap = int(pltpu.get_tpu_info().vmem_capacity_bytes)
    except Exception:
        vmem_cap = 64 * 1024 * 1024                      # conservative (v7x) default
    vmem_limit = min(vmem_cap // 2, 100 * 1024 * 1024)
    th = _pick_block_rows(H, W, Cin, Cout, budget_bytes=(vmem_limit * 3) // 4)
    nrt = H // th
    Wp = W + 2

    # ---- wrapper layout work: one fused input-sized pass ----
    # LeakyReLU(0.1) maps 0 -> 0, so it commutes with the zero pad; the cast to bf16
    # halves pass-1 input DMA (error stays within the bf16-MXU tolerance).
    xa = jnp.transpose(x_nchw, (0, 2, 3, 1))                           # NCHW -> NHWC
    xa = jnp.where(xa > 0, xa, jnp.float32(0.1) * xa).astype(jnp.bfloat16)
    xpad = jnp.pad(xa, ((0, 0), (1, 1), (1, 1), (0, 0)))               # (N, H+2, W+2, Cin)

    # 2-row bottom halo per row tile (tiny; avoids DMA'ing every block twice).
    row_idx = (jnp.arange(nrt)[:, None] + 1) * th + jnp.arange(2)[None, :]
    xhalo = jnp.take(xpad, row_idx, axis=1)                            # (N, nrt, 2, W+2, Cin)

    # Fold "upsample 2x nearest, then 3x3 conv" into 4 sub-pixel 2x2 convs, then fuse
    # the 4 taps into a single K = 4*Cin contraction:
    #   out[2a+s, 2b+t, o] = sum_{ri,cj} Wk[s,t,2*ri+cj] . act(xpad[a+s+ri, b+t+cj])
    A = jnp.array([[[1., 0.], [0., 1.], [0., 1.]],                     # s = 0
                   [[1., 0.], [1., 0.], [0., 1.]]], jnp.float32)       # s = 1
    Wc = jnp.einsum('sir,tju,omij->strumo', A, A, w1.astype(jnp.float32))
    Wk = Wc.reshape(2, 2, 4 * Cin, Cout).astype(jnp.bfloat16)          # bf16 MXU operands

    kern = functools.partial(_conv_stats_kernel,
                             block_rows=th, width=W, cin=Cin, cout=Cout)

    # ---- single Pallas pass: conv (4 sub-pixel matmuls) + per-tile BN partials ----
    y, sums, sqs = pl.pallas_call(
        kern,
        out_shape=(
            jax.ShapeDtypeStruct((N, 2, 2, Cout, H * W), jnp.bfloat16),  # channel-major y
            jax.ShapeDtypeStruct((N, nrt, 1, Cout), jnp.float32),        # per-tile sum
            jax.ShapeDtypeStruct((N, nrt, 1, Cout), jnp.float32),        # per-tile sumsq
        ),
        grid=(N, nrt),
        in_specs=[
            pl.BlockSpec((None, th, Wp, Cin), lambda n, i: (n, i, 0, 0)),
            pl.BlockSpec((None, None, 2, Wp, Cin), lambda n, i: (n, i, 0, 0, 0)),
            pl.BlockSpec((2, 2, 4 * Cin, Cout), lambda n, i: (0, 0, 0, 0)),
        ],
        out_specs=(
            pl.BlockSpec((None, 2, 2, Cout, th * W), lambda n, i: (n, 0, 0, 0, i)),
            pl.BlockSpec((None, None, 1, Cout), lambda n, i: (n, i, 0, 0)),
            pl.BlockSpec((None, None, 1, Cout), lambda n, i: (n, i, 0, 0)),
        ),
        compiler_params=pltpu.CompilerParams(
            dimension_semantics=("parallel", "parallel"),
            vmem_limit_bytes=int(vmem_limit)),
    )(xpad, xhalo, Wk)

    # ---- combine per-tile one-pass partials (tiny; Chan-style, no E[y^2]-E[y]^2 loss) ----
    cnt_tile = jnp.float32(4 * th * W)
    total = jnp.float32(4 * N * H * W)
    mean = jnp.sum(sums, axis=(0, 1, 2)) / total                       # (Cout,)
    mean_t = sums / cnt_tile
    m2_t = sqs - sums * sums / cnt_tile                                # per-tile centered M2
    m2 = jnp.sum(m2_t, axis=(0, 1, 2)) + jnp.sum(
        cnt_tile * (mean_t - mean) ** 2, axis=(0, 1, 2))
    var = m2 / total                                                   # biased (BN training)
    inv = lax.rsqrt(var + eps)
    scale = (gamma * inv).astype(jnp.float32)
    shift = (beta - mean * gamma * inv).astype(jnp.float32)

    # ---- fused XLA epilogue: BN affine + sub-pixel -> NCHW relayout in ONE pass ----
    # (bf16 read -> convert/affine -> f32 write; replaces the previous separate Pallas
    #  BN pass *and* the standalone f32 transpose.)
    y6 = y.reshape(N, 2, 2, Cout, H, W).astype(jnp.float32)
    out6 = (y6 * scale[None, None, None, :, None, None]
            + shift[None, None, None, :, None, None])
    out = jnp.transpose(out6, (0, 3, 4, 1, 5, 2)).reshape(N, Cout, 2 * H, 2 * W)
    return out


def ref_forward(x, w1, b1, gamma, beta, eps=1e-5):
    """Pure-JAX (f32) reference of the PyTorch GBlock.forward (training-mode BN)."""
    h = jnp.where(x > 0, x, 0.1 * x)
    h = jnp.repeat(jnp.repeat(h, 2, axis=2), 2, axis=3)
    y = lax.conv_general_dilated(h, w1, window_strides=(1, 1),
                                 padding=((1, 1), (1, 1)),
                                 dimension_numbers=("NCHW", "OIHW", "NCHW"))
    y = y + b1[None, :, None, None]
    mean = y.mean(axis=(0, 2, 3), keepdims=True)
    var = y.var(axis=(0, 2, 3), keepdims=True)
    return gamma[None, :, None, None] * (y - mean) * lax.rsqrt(var + eps) \
        + beta[None, :, None, None]


if __name__ == "__main__":
    key = jax.random.PRNGKey(0)
    kx, kw, kb, kg, kbe = jax.random.split(key, 5)
    N, Cin, Cout, H, W = 2, 4, 8, 16, 16

    # Deterministic synthetic parameters (shapes from GBlock.__init__; no checkpoint).
    x = jax.random.normal(kx, (N, Cin, H, W), jnp.float32)
    w1 = 0.1 * jax.random.normal(kw, (Cout, Cin, 3, 3), jnp.float32)    # conv1.weight
    b1 = 0.1 * jax.random.normal(kb, (Cout,), jnp.float32)              # conv1.bias
    gamma = 1.0 + 0.1 * jax.random.normal(kg, (Cout,), jnp.float32)     # bn1.weight
    beta = 0.1 * jax.random.normal(kbe, (Cout,), jnp.float32)           # bn1.bias

    out = jax.block_until_ready(gblock_forward(x, w1, b1, gamma, beta))
    assert out.shape == (N, Cout, 2 * H, 2 * W), out.shape

    ref = ref_forward(x, w1, b1, gamma, beta)
    max_err = float(jnp.max(jnp.abs(out - ref)))
    mean_err = float(jnp.mean(jnp.abs(out - ref)))
    # bf16 MXU operands + bf16 activations/intermediate => bf16-scale tolerance vs f32.
    if max_err > 0.15 or mean_err > 0.02:
        raise AssertionError(f"mismatch vs reference: max {max_err}, mean {mean_err}")

    print("KERNEL_OK")
</pallas_src>

<mosaic_0001>
module attributes {stable_mosaic.version = 11 : i64} {
  func.func @_conv_stats_kernel(%arg0: i32, %arg1: i32, %arg2: memref<1x16x18x4xbf16, #tpu.memory_space<vmem>>, %arg3: memref<1x1x2x18x4xbf16, #tpu.memory_space<vmem>>, %arg4: memref<2x2x16x8xbf16, #tpu.memory_space<vmem>>, %arg5: memref<1x2x2x8x256xbf16, #tpu.memory_space<vmem>>, %arg6: memref<1x1x1x8xf32, #tpu.memory_space<vmem>>, %arg7: memref<1x1x1x8xf32, #tpu.memory_space<vmem>>) attributes {dimension_semantics = [#tpu.dimension_semantics<parallel>, #tpu.dimension_semantics<parallel>], iteration_bounds = array<i64: 2, 1>, scalar_prefetch = 0 : i64, scratch_operands = 0 : i64, tpu.core_type = #tpu.core_type<tc>, window_params = [{transform_indices = @transform_0, window_bounds = array<i64: 1, 16, 18, 4>}, {transform_indices = @transform_1, window_bounds = array<i64: 1, 1, 2, 18, 4>}, {pipeline_mode = #tpu.pipeline_mode<synchronous>, transform_indices = @transform_2, window_bounds = array<i64: 2, 2, 16, 8>}, {transform_indices = @transform_3, window_bounds = array<i64: 1, 2, 2, 8, 256>}, {transform_indices = @transform_4, window_bounds = array<i64: 1, 1, 1, 8>}, {transform_indices = @transform_5, window_bounds = array<i64: 1, 1, 1, 8>}]} {
    %c0 = arith.constant 0 : index
    %c0_0 = arith.constant 0 : index
    %c0_1 = arith.constant 0 : index
    %c0_2 = arith.constant 0 : index
    %0 = vector.load %arg2[%c0, %c0_0, %c0_1, %c0_2] : memref<1x16x18x4xbf16, #tpu.memory_space<vmem>>, vector<1x16x18x4xbf16>
    %1 = vector.shape_cast %0 : vector<1x16x18x4xbf16> to vector<16x18x4xbf16>
    %c0_3 = arith.constant 0 : index
    %c0_4 = arith.constant 0 : index
    %c0_5 = arith.constant 0 : index
    %c0_6 = arith.constant 0 : index
    %c0_7 = arith.constant 0 : index
    %2 = vector.load %arg3[%c0_3, %c0_4, %c0_5, %c0_6, %c0_7] : memref<1x1x2x18x4xbf16, #tpu.memory_space<vmem>>, vector<1x1x2x18x4xbf16>
    %3 = vector.shape_cast %2 : vector<1x1x2x18x4xbf16> to vector<2x18x4xbf16>
    %4 = tpu.concatenate %1, %3 in 0 : vector<16x18x4xbf16>, vector<2x18x4xbf16> -> vector<18x18x4xbf16>
    %cst = arith.constant 0.000000e+00 : f32
    %5 = vector.broadcast %cst : f32 to vector<1x8xf32>
    %cst_8 = arith.constant 0.000000e+00 : f32
    %6 = vector.broadcast %cst_8 : f32 to vector<1x8xf32>
    %7 = vector.extract_strided_slice %4 {offsets = [0, 0, 0], sizes = [16, 16, 4], strides = [1, 1, 1]} : vector<18x18x4xbf16> to vector<16x16x4xbf16>
    %8 = vector.extract_strided_slice %4 {offsets = [0, 1, 0], sizes = [16, 16, 4], strides = [1, 1, 1]} : vector<18x18x4xbf16> to vector<16x16x4xbf16>
    %9 = vector.extract_strided_slice %4 {offsets = [1, 0, 0], sizes = [16, 16, 4], strides = [1, 1, 1]} : vector<18x18x4xbf16> to vector<16x16x4xbf16>
    %10 = vector.extract_strided_slice %4 {offsets = [1, 1, 0], sizes = [16, 16, 4], strides = [1, 1, 1]} : vector<18x18x4xbf16> to vector<16x16x4xbf16>
    %11 = tpu.concatenate %7, %8, %9, %10 in 2 : vector<16x16x4xbf16>, vector<16x16x4xbf16>, vector<16x16x4xbf16>, vector<16x16x4xbf16> -> vector<16x16x16xbf16>
    %12 = vector.shape_cast %11 : vector<16x16x16xbf16> to vector<256x16xbf16>
    %c0_9 = arith.constant 0 : index
    %c0_10 = arith.constant 0 : index
    %c0_11 = arith.constant 0 : index
    %c0_12 = arith.constant 0 : index
    %13 = vector.load %arg4[%c0_9, %c0_10, %c0_11, %c0_12] : memref<2x2x16x8xbf16, #tpu.memory_space<vmem>>, vector<1x1x16x8xbf16>
    %14 = vector.shape_cast %13 : vector<1x1x16x8xbf16> to vector<16x8xbf16>
    %cst_13 = arith.constant dense<0.000000e+00> : vector<256x8xf32>
    %15 = tpu.matmul %12, %14, %cst_13 {dimension_numbers = #tpu.dot_dimension_numbers<[1], [0], [0], [1], [0, 0, 1, 1], [], []>} : vector<256x16xbf16>, vector<16x8xbf16>, vector<256x8xf32> -> vector<256x8xf32>
    %cst_14 = arith.constant dense<0.000000e+00> : vector<8xf32>
    %16 = vector.multi_reduction <add>, %15, %cst_14 [0] : vector<256x8xf32> to vector<8xf32>
    %17 = vector.shape_cast %16 : vector<8xf32> to vector<1x8xf32>
    %18 = arith.addf %5, %17 : vector<1x8xf32>
    %19 = arith.mulf %15, %15 : vector<256x8xf32>
    %cst_15 = arith.constant dense<0.000000e+00> : vector<8xf32>
    %20 = vector.multi_reduction <add>, %19, %cst_15 [0] : vector<256x8xf32> to vector<8xf32>
    %21 = vector.shape_cast %20 : vector<8xf32> to vector<1x8xf32>
    %22 = arith.addf %6, %21 : vector<1x8xf32>
    %23 = tpu.transpose %15, [1, 0] : vector<256x8xf32> -> vector<8x256xf32>
    %24 = arith.truncf %23 : vector<8x256xf32> to vector<8x256xbf16>
    %c0_16 = arith.constant 0 : index
    %c0_17 = arith.constant 0 : index
    %c0_18 = arith.constant 0 : index
    %c0_19 = arith.constant 0 : index
    %c0_20 = arith.constant 0 : index
    %25 = vector.load %arg5[%c0_16, %c0_17, %c0_18, %c0_19, %c0_20] : memref<1x2x2x8x256xbf16, #tpu.memory_space<vmem>>, vector<1x1x1x8x256xbf16>
    %26 = vector.shape_cast %25 : vector<1x1x1x8x256xbf16> to vector<8x256xbf16>
    %27 = vector.shape_cast %24 : vector<8x256xbf16> to vector<1x1x1x8x256xbf16>
    tpu.vector_store %arg5[%c0_16, %c0_17, %c0_18, %c0_19, %c0_20], %27 {strides = array<i32>} : memref<1x2x2x8x256xbf16, #tpu.memory_space<vmem>>, vector<1x1x1x8x256xbf16>,
    %28 = vector.extract_strided_slice %4 {offsets = [0, 1, 0], sizes = [16, 16, 4], strides = [1, 1, 1]} : vector<18x18x4xbf16> to vector<16x16x4xbf16>
    %29 = vector.extract_strided_slice %4 {offsets = [0, 2, 0], sizes = [16, 16, 4], strides = [1, 1, 1]} : vector<18x18x4xbf16> to vector<16x16x4xbf16>
    %30 = vector.extract_strided_slice %4 {offsets = [1, 1, 0], sizes = [16, 16, 4], strides = [1, 1, 1]} : vector<18x18x4xbf16> to vector<16x16x4xbf16>
    %31 = vector.extract_strided_slice %4 {offsets = [1, 2, 0], sizes = [16, 16, 4], strides = [1, 1, 1]} : vector<18x18x4xbf16> to vector<16x16x4xbf16>
    %32 = tpu.concatenate %28, %29, %30, %31 in 2 : vector<16x16x4xbf16>, vector<16x16x4xbf16>, vector<16x16x4xbf16>, vector<16x16x4xbf16> -> vector<16x16x16xbf16>
    %33 = vector.shape_cast %32 : vector<16x16x16xbf16> to vector<256x16xbf16>
    %c0_21 = arith.constant 0 : index
    %c1 = arith.constant 1 : index
    %c0_22 = arith.constant 0 : index
    %c0_23 = arith.constant 0 : index
    %34 = vector.load %arg4[%c0_21, %c1, %c0_22, %c0_23] : memref<2x2x16x8xbf16, #tpu.memory_space<vmem>>, vector<1x1x16x8xbf16>
    %35 = vector.shape_cast %34 : vector<1x1x16x8xbf16> to vector<16x8xbf16>
    %cst_24 = arith.constant dense<0.000000e+00> : vector<256x8xf32>
    %36 = tpu.matmul %33, %35, %cst_24 {dimension_numbers = #tpu.dot_dimension_numbers<[1], [0], [0], [1], [0, 0, 1, 1], [], []>} : vector<256x16xbf16>, vector<16x8xbf16>, vector<256x8xf32> -> vector<256x8xf32>
    %cst_25 = arith.constant dense<0.000000e+00> : vector<8xf32>
    %37 = vector.multi_reduction <add>, %36, %cst_25 [0] : vector<256x8xf32> to vector<8xf32>
    %38 = vector.shape_cast %37 : vector<8xf32> to vector<1x8xf32>
    %39 = arith.addf %18, %38 : vector<1x8xf32>
    %40 = arith.mulf %36, %36 : vector<256x8xf32>
    %cst_26 = arith.constant dense<0.000000e+00> : vector<8xf32>
    %41 = vector.multi_reduction <add>, %40, %cst_26 [0] : vector<256x8xf32> to vector<8xf32>
    %42 = vector.shape_cast %41 : vector<8xf32> to vector<1x8xf32>
    %43 = arith.addf %22, %42 : vector<1x8xf32>
    %44 = tpu.transpose %36, [1, 0] : vector<256x8xf32> -> vector<8x256xf32>
    %45 = arith.truncf %44 : vector<8x256xf32> to vector<8x256xbf16>
    %c0_27 = arith.constant 0 : index
    %c0_28 = arith.constant 0 : index
    %c1_29 = arith.constant 1 : index
    %c0_30 = arith.constant 0 : index
    %c0_31 = arith.constant 0 : index
    %46 = vector.load %arg5[%c0_27, %c0_28, %c1_29, %c0_30, %c0_31] : memref<1x2x2x8x256xbf16, #tpu.memory_space<vmem>>, vector<1x1x1x8x256xbf16>
    %47 = vector.shape_cast %46 : vector<1x1x1x8x256xbf16> to vector<8x256xbf16>
    %48 = vector.shape_cast %45 : vector<8x256xbf16> to vector<1x1x1x8x256xbf16>
    tpu.vector_store %arg5[%c0_27, %c0_28, %c1_29, %c0_30, %c0_31], %48 {strides = array<i32>} : memref<1x2x2x8x256xbf16, #tpu.memory_space<vmem>>, vector<1x1x1x8x256xbf16>,
    %49 = vector.extract_strided_slice %4 {offsets = [1, 0, 0], sizes = [16, 16, 4], strides = [1, 1, 1]} : vector<18x18x4xbf16> to vector<16x16x4xbf16>
    %50 = vector.extract_strided_slice %4 {offsets = [1, 1, 0], sizes = [16, 16, 4], strides = [1, 1, 1]} : vector<18x18x4xbf16> to vector<16x16x4xbf16>
    %51 = vector.extract_strided_slice %4 {offsets = [2, 0, 0], sizes = [16, 16, 4], strides = [1, 1, 1]} : vector<18x18x4xbf16> to vector<16x16x4xbf16>
    %52 = vector.extract_strided_slice %4 {offsets = [2, 1, 0], sizes = [16, 16, 4], strides = [1, 1, 1]} : vector<18x18x4xbf16> to vector<16x16x4xbf16>
    %53 = tpu.concatenate %49, %50, %51, %52 in 2 : vector<16x16x4xbf16>, vector<16x16x4xbf16>, vector<16x16x4xbf16>, vector<16x16x4xbf16> -> vector<16x16x16xbf16>
    %54 = vector.shape_cast %53 : vector<16x16x16xbf16> to vector<256x16xbf16>
    %c1_32 = arith.constant 1 : index
    %c0_33 = arith.constant 0 : index
    %c0_34 = arith.constant 0 : index
    %c0_35 = arith.constant 0 : index
    %55 = vector.load %arg4[%c1_32, %c0_33, %c0_34, %c0_35] : memref<2x2x16x8xbf16, #tpu.memory_space<vmem>>, vector<1x1x16x8xbf16>
    %56 = vector.shape_cast %55 : vector<1x1x16x8xbf16> to vector<16x8xbf16>
    %cst_36 = arith.constant dense<0.000000e+00> : vector<256x8xf32>
    %57 = tpu.matmul %54, %56, %cst_36 {dimension_numbers = #tpu.dot_dimension_numbers<[1], [0], [0], [1], [0, 0, 1, 1], [], []>} : vector<256x16xbf16>, vector<16x8xbf16>, vector<256x8xf32> -> vector<256x8xf32>
    %cst_37 = arith.constant dense<0.000000e+00> : vector<8xf32>
    %58 = vector.multi_reduction <add>, %57, %cst_37 [0] : vector<256x8xf32> to vector<8xf32>
    %59 = vector.shape_cast %58 : vector<8xf32> to vector<1x8xf32>
    %60 = arith.addf %39, %59 : vector<1x8xf32>
    %61 = arith.mulf %57, %57 : vector<256x8xf32>
    %cst_38 = arith.constant dense<0.000000e+00> : vector<8xf32>
    %62 = vector.multi_reduction <add>, %61, %cst_38 [0] : vector<256x8xf32> to vector<8xf32>
    %63 = vector.shape_cast %62 : vector<8xf32> to vector<1x8xf32>
    %64 = arith.addf %43, %63 : vector<1x8xf32>
    %65 = tpu.transpose %57, [1, 0] : vector<256x8xf32> -> vector<8x256xf32>
    %66 = arith.truncf %65 : vector<8x256xf32> to vector<8x256xbf16>
    %c0_39 = arith.constant 0 : index
    %c1_40 = arith.constant 1 : index
    %c0_41 = arith.constant 0 : index
    %c0_42 = arith.constant 0 : index
    %c0_43 = arith.constant 0 : index
    %67 = vector.load %arg5[%c0_39, %c1_40, %c0_41, %c0_42, %c0_43] : memref<1x2x2x8x256xbf16, #tpu.memory_space<vmem>>, vector<1x1x1x8x256xbf16>
    %68 = vector.shape_cast %67 : vector<1x1x1x8x256xbf16> to vector<8x256xbf16>
    %69 = vector.shape_cast %66 : vector<8x256xbf16> to vector<1x1x1x8x256xbf16>
    tpu.vector_store %arg5[%c0_39, %c1_40, %c0_41, %c0_42, %c0_43], %69 {strides = array<i32>} : memref<1x2x2x8x256xbf16, #tpu.memory_space<vmem>>, vector<1x1x1x8x256xbf16>,
    %70 = vector.extract_strided_slice %4 {offsets = [1, 1, 0], sizes = [16, 16, 4], strides = [1, 1, 1]} : vector<18x18x4xbf16> to vector<16x16x4xbf16>
    %71 = vector.extract_strided_slice %4 {offsets = [1, 2, 0], sizes = [16, 16, 4], strides = [1, 1, 1]} : vector<18x18x4xbf16> to vector<16x16x4xbf16>
    %72 = vector.extract_strided_slice %4 {offsets = [2, 1, 0], sizes = [16, 16, 4], strides = [1, 1, 1]} : vector<18x18x4xbf16> to vector<16x16x4xbf16>
    %73 = vector.extract_strided_slice %4 {offsets = [2, 2, 0], sizes = [16, 16, 4], strides = [1, 1, 1]} : vector<18x18x4xbf16> to vector<16x16x4xbf16>
    %74 = tpu.concatenate %70, %71, %72, %73 in 2 : vector<16x16x4xbf16>, vector<16x16x4xbf16>, vector<16x16x4xbf16>, vector<16x16x4xbf16> -> vector<16x16x16xbf16>
    %75 = vector.shape_cast %74 : vector<16x16x16xbf16> to vector<256x16xbf16>
    %c1_44 = arith.constant 1 : index
    %c1_45 = arith.constant 1 : index
    %c0_46 = arith.constant 0 : index
    %c0_47 = arith.constant 0 : index
    %76 = vector.load %arg4[%c1_44, %c1_45, %c0_46, %c0_47] : memref<2x2x16x8xbf16, #tpu.memory_space<vmem>>, vector<1x1x16x8xbf16>
    %77 = vector.shape_cast %76 : vector<1x1x16x8xbf16> to vector<16x8xbf16>
    %cst_48 = arith.constant dense<0.000000e+00> : vector<256x8xf32>
    %78 = tpu.matmul %75, %77, %cst_48 {dimension_numbers = #tpu.dot_dimension_numbers<[1], [0], [0], [1], [0, 0, 1, 1], [], []>} : vector<256x16xbf16>, vector<16x8xbf16>, vector<256x8xf32> -> vector<256x8xf32>
    %cst_49 = arith.constant dense<0.000000e+00> : vector<8xf32>
    %79 = vector.multi_reduction <add>, %78, %cst_49 [0] : vector<256x8xf32> to vector<8xf32>
    %80 = vector.shape_cast %79 : vector<8xf32> to vector<1x8xf32>
    %81 = arith.addf %60, %80 : vector<1x8xf32>
    %82 = arith.mulf %78, %78 : vector<256x8xf32>
    %cst_50 = arith.constant dense<0.000000e+00> : vector<8xf32>
    %83 = vector.multi_reduction <add>, %82, %cst_50 [0] : vector<256x8xf32> to vector<8xf32>
    %84 = vector.shape_cast %83 : vector<8xf32> to vector<1x8xf32>
    %85 = arith.addf %64, %84 : vector<1x8xf32>
    %86 = tpu.transpose %78, [1, 0] : vector<256x8xf32> -> vector<8x256xf32>
    %87 = arith.truncf %86 : vector<8x256xf32> to vector<8x256xbf16>
    %c0_51 = arith.constant 0 : index
    %c1_52 = arith.constant 1 : index
    %c1_53 = arith.constant 1 : index
    %c0_54 = arith.constant 0 : index
    %c0_55 = arith.constant 0 : index
    %88 = vector.load %arg5[%c0_51, %c1_52, %c1_53, %c0_54, %c0_55] : memref<1x2x2x8x256xbf16, #tpu.memory_space<vmem>>, vector<1x1x1x8x256xbf16>
    %89 = vector.shape_cast %88 : vector<1x1x1x8x256xbf16> to vector<8x256xbf16>
    %90 = vector.shape_cast %87 : vector<8x256xbf16> to vector<1x1x1x8x256xbf16>
    tpu.vector_store %arg5[%c0_51, %c1_52, %c1_53, %c0_54, %c0_55], %90 {strides = array<i32>} : memref<1x2x2x8x256xbf16, #tpu.memory_space<vmem>>, vector<1x1x1x8x256xbf16>,
    %c0_56 = arith.constant 0 : index
    %c0_57 = arith.constant 0 : index
    %c0_58 = arith.constant 0 : index
    %c0_59 = arith.constant 0 : index
    %91 = vector.load %arg6[%c0_56, %c0_57, %c0_58, %c0_59] : memref<1x1x1x8xf32, #tpu.memory_space<vmem>>, vector<1x1x1x8xf32>
    %92 = vector.shape_cast %91 : vector<1x1x1x8xf32> to vector<1x8xf32>
    %93 = vector.shape_cast %81 : vector<1x8xf32> to vector<1x1x1x8xf32>
    tpu.vector_store %arg6[%c0_56, %c0_57, %c0_58, %c0_59], %93 {strides = array<i32>} : memref<1x1x1x8xf32, #tpu.memory_space<vmem>>, vector<1x1x1x8xf32>,
    %c0_60 = arith.constant 0 : index
    %c0_61 = arith.constant 0 : index
    %c0_62 = arith.constant 0 : index
    %c0_63 = arith.constant 0 : index
    %94 = vector.load %arg7[%c0_60, %c0_61, %c0_62, %c0_63] : memref<1x1x1x8xf32, #tpu.memory_space<vmem>>, vector<1x1x1x8xf32>
    %95 = vector.shape_cast %94 : vector<1x1x1x8xf32> to vector<1x8xf32>
    %96 = vector.shape_cast %85 : vector<1x8xf32> to vector<1x1x1x8xf32>
    tpu.vector_store %arg7[%c0_60, %c0_61, %c0_62, %c0_63], %96 {strides = array<i32>} : memref<1x1x1x8xf32, #tpu.memory_space<vmem>>, vector<1x1x1x8xf32>,
    return
  }
  func.func @transform_0(%arg0: i32, %arg1: i32) -> (i32, i32, i32, i32) {
    %c0_i32 = arith.constant 0 : i32
    %c0_i32_0 = arith.constant 0 : i32
    %c0_i32_1 = arith.constant 0 : i32
    return %arg0, %arg1, %c0_i32, %c0_i32_0 : i32, i32, i32, i32
  }
  func.func @transform_1(%arg0: i32, %arg1: i32) -> (i32, i32, i32, i32, i32) {
    %c0_i32 = arith.constant 0 : i32
    %c0_i32_0 = arith.constant 0 : i32
    %c0_i32_1 = arith.constant 0 : i32
    %c0_i32_2 = arith.constant 0 : i32
    return %arg0, %arg1, %c0_i32, %c0_i32_0, %c0_i32_1 : i32, i32, i32, i32, i32
  }
  func.func @transform_2(%arg0: i32, %arg1: i32) -> (i32, i32, i32, i32) {
    %c0_i32 = arith.constant 0 : i32
    %c0_i32_0 = arith.constant 0 : i32
    %c0_i32_1 = arith.constant 0 : i32
    %c0_i32_2 = arith.constant 0 : i32
    %c0_i32_3 = arith.constant 0 : i32
    return %c0_i32, %c0_i32_0, %c0_i32_1, %c0_i32_2 : i32, i32, i32, i32
  }
  func.func @transform_3(%arg0: i32, %arg1: i32) -> (i32, i32, i32, i32, i32) {
    %c0_i32 = arith.constant 0 : i32
    %c0_i32_0 = arith.constant 0 : i32
    %c0_i32_1 = arith.constant 0 : i32
    %c0_i32_2 = arith.constant 0 : i32
    return %arg0, %c0_i32, %c0_i32_0, %c0_i32_1, %arg1 : i32, i32, i32, i32, i32
  }
  func.func @transform_4(%arg0: i32, %arg1: i32) -> (i32, i32, i32, i32) {
    %c0_i32 = arith.constant 0 : i32
    %c0_i32_0 = arith.constant 0 : i32
    %c0_i32_1 = arith.constant 0 : i32
    return %arg0, %arg1, %c0_i32, %c0_i32_0 : i32, i32, i32, i32
  }
  func.func @transform_5(%arg0: i32, %arg1: i32) -> (i32, i32, i32, i32) {
    %c0_i32 = arith.constant 0 : i32
    %c0_i32_0 = arith.constant 0 : i32
    %c0_i32_1 = arith.constant 0 : i32
    return %arg0, %arg1, %c0_i32, %c0_i32_0 : i32, i32, i32, i32
  }
}

</mosaic_0001>

<bundles_post_ra>
// kernel: tpu_custom_call.1
= control target key start
LH: loop header
LB: loop body
LE: loop exit
PB: predicated region body
PF: predicated region fallthrough
CT: control target
= control target key end

     0   :  { %s5472_s0 = inlined_call_operand.vmem [shape: bf16[2,18,18,4], index: 0, kind: input, shape index: {}]   ;;  %s5473_s1 = inlined_call_operand.vmem [shape: bf16[2,1,2,18,4], index: 1, kind: input, shape index: {}]   ;;  %s5474_s2 = inlined_call_operand.vmem [shape: bf16[2,2,16,8], index: 2, kind: input, shape index: {}]   ;;  %s5475_s3 = inlined_call_operand.hbm [shape: bf16[2,2,2,8,256], index: 3, kind: output, shape index: {0}]   ;;  %s5476_s4 = inlined_call_operand.hbm [shape: f32[2,1,1,8], index: 4, kind: output, shape index: {1}]   ;;  %s5477_s5 = inlined_call_operand.hbm [shape: f32[2,1,1,8], index: 5, kind: output, shape index: {2}]  }
   0x1   :  { %5499 = sst [smem:[#allocation27_spill]] %s5472_s0 }
   0x2   :  { %5500 = sst [smem:[#allocation28_spill]] %s5473_s1 }
   0x3   :  { %11 = vsyncpa [#allocation3], 0 }
   0x4   :  { %13 = vsyncpa [#allocation3 + $0x1], 0 }
   0x5   :  { %14 = vsyncpa [#allocation5], 0 }
   0x6   :  { %16 = vsyncpa [#allocation5 + $0x1], 0  ;;  %s3607_s18 = smov 0   ;;  %s3609_s19 = smov 0  }
   0x7   :  { %s3611_s20 = smov 0   ;;  %s3613_s21 = smov 0  }
   0x8   :  { %s3615_s22 = smov 0   ;;  %s3617_s23 = smov 0  }
   0x9 LB: > { %s3016_s24 = sadd.s32 4294967295, %s3571_s23   ;;  %s5497_s25 = sadd.s32 4294967294, %s3571_s23   ;;  %s3571_s23 = sphi %s3617_s23, %s22_s23   ;;  %s3567_s22 = sphi %s3615_s22, %s5549_s22   ;;  %s3563_s21 = sphi %s3613_s21, %s5548_s21   ;;  %s3559_s20 = sphi %s3611_s20, %s5547_s20   ;;  %s3555_s19 = sphi %s3609_s19, %s5546_s19   ;;  %s3551_s18 = sphi %s3607_s18, %s5545_s18  }
   0xa   : > { %s34_s26 = sadd.s32 1, %s3567_s22  ;;  %s120_s27 = sadd.s32 1, %s3559_s20 }
   0xb   : > { %p36_p0 = scmp.ge.s32.totalorder %s34_s26, 2  ;;  %p130_p1 = scmp.ne.s32.totalorder %s3559_s20, %s3555_s19 }
   0xc   : > { %p131_p2 = scmp.eq.s32.totalorder %s3016_s24, 1  ;;  %p136_p3 = scmp.ne.s32.totalorder %s3555_s19, %s3551_s18 }
   0xd   : > { %s5551_s26 = smov (%p36_p0, %s34_s26), 0  ;;  %p137_p5 = scmp.eq.s32.totalorder %s5497_s25, 1 }
   0xe   : > { %p3649_p4 = por %p131_p2, %p130_p1  ;;  %s115_s29 = ssub.s32 %s3567_s22, %s5551_s26 }
   0xf   : > { %p3020_p6 = scmp.ge.s32.totalorder %s3571_s23, 1  ;;  %p118_p7 = scmp.eq.s32.totalorder %s115_s29, 0 }
  0x10   : > { %p3658_p8 = por %p137_p5, %p136_p3  ;;  %p250_p9 = scmp.lt.s32.totalorder %s3571_s23, 3 }
  0x11   : > { %s3664_s6 = scalar_select %p118_p7, %s3559_s20, %s120_s27  }
  0x12   : > { %p251_p10 = pnand %p3020_p6, %p250_p9 }
  0x14   : > { %254 = sbr.rel (%p251_p10) target bundleno = 847 (0x34f), region = 32 }
  0x19   : > { %p311_p11 = scmp.lt.s32.totalorder %s3563_s21, 1  ;;  %s5503_s0 = sld [smem:[#allocation27_spill]]  ;;  %vm519_vm0 = vsmask.f32 7424  ;;  %vm828_vm1 = vcmask 31744   ;;  %vm861_vm2 = vcmask 64512  }
  0x1a   : > { %s3573_s12 = smov 4   ;;  %s5498_s13 = smov 8   ;;  %vm894_vm3 = vcmask 97280   ;;  %vm935_vm4 = vcmask 130048   ;;  %vm2801_vm5 = vcmask 57344  }
  0x1b   : > { %s3668_s7 = scalar_select %p311_p11, %s3563_s21, 1 }
  0x1c   : > { %s5504_s1 = sld [smem:[#allocation28_spill]]  ;;  %s3575_s27 = smov 12  }
  0x1d   : > { %s3213_s8 = smul.u32 216, %s3668_s7  ;;  %s5322_s15 = sand.u32 1, %s3555_s19  }
  0x1e   : > { %s3214_s14 = smul.u32 24, %s3668_s7  ;;  %s3021_s16 = sshll.u32 %s5322_s15, 5 }
  0x1f   : > { %s3674_s11 = scalar_lea.vmem %s5503_s0, %s3213_s8  ;;  %s2842_s7 = scalar_lea.hbm %s5476_s4, %s3563_s21 }
  0x20   : > { %v3677_v0 = vld [vmem:[%s3674_s11 + $0x30] sm:$0xff]  ;;  %v351_v1 = vld [vmem:[%s3674_s11 + $0x38] sm:$0x1]  ;;  %v345_v4 = vld [vmem:[%s3674_s11 + $0x20] sm:$0x1]  ;;  %s5380_s8 = sand.u32 1, %s3016_s24  }
  0x21   : > { %v3681_v2 = vld [vmem:[%s3674_s11 + $0x18] sm:$0xff]  ;;  %v491_v3 = vunpack.c.l.b16 %v351_v1  ;;  %v3685_v5 = vld [vmem:[%s3674_s11] sm:$0xff]  ;;  %v339_v6 = vld [vmem:[%s3674_s11 + $0x8] sm:$0x1]  ;;  %v569_v7 = vshrl.u32 %v3677_v0, 16  ;;  %v571_v8 = vshll.u32 %v3677_v0, 16  ;;  %v489_v9 = vunpack.c.l.b16 %v345_v4 }
  0x22   : > { %v545_v10 = vshrl.u32 %v3681_v2, 16  ;;  %v354_v11 = vld [vmem:[%s3674_s11 + $0x44] sm:$0x1]  ;;  %v547_v13 = vshll.u32 %v3681_v2, 16  ;;  %v487_v14 = vunpack.c.l.b16 %v339_v6  ;;  %v521_v15 = vshrl.u32 %v3685_v5, 16  ;;  %v3697_v16 = vld [vmem:[%s3674_s11 + $0x3c] sm:$0xff]  ;;  %s3920_s17 = scalar_lea.vmem %s5504_s1, %s3214_s14 }
  0x23   : > { %v3692_v12 = vpack.c.b16 %v491_v3, %v491_v3  ;;  %v573_v17 = vrot.slane %v571_v8, 1  ;;  %v3699_v18 = vpack.c.b16 %v489_v9, %v489_v9  ;;  %v523_v19 = vshll.u32 %v3685_v5, 16  ;;  %v348_v25 = vld [vmem:[%s3674_s11 + $0x2c] sm:$0x1]  ;;  %v3711_v30 = vld [vmem:[%s3674_s11 + $0x24] sm:$0xff]  ;;  %v3744_v59 = vld [vmem:[%s3674_s11 + $0x54] sm:$0xff] }
  0x24   : > { %v492_v20 = vunpack.c.l.b16 %v354_v11  ;;  %v549_v22 = vrot.slane %v547_v13, 1  ;;  %v3703_v23 = vpack.c.b16 %v487_v14, %v487_v14  ;;  %v581_v24 = vshrl.u32 %v3697_v16, 16  ;;  %v3717_v39 = vld [vmem:[%s3674_s11 + $0xc] sm:$0xff]  ;;  %v342_v40 = vld [vmem:[%s3674_s11 + $0x14] sm:$0x1]  ;;  %v3725_v45 = vld [vmem:[%s3674_s11 + $0x60] sm:$0xff] }
  0x25   : > { %v576_v21 = vshll.u32 %v3692_v12, 16  ;;  %v574_v26 = vor.u32 %v573_v17, %v569_v7  ;;  %v552_v27 = vshll.u32 %v3699_v18, 16  ;;  %v525_v28 = vrot.slane %v523_v19, 1  ;;  %v363_v46 = vld [vmem:[%s3674_s11 + $0x68] sm:$0x1]  ;;  %s304_s24 = scalar_lea.vmem [#allocation6], %s5322_s15 }
  0x26   : > { %v3708_v29 = vpack.c.b16 %v492_v20, %v492_v20  ;;  %v550_v32 = vor.u32 %v549_v22, %v545_v10  ;;  %v528_v33 = vshll.u32 %v3703_v23, 16  ;;  %v583_v34 = vshll.u32 %v3697_v16, 16  ;;  %v360_v60 = vld [vmem:[%s3674_s11 + $0x5c] sm:$0x1]  ;;  %v3757_v8 = vld [vmem:[%s3674_s11 + $0x48] sm:$0xff] }
  0x27   : > { %v578_v31 = vrot.slane %v576_v21, 1  ;;  %v554_v35 = vrot.slane %v552_v27, 1  ;;  %v526_v36 = vor.u32 %v525_v28, %v521_v15  ;;  %v490_v38 = vunpack.c.l.b16 %v348_v25  ;;  %v357_v9 = vld [vmem:[%s3674_s11 + $0x50] sm:$0x1]  ;;  %v372_v21 = vld [vmem:[%s3674_s11 + $0x8c] sm:$0x1] }
  0x28   : > { %v588_v37 = vshll.u32 %v3708_v29, 16  ;;  %v530_v42 = vrot.slane %v528_v33, 1  ;;  %v585_v43 = vrot.slane %v583_v34, 1  ;;  %v557_v44 = vshrl.u32 %v3711_v30, 16  ;;  %v3771_v27 = vld [vmem:[%s3674_s11 + $0x84] sm:$0xff]  ;;  %v3778_v34 = vld [vmem:[%s3674_s11 + $0x78] sm:$0xff] }
  0x29   : > { %v3721_v41 = vsel %vm519_vm0, %v574_v26, %v578_v31  ;;  %v3731_v47 = vsel %vm519_vm0, %v550_v32, %v554_v35  ;;  %v3733_v49 = vpack.c.b16 %v490_v38, %v490_v38  ;;  %v559_v50 = vshll.u32 %v3711_v30, 16 }
  0x2a   : > { %720 = vrot.lane.b32.xlu2 %v3721_v41, %s3573_s12  ;;  %v590_v48 = vrot.slane %v588_v37, 1  ;;  %716 = vrot.lane.b32.xlu1 %v3731_v47, %s3573_s12  ;;  %v531_v51 = vsel %vm519_vm0, %v526_v36, %v530_v42  ;;  %v586_v52 = vor.u32 %v585_v43, %v581_v24  ;;  %v488_v53 = vunpack.c.l.b16 %v342_v40  ;;  %v369_v40 = vld [vmem:[%s3674_s11 + $0x80] sm:$0x1] }
  0x2b   : > { %v533_v54 = vshrl.u32 %v3717_v39, 16  ;;  %712 = vrot.lane.b32.xlu0 %v531_v51, %s3573_s12  ;;  %v561_v55 = vrot.slane %v559_v50, 1  ;;  %v564_v56 = vshll.u32 %v3733_v49, 16  ;;  %v535_v57 = vshll.u32 %v3717_v39, 16 }
  0x2c   : > { %v495_v58 = vunpack.c.l.b16 %v363_v46  ;;  %v3748_v61 = vsel %vm519_vm0, %v586_v52, %v590_v48  ;;  %v3750_v62 = vpack.c.b16 %v488_v53, %v488_v53  ;;  %v617_v63 = vshrl.u32 %v3725_v45, 16  ;;  %v3797_v52 = vld [vmem:[%s3674_s11 + $0x6c] sm:$0xff]  ;;  %v366_v53 = vld [vmem:[%s3674_s11 + $0x74] sm:$0x1] }
  0x2d   : > { %v619_v1 = vshll.u32 %v3725_v45, 16  ;;  %v562_v3 = vor.u32 %v561_v55, %v557_v44  ;;  %v566_v4 = vrot.slane %v564_v56, 1  ;;  %v537_v6 = vrot.slane %v535_v57, 1 }
  0x2e   : > { %v3754_v7 = vpack.c.b16 %v495_v58, %v495_v58  ;;  %v540_v10 = vshll.u32 %v3750_v62, 16  ;;  %v494_v13 = vunpack.c.l.b16 %v360_v60  ;;  %v605_v14 = vshrl.u32 %v3744_v59, 16  ;;  %v3805_v58 = vld [vmem:[%s3674_s11 + $0xa8] sm:$0xff] }
  0x2f   : > { %v621_v11 = vrot.slane %v619_v1, 1  ;;  %v3763_v15 = vsel %vm519_vm0, %v562_v3, %v566_v4  ;;  %v538_v17 = vor.u32 %v537_v6, %v533_v54  ;;  %v607_v20 = vshll.u32 %v3744_v59, 16  ;;  %v381_v4 = vld [vmem:[%s3674_s11 + $0xb0] sm:$0x1] }
  0x30   : > { %v624_v19 = vshll.u32 %v3754_v7, 16  ;;  %v542_v22 = vrot.slane %v540_v10, 1  ;;  %v3768_v25 = vpack.c.b16 %v494_v13, %v494_v13  ;;  %v493_v26 = vunpack.c.l.b16 %v357_v9 }
  0x31   : > { %v622_v24 = vor.u32 %v621_v11, %v617_v63  ;;  %v609_v31 = vrot.slane %v607_v20, 1  ;;  %v593_v32 = vshrl.u32 %v3757_v8, 16  ;;  %v595_v33 = vshll.u32 %v3757_v8, 16  ;;  %v3821_v20 = vld [vmem:[%s3674_s11 + $0x9c] sm:$0xff] }
  0x32   : > { %722 = vrot.lane.b32.xlu2 %v3748_v61, %s3573_s12  ;;  %v626_v28 = vrot.slane %v624_v19, 1  ;;  %718 = vrot.lane.b32.xlu1 %v3763_v15, %s3573_s12  ;;  %v3783_v35 = vsel %vm519_vm0, %v538_v17, %v542_v22  ;;  %v612_v36 = vshll.u32 %v3768_v25, 16  ;;  %v3786_v37 = vpack.c.b16 %v493_v26, %v493_v26 }
  0x33   : > { %v498_v38 = vunpack.c.l.b16 %v372_v21  ;;  %714 = vrot.lane.b32.xlu0 %v3783_v35, %s3573_s12  ;;  %v610_v42 = vor.u32 %v609_v31, %v605_v14  ;;  %v597_v43 = vrot.slane %v595_v33, 1  ;;  %v653_v44 = vshrl.u32 %v3771_v27, 16  ;;  %v378_v21 = vld [vmem:[%s3674_s11 + $0xa4] sm:$0x1] }
  0x34   : > { %v614_v46 = vrot.slane %v612_v36, 1  ;;  %v600_v48 = vshll.u32 %v3786_v37, 16  ;;  %v655_v51 = vshll.u32 %v3771_v27, 16  ;;  %v3801_v54 = vsel %vm519_vm0, %v622_v24, %v626_v28 }
  0x35   : > { %v3793_v50 = vpack.c.b16 %v498_v38, %v498_v38  ;;  %v598_v55 = vor.u32 %v597_v43, %v593_v32  ;;  %v497_v56 = vunpack.c.l.b16 %v369_v40  ;;  %v643_v57 = vshll.u32 %v3778_v34, 16  ;;  %v3838_v43 = vld [vmem:[%s3674_s11 + $0x90] sm:$0xff] }
  0x36   : > { %v602_v60 = vrot.slane %v600_v48, 1  ;;  %v657_v63 = vrot.slane %v655_v51, 1  ;;  %v641_v3 = vshrl.u32 %v3778_v34, 16  ;;  %v3811_v6 = vsel %vm519_vm0, %v610_v42, %v614_v46 }
  0x37   : > { %v660_v1 = vshll.u32 %v3793_v50, 16  ;;  %v3813_v9 = vpack.c.b16 %v497_v56, %v497_v56  ;;  %v645_v10 = vrot.slane %v643_v57, 1  ;;  %v496_v11 = vunpack.c.l.b16 %v366_v53  ;;  %v384_v57 = vld [vmem:[%s3674_s11 + $0xbc] sm:$0x1] }
  0x38   : > { %v3816_v13 = vsel %vm519_vm0, %v598_v55, %v602_v60  ;;  %v658_v14 = vor.u32 %v657_v63, %v653_v44  ;;  %v629_v17 = vshrl.u32 %v3797_v52, 16  ;;  %v631_v19 = vshll.u32 %v3797_v52, 16  ;;  %v375_v44 = vld [vmem:[%s3674_s11 + $0x98] sm:$0x1] }
  0x39   : > { %v662_v22 = vrot.slane %v660_v1, 1  ;;  %v648_v24 = vshll.u32 %v3813_v9, 16  ;;  %v3827_v26 = vpack.c.b16 %v496_v11, %v496_v11  ;;  %v501_v28 = vunpack.c.l.b16 %v381_v4 }
  0x3a   : > { %728 = vrot.lane.b32.xlu2 %v3801_v54, %s3573_s12  ;;  %726 = vrot.lane.b32.xlu1 %v3811_v6, %s3573_s12  ;;  %v646_v31 = vor.u32 %v645_v10, %v641_v3  ;;  %v633_v32 = vrot.slane %v631_v19, 1  ;;  %v691_v33 = vshll.u32 %v3805_v58, 16  ;;  %v500_v42 = vunpack.c.l.b16 %v378_v21 }
  0x3b   : > { %724 = vrot.lane.b32.xlu0 %v3816_v13, %s3573_s12  ;;  %v650_v36 = vrot.slane %v648_v24, 1  ;;  %v636_v38 = vshll.u32 %v3827_v26, 16  ;;  %v3835_v40 = vpack.c.b16 %v501_v28, %v501_v28  ;;  %v679_v48 = vshll.u32 %v3821_v20, 16 }
  0x3c   : > { %v634_v46 = vor.u32 %v633_v32, %v629_v17  ;;  %v3843_v51 = vsel %vm519_vm0, %v658_v14, %v662_v22  ;;  %v689_v55 = vshrl.u32 %v3805_v58, 16  ;;  %v3846_v56 = vpack.c.b16 %v500_v42, %v500_v42  ;;  %v3863_v22 = vld [vmem:[%s3674_s11 + $0xb4] sm:$0xff]  ;;  %s2856_s11 = scalar_lea.hbm %s5477_s5, %s3563_s21 }
  0x3d   : > { %v638_v53 = vrot.slane %v636_v38, 1  ;;  %v693_v60 = vrot.slane %v691_v33, 1  ;;  %v696_v63 = vshll.u32 %v3835_v40, 16  ;;  %v677_v1 = vshrl.u32 %v3821_v20, 16  ;;  %s5394_s29 = sshll.u32 %s2856_s11, 4  ;;  %s2861_s29 = int_to_ptr.hbm [resolvable:$true] %s5394_s29 }
  0x3e   : > { %v499_v3 = vunpack.c.l.b16 %v375_v44  ;;  %v3852_v4 = vsel %vm519_vm0, %v646_v31, %v650_v36  ;;  %v681_v10 = vrot.slane %v679_v48, 1  ;;  %v684_v11 = vshll.u32 %v3846_v56, 16 }
  0x3f   : > { %v667_v14 = vshll.u32 %v3838_v43, 16  ;;  %v3857_v17 = vsel %vm519_vm0, %v634_v46, %v638_v53  ;;  %v665_v21 = vshrl.u32 %v3838_v43, 16  ;;  %v502_v24 = vunpack.c.l.b16 %v384_v57 }
  0x40   : > { %v3859_v19 = vpack.c.b16 %v499_v3, %v499_v3  ;;  %v694_v31 = vor.u32 %v693_v60, %v689_v55  ;;  %v698_v32 = vrot.slane %v696_v63, 1  ;;  %v682_v36 = vor.u32 %v681_v10, %v677_v1 }
  0x41   : > { %v669_v28 = vrot.slane %v667_v14, 1  ;;  %v686_v38 = vrot.slane %v684_v11, 1  ;;  %v3872_v46 = vpack.c.b16 %v502_v24, %v502_v24  ;;  %v703_v48 = vshll.u32 %v3863_v22, 16  ;;  %v3206_v14 = vld [vmem:[%s3920_s17] sm:$0xff]  ;;  %v387_v24 = vld [vmem:[%s3920_s17 + $0x8] sm:$0x1] }
  0x42   : > { %734 = vrot.lane.b32.xlu2 %v3843_v51, %s3573_s12  ;;  %732 = vrot.lane.b32.xlu1 %v3852_v4, %s3573_s12  ;;  %v672_v33 = vshll.u32 %v3859_v19, 16  ;;  %v3876_v53 = vsel %vm519_vm0, %v694_v31, %v698_v32  ;;  %v701_v60 = vshrl.u32 %v3863_v22, 16 }
  0x43   : > { %730 = vrot.lane.b32.xlu0 %v3857_v17, %s3573_s12  ;;  %v670_v42 = vor.u32 %v669_v28, %v665_v21  ;;  %v687_v57 = vsel %vm519_vm0, %v682_v36, %v686_v38  ;;  %v705_v63 = vrot.slane %v703_v48, 1  ;;  %v708_v3 = vshll.u32 %v3872_v46, 16 }
  0x44   : > { %v674_v44 = vrot.slane %v672_v33, 1 }
  0x45   : > { %v706_v1 = vor.u32 %v705_v63, %v701_v60  ;;  %v710_v10 = vrot.slane %v708_v3, 1  ;;  %v1301_v3 = vshrl.u32 %v3733_v49, 16 }
  0x46   : > { %v675_v55 = vsel %vm519_vm0, %v670_v42, %v674_v44  ;;  %v1297_v42 = vshrl.u32 %v3750_v62, 16  ;;  %v1295_v44 = vshrl.u32 %v3703_v23, 16 }
  0x47   : > { %v711_v11 = vsel %vm519_vm0, %v706_v1, %v710_v10  ;;  %v3208_v1 = vld [vmem:[%s5474_s2] sm:$0xff] }
  0x48   : > { %975 = vmatpush.bf16.msra.mxu0 %v3208_v1  ;;  %v1311_v1 = vshrl.u32 %v3754_v7, 16 }
  0x4a   : > { %740 = vrot.lane.b32.xlu2 %v3876_v53, %s3573_s12  ;;  %738 = vrot.lane.b32.xlu1 %v687_v57, %s3573_s12 }
  0x4b   : > { %736 = vrot.lane.b32.xlu0 %v675_v55, %s3573_s12 }
  0x52   : > { %751 = vrot.lane.b32.xlu2 %v3681_v2, %s5498_s13  ;;  %749 = vrot.lane.b32.xlu1 %v3717_v39, %s5498_s13 }
  0x53   : > { %742 = vrot.lane.b32.xlu0 %v711_v11, %s3573_s12 }
  0x5a   : > { %757 = vrot.lane.b32.xlu2 %v3697_v16, %s5498_s13  ;;  %755 = vrot.lane.b32.xlu1 %v3677_v0, %s5498_s13 }
  0x5b   : > { %753 = vrot.lane.b32.xlu0 %v3711_v30, %s5498_s13 }
  0x62   : > { %763 = vrot.lane.b32.xlu2 %v3725_v45, %s5498_s13  ;;  %761 = vrot.lane.b32.xlu1 %v3744_v59, %s5498_s13 }
  0x63   : > { %759 = vrot.lane.b32.xlu0 %v3757_v8, %s5498_s13 }
  0x6a   : > { %769 = vrot.lane.b32.xlu2 %v3771_v27, %s5498_s13  ;;  %767 = vrot.lane.b32.xlu1 %v3778_v34, %s5498_s13 }
  0x6b   : > { %765 = vrot.lane.b32.xlu0 %v3797_v52, %s5498_s13 }
  0x72   : > { %775 = vrot.lane.b32.xlu2 %v3805_v58, %s5498_s13  ;;  %773 = vrot.lane.b32.xlu1 %v3821_v20, %s5498_s13 }
  0x73   : > { %771 = vrot.lane.b32.xlu0 %v3838_v43, %s5498_s13 }
  0x7a   : > { %796 = vrot.lane.b32.xlu2 %v3783_v35, %s3575_s27  ;;  %779 = vrot.lane.b32.xlu1 %v3206_v14, %s5498_s13 }
  0x7b   : > { %777 = vrot.lane.b32.xlu0 %v3863_v22, %s5498_s13 }
  0x82   : > { %802 = vrot.lane.b32.xlu2 %v3721_v41, %s3575_s27  ;;  %800 = vrot.lane.b32.xlu1 %v3763_v15, %s3575_s27  ;;  %v782_v41 = vunpack.c.l.b16 %v387_v24  ;;  %v787_v15 = vshll.u32 %v3206_v14, 16 }
  0x83   : > { %798 = vrot.lane.b32.xlu0 %v3731_v47, %s3575_s27 }
  0x84   : > { %v721_v21 = vpop.permute.xlu2 %720  ;;  %v3947_v47 = vpack.c.b16 %v782_v41, %v782_v41 }
  0x85   : > { %v838_v10 = vsel %vm828_vm1, %v3677_v0, %v721_v21 }
  0x86   : > { %5505 = vst [vmem:[#allocation9_spill] sm:$0xff] %v3947_v47  ;;  %v792_v28 = vshll.u32 %v3947_v47, 16 }
  0x88   : > { %v794_v31 = vrot.slane %v792_v28, 1 }
  0x8a   : > { %808 = vrot.lane.b32.xlu2 %v3811_v6, %s3575_s27  ;;  %806 = vrot.lane.b32.xlu1 %v3816_v13, %s3575_s27  ;;  %v785_v13 = vshrl.u32 %v3206_v14, 16 }
  0x8b   : > { %804 = vrot.lane.b32.xlu0 %v3748_v61, %s3575_s27  ;;  %v789_v61 = vrot.slane %v787_v15, 1  ;;  %v1305_v15 = vshrl.u32 %v3708_v29, 16 }
  0x8c   : > { %v3940_v35 = vpop.permute.xlu2 %722 }
  0x92   : > { %814 = vrot.lane.b32.xlu2 %v3852_v4, %s3575_s27  ;;  %812 = vrot.lane.b32.xlu1 %v3857_v17, %s3575_s27  ;;  %v790_v4 = vor.u32 %v789_v61, %v785_v13  ;;  %v1303_v13 = vshrl.u32 %v3692_v12, 16 }
  0x93   : > { %810 = vrot.lane.b32.xlu0 %v3801_v54, %s3575_s27 }
  0x94   : > { %v3951_v6 = vpop.permute.xlu2 %728  ;;  %v3965_v33 = vsel %vm519_vm0, %v790_v4, %v794_v31  ;;  %v1309_v31 = vshrl.u32 %v3768_v25, 16 }
  0x9a   : > { %820 = vrot.lane.b32.xlu2 %v687_v57, %s3575_s27  ;;  %818 = vrot.lane.b32.xlu1 %v675_v55, %s3575_s27  ;;  %v1313_v57 = vshrl.u32 %v3827_v26, 16 }
  0x9b   : > { %816 = vrot.lane.b32.xlu0 %v3843_v51, %s3575_s27 }
  0x9c   : > { %v3958_v17 = vpop.permute.xlu2 %734  ;;  %v3960_v32 = vpop.permute.xlu1 %716 }
  0x9d   : > { %v3962_v54 = vpop.permute.xlu0 %712 }
  0xa2   : > { %826 = vrot.lane.b32.xlu2 %v3965_v33, %s3575_s27  ;;  %824 = vrot.lane.b32.xlu1 %v711_v11, %s3575_s27 }
  0xa3   : > { %822 = vrot.lane.b32.xlu0 %v3876_v53, %s3575_s27 }
  0xa4   : > { %v3972_v36 = vpop.permute.xlu2 %740  ;;  %v719_v51 = vpop.permute.xlu1 %718 }
  0xa5   : > { %v715_v38 = vpop.permute.xlu0 %714 }
  0xa6   : > { %v832_v48 = vsel %vm828_vm1, %v3717_v39, %v715_v38  ;;  %v1299_v39 = vshrl.u32 %v3699_v18, 16  ;;  %v1307_v38 = vshrl.u32 %v3786_v37, 16 }
  0xaa   : > { %1329 = vrot.lane.b32.xlu2 %v1297_v42, %s3573_s12  ;;  %1327 = vrot.lane.b32.xlu1 %v1295_v44, %s3573_s12 }
  0xab   : > { %1409 = vrot.lane.b32.xlu0 %v1313_v57, %s3575_s27 }
  0xac   : > { %v752_v53 = vpop.permute.xlu2 %751  ;;  %v727_v60 = vpop.permute.xlu1 %726 }
  0xad   : > { %v3985_v55 = vsel %vm861_vm2, %v832_v48, %v752_v53  ;;  %v725_v63 = vpop.permute.xlu0 %724  ;;  %v844_v0 = vsel %vm828_vm1, %v3744_v59, %v727_v60 }
  0xb2   : > { %1333 = vrot.lane.b32.xlu2 %v1301_v3, %s3573_s12  ;;  %1331 = vrot.lane.b32.xlu1 %v1299_v39, %s3573_s12 }
  0xb4   : > { %v758_v11 = vpop.permute.xlu2 %757  ;;  %v733_v24 = vpop.permute.xlu1 %732 }
  0xb5   : > { %v4001_v14 = vsel %vm861_vm2, %v838_v10, %v758_v11  ;;  %v731_v41 = vpop.permute.xlu0 %730  ;;  %v850_v59 = vsel %vm828_vm1, %v3778_v34, %v733_v24  ;;  %v836_v34 = vsel %vm828_vm1, %v3711_v30, %v719_v51  ;;  %v842_v30 = vsel %vm828_vm1, %v3757_v8, %v725_v63  ;;  %v3210_v51 = vld [vmem:[%s5474_s2 + $0x10] sm:$0xff] }
  0xb6   : > { %2116 = vmatpush.bf16.msra.mxu2 %v3210_v51  ;;  %v840_v8 = vsel %vm828_vm1, %v3697_v16, %v3940_v35  ;;  %v848_v16 = vsel %vm828_vm1, %v3797_v52, %v731_v41  ;;  %v1323_v52 = vshrl.u32 %v3835_v40, 16 }
  0xba   : > { %1337 = vrot.lane.b32.xlu2 %v1305_v15, %s3573_s12  ;;  %1335 = vrot.lane.b32.xlu1 %v1303_v13, %s3573_s12 }
  0xbc   : > { %v764_v21 = vpop.permute.xlu2 %763  ;;  %v739_v28 = vpop.permute.xlu1 %738 }
  0xbd   : > { %v4014_v61 = vsel %vm861_vm2, %v844_v0, %v764_v21  ;;  %v737_v4 = vpop.permute.xlu0 %736  ;;  %v856_v10 = vsel %vm828_vm1, %v3821_v20, %v739_v28  ;;  %v830_v20 = vsel %vm828_vm1, %v3685_v5, %v3962_v54 }
  0xbe   : > { %v854_v41 = vsel %vm828_vm1, %v3838_v43, %v737_v4 }
  0xc2   : > { %1341 = vrot.lane.b32.xlu2 %v1309_v31, %s3573_s12  ;;  %1339 = vrot.lane.b32.xlu1 %v1307_v38, %s3573_s12 }
  0xc4   : > { %v770_v44 = vpop.permute.xlu2 %769  ;;  %v750_v53 = vpop.permute.xlu1 %749 }
  0xc5   : > { %v4027_v48 = vsel %vm861_vm2, %v850_v59, %v770_v44  ;;  %v743_v60 = vpop.permute.xlu0 %742  ;;  %v1315_v44 = vshrl.u32 %v3813_v9, 16  ;;  %v863_v28 = vsel %vm861_vm2, %v830_v20, %v750_v53 }
  0xc6   : > { %v860_v43 = vsel %vm828_vm1, %v3863_v22, %v743_v60 }
  0xca   : > { %1345 = vrot.lane.b32.xlu2 %v1313_v57, %s3573_s12  ;;  %1343 = vrot.lane.b32.xlu1 %v1311_v1, %s3573_s12  ;;  %v1317_v57 = vshrl.u32 %v3793_v50, 16 }
  0xcc   : > { %v776_v11 = vpop.permute.xlu2 %775  ;;  %v756_v0 = vpop.permute.xlu1 %755 }
  0xcd   : > { %v4039_v24 = vsel %vm861_vm2, %v856_v10, %v776_v11  ;;  %v4042_v21 = vsel %vm861_vm2, %v836_v34, %v756_v0  ;;  %v4044_v59 = vpop.permute.xlu0 %753  ;;  %v1321_v34 = vshrl.u32 %v3846_v56, 16  ;;  %v1319_v0 = vshrl.u32 %v3859_v19, 16 }
  0xd2   : > { %1349 = vrot.lane.b32.xlu2 %v1317_v57, %s3573_s12  ;;  %1347 = vrot.lane.b32.xlu1 %v1315_v44, %s3573_s12 }
  0xd4   : > { %v797_v5 = vpop.permute.xlu2 %796  ;;  %v762_v54 = vpop.permute.xlu1 %761 }
  0xd5   : > { %v4064_v10 = vsel %vm894_vm3, %v863_v28, %v797_v5  ;;  %v875_v63 = vsel %vm861_vm2, %v842_v30, %v762_v54  ;;  %v760_v11 = vpop.permute.xlu0 %759  ;;  %v846_v30 = vsel %vm828_vm1, %v3725_v45, %v3951_v6  ;;  %v1325_v5 = vshrl.u32 %v3872_v46, 16 }
  0xd6   : > { %3096 = vmatmul.msk.bf16.vlgmr.msra.gmra.mxu0 %vm935_vm4, %v4064_v10  ;;  %v4074_v53 = vsel %vm861_vm2, %v840_v8, %v760_v11  ;;  %v852_v11 = vsel %vm828_vm1, %v3771_v27, %v3958_v17  ;;  %v858_v27 = vsel %vm828_vm1, %v3805_v58, %v3972_v36 }
  0xda   : > { %1353 = vrot.lane.b32.xlu2 %v1321_v34, %s3573_s12  ;;  %1351 = vrot.lane.b32.xlu1 %v1319_v0, %s3573_s12 }
  0xdc   : > { %v4085_v35 = vpop.permute.xlu2 %802  ;;  %v768_v20 = vpop.permute.xlu1 %767 }
  0xdd   : > { %v881_v51 = vsel %vm861_vm2, %v848_v16, %v768_v20  ;;  %v766_v28 = vpop.permute.xlu0 %765 }
  0xde   : > { %v879_v54 = vsel %vm861_vm2, %v846_v30, %v766_v28 }
  0xe2   : > { %1357 = vrot.lane.b32.xlu2 %v1325_v5, %s3573_s12  ;;  %1355 = vrot.lane.b32.xlu1 %v1323_v52, %s3573_s12 }
  0xe4   : > { %v809_v45 = vpop.permute.xlu2 %808  ;;  %v774_v6 = vpop.permute.xlu1 %773 }
  0xe5   : > { %v4103_v8 = vsel %vm894_vm3, %v875_v63, %v809_v45  ;;  %v887_v16 = vsel %vm861_vm2, %v854_v41, %v774_v6  ;;  %v772_v20 = vpop.permute.xlu0 %771 }
  0xe6   : > { %v885_v30 = vsel %vm861_vm2, %v852_v11, %v772_v20  ;;  %v834_v20 = vsel %vm828_vm1, %v3681_v2, %v3960_v32 }
  0xea   : > { %1361 = vrot.lane.b32.xlu2 %v3699_v18, %s5498_s13  ;;  %1359 = vrot.lane.b32.xlu1 %v3750_v62, %s5498_s13 }
  0xec   : > { %v815_v4 = vpop.permute.xlu2 %814  ;;  %v780_v63 = vpop.permute.xlu1 %779 }
  0xed   : > { %v4117_v28 = vsel %vm894_vm3, %v881_v51, %v815_v4  ;;  %v893_v17 = vsel %vm861_vm2, %v860_v43, %v780_v63  ;;  %v778_v41 = vpop.permute.xlu0 %777  ;;  %v867_v4 = vsel %vm861_vm2, %v834_v20, %v4044_v59 }
  0xee   : > { %v891_v45 = vsel %vm861_vm2, %v858_v27, %v778_v41 }
  0xf2   : > { %1365 = vrot.lane.b32.xlu2 %v3692_v12, %s5498_s13  ;;  %1363 = vrot.lane.b32.xlu1 %v3733_v49, %s5498_s13 }
  0xf4   : > { %v821_v22 = vpop.permute.xlu2 %820  ;;  %v801_v60 = vpop.permute.xlu1 %800 }
  0xf5   : > { %v4129_v51 = vsel %vm894_vm3, %v887_v16, %v821_v22  ;;  %v799_v6 = vpop.permute.xlu0 %798  ;;  %v4161_v27 = vsel %vm894_vm3, %v867_v4, %v801_v60  ;;  %v4184_v22 = vsel %vm894_vm3, %v4042_v21, %v4085_v35  ;;  %v390_v4 = vld [vmem:[%s3920_s17 + $0x14] sm:$0x1] }
  0xf6   : > { %5506 = vst [vmem:[#allocation10_spill] sm:$0xff] %v4129_v51  ;;  %v4133_v58 = vsel %vm894_vm3, %v3985_v55, %v799_v6 }
  0xf7   : > { %3097 = vmatmul.msk.bf16.gmra.mxu0 %vm935_vm4, %v4133_v58  ;;  %3145 = vmatmul.msk.bf16.vlgmr.msra.gmra.mxu2 %vm935_vm4, %v4133_v58 }
  0xfa   : > { %1369 = vrot.lane.b32.xlu2 %v3786_v37, %s5498_s13  ;;  %1367 = vrot.lane.b32.xlu1 %v3708_v29, %s5498_s13 }
  0xfc   : > { %v827_v36 = vpop.permute.xlu2 %826  ;;  %v807_v11 = vpop.permute.xlu1 %806 }
  0xfd   : > { %v4144_v16 = vsel %vm894_vm3, %v893_v17, %v827_v36  ;;  %v805_v21 = vpop.permute.xlu0 %804 }
  0xfe   : > { %5507 = vst [vmem:[#allocation11_spill] sm:$0xff] %v4144_v16  ;;  %v4204_v6 = vsel %vm894_vm3, %v4001_v14, %v805_v21 }
 0x102   : > { %1373 = vrot.lane.b32.xlu2 %v3754_v7, %s5498_s13  ;;  %1371 = vrot.lane.b32.xlu1 %v3768_v25, %s5498_s13 }
 0x104   : > { %v4150_v55 = vpop.permute.xlu2 %1329  ;;  %v813_v43 = vpop.permute.xlu1 %812 }
 0x105   : > { %v4158_v63 = vsel %vm894_vm3, %v879_v54, %v813_v43 }
 0x107   : > { %3098 = vmatmul.msk.bf16.gmra.mxu0 %vm935_vm4, %v4161_v27  ;;  %3146 = vmatmul.msk.bf16.gmra.mxu2 %vm935_vm4, %v4161_v27 }
 0x10a   : > { %1377 = vrot.lane.b32.xlu2 %v3813_v9, %s5498_s13  ;;  %1375 = vrot.lane.b32.xlu1 %v3827_v26, %s5498_s13 }
 0x10c   : > { %v1334_v2 = vpop.permute.xlu2 %1333  ;;  %v819_v32 = vpop.permute.xlu1 %818 }
 0x10d   : > { %v4172_v59 = vsel %vm894_vm3, %v885_v30, %v819_v32 }
 0x10e   : > { %5508 = vst [vmem:[#allocation12_spill] sm:$0xff] %v4172_v59 }
 0x112   : > { %1381 = vrot.lane.b32.xlu2 %v3859_v19, %s5498_s13  ;;  %1379 = vrot.lane.b32.xlu1 %v3793_v50, %s5498_s13 }
 0x114   : > { %v1338_v54 = vpop.permute.xlu2 %1337  ;;  %v825_v17 = vpop.permute.xlu1 %824 }
 0x115   : > { %v4179_v41 = vsel %vm894_vm3, %v891_v45, %v825_v17 }
 0x116   : > { %5509 = vst [vmem:[#allocation13_spill] sm:$0xff] %v4179_v41 }
 0x117   : > { %3099 = vmatmul.msk.bf16.gmra.mxu0 %vm935_vm4, %v4184_v22  ;;  %3147 = vmatmul.msk.bf16.gmra.mxu2 %vm935_vm4, %v4184_v22 }
 0x11a   : > { %1385 = vrot.lane.b32.xlu2 %v3835_v40, %s5498_s13  ;;  %1383 = vrot.lane.b32.xlu1 %v3846_v56, %s5498_s13 }
 0x11c   : > { %v1342_v30 = vpop.permute.xlu2 %1341  ;;  %v4194_v45 = vpop.permute.xlu1 %1327 }
 0x122   : > { %1389 = vrot.lane.b32.xlu2 %v3947_v47, %s5498_s13  ;;  %1387 = vrot.lane.b32.xlu1 %v3872_v46, %s5498_s13 }
 0x124   : > { %v1346_v35 = vpop.permute.xlu2 %1345  ;;  %v4200_v60 = vpop.permute.xlu1 %1331 }
 0x127   : > { %3100 = vmatmul.msk.bf16.gmra.mxu0 %vm935_vm4, %v4204_v6  ;;  %3148 = vmatmul.msk.bf16.gmra.mxu2 %vm935_vm4, %v4204_v6 }
 0x12a   : > { %1395 = vrot.lane.b32.xlu2 %v1299_v39, %s3575_s27  ;;  %1393 = vrot.lane.b32.xlu1 %v1297_v42, %s3575_s27  ;;  %v4228_v39 = vsel %vm894_vm3, %v4074_v53, %v807_v11 }
 0x12c   : > { %v1350_v36 = vpop.permute.xlu2 %1349  ;;  %v1336_v20 = vpop.permute.xlu1 %1335 }
 0x132   : > { %1399 = vrot.lane.b32.xlu2 %v1303_v13, %s3575_s27  ;;  %1397 = vrot.lane.b32.xlu1 %v1301_v3, %s3575_s27  ;;  %v1391_v13 = vshrl.u32 %v3947_v47, 16 }
 0x134   : > { %v4222_v14 = vpop.permute.xlu2 %1353  ;;  %v4224_v43 = vpop.permute.xlu1 %1339  ;;  %2437 = vrot.lane.b32.xlu0 %v1391_v13, %s3573_s12 }
 0x137   : > { %3101 = vmatmul.msk.bf16.gmra.mxu0 %vm935_vm4, %v4228_v39  ;;  %3149 = vmatmul.msk.bf16.gmra.mxu2 %vm935_vm4, %v4228_v39 }
 0x13a   : > { %1403 = vrot.lane.b32.xlu2 %v1307_v38, %s3575_s27  ;;  %1401 = vrot.lane.b32.xlu1 %v1305_v15, %s3575_s27 }
 0x13c   : > { %v4240_v42 = vpop.permute.xlu2 %1357  ;;  %v4242_v3 = vpop.permute.xlu1 %1343 }
 0x142   : > { %1407 = vrot.lane.b32.xlu2 %v1311_v1, %s3575_s27  ;;  %1405 = vrot.lane.b32.xlu1 %v1309_v31, %s3575_s27  ;;  %v1432_v31 = vsel %vm828_vm1, %v3733_v49, %v1334_v2  ;;  %v1436_v49 = vsel %vm828_vm1, %v3708_v29, %v1338_v54  ;;  %v1440_v29 = vsel %vm828_vm1, %v3768_v25, %v1342_v30  ;;  %v3207_v25 = vld [vmem:[%s3920_s17 + $0xc] sm:$0xff]  ;;  %v3211_v30 = vld [vmem:[%s5474_s2 + $0x18] sm:$0xff] }
 0x143   : > { %2480 = vmatpush.bf16.msra.mxu3 %v3211_v30 }
 0x144   : > { %v4252_v38 = vpop.permute.xlu2 %1361  ;;  %v4254_v15 = vpop.permute.xlu1 %1347 }
 0x147   : > { %3102 = vmatmul.msk.bf16.gmra.mxu0 %vm935_vm4, %v4103_v8  ;;  %3150 = vmatmul.msk.bf16.gmra.mxu2 %vm935_vm4, %v4103_v8 }
 0x14a   : > { %1413 = vrot.lane.b32.xlu2 %v1317_v57, %s3575_s27  ;;  %1411 = vrot.lane.b32.xlu1 %v1315_v44, %s3575_s27  ;;  %v2076_v57 = vunpack.c.l.b16 %v390_v4  ;;  %v811_v44 = vpop.permute.xlu0 %810 }
 0x14c   : > { %v1366_v1 = vpop.permute.xlu2 %1365  ;;  %v4271_v11 = vpop.permute.xlu1 %1351  ;;  %v4287_v21 = vpack.c.b16 %v2076_v57, %v2076_v57  ;;  %v1434_v57 = vsel %vm828_vm1, %v3692_v12, %v1336_v20 }
 0x14d   : > { %v4269_v53 = vsel %vm861_vm2, %v1432_v31, %v1366_v1 }
 0x14e   : > { %2439 = vrot.lane.b32.xlu0 %v4287_v21, %s5498_s13 }
 0x152   : > { %1417 = vrot.lane.b32.xlu2 %v1321_v34, %s3575_s27  ;;  %1415 = vrot.lane.b32.xlu1 %v1319_v0, %s3575_s27  ;;  %v4291_v34 = vsel %vm894_vm3, %v4014_v61, %v811_v44 }
 0x153   : > { %v4312_v31 = vpop.f32.mrf.mxu0 }
 0x154   : > { %v1370_v2 = vpop.permute.xlu2 %1369  ;;  %v4285_v17 = vpop.permute.xlu1 %1355 }
 0x155   : > { %v4283_v32 = vsel %vm861_vm2, %v1436_v49, %v1370_v2 }
 0x157   : > { %3103 = vmatmul.msk.bf16.gmra.mxu0 %vm935_vm4, %v4291_v34  ;;  %3151 = vmatmul.msk.bf16.gmra.mxu2 %vm935_vm4, %v4291_v34 }
 0x15a   : > { %1421 = vrot.lane.b32.xlu2 %v1325_v5, %s3575_s27  ;;  %1419 = vrot.lane.b32.xlu1 %v1323_v52, %s3575_s27  ;;  %v1444_v5 = vsel %vm828_vm1, %v3827_v26, %v1346_v35  ;;  %v1448_v26 = vsel %vm828_vm1, %v3793_v50, %v1350_v36  ;;  %v1452_v50 = vsel %vm828_vm1, %v3846_v56, %v4222_v14 }
 0x15b   : > { %v4336_v44 = vpop.f32.mrf.mxu0 }
 0x15c   : > { %v1374_v61 = vpop.permute.xlu2 %1373  ;;  %v4310_v54 = vpop.permute.xlu1 %1359 }
 0x15d   : > { %v4308_v0 = vsel %vm861_vm2, %v1440_v29, %v1374_v61  ;;  %v2079_v61 = vshrl.u32 %v3207_v25, 16 }
 0x162   : > { %1423 = vrot.lane.b32.xlu1 %v1391_v13, %s3575_s27  ;;  %v2081_v13 = vshll.u32 %v3207_v25, 16 }
 0x164   : > { %v1378_v1 = vpop.permute.xlu2 %1377  ;;  %v4320_v52 = vpop.permute.xlu1 %1363 }
 0x165   : > { %v4318_v4 = vsel %vm861_vm2, %v1444_v5, %v1378_v1  ;;  %v2083_v5 = vrot.slane %v2081_v13, 1  ;;  %v1438_v1 = vsel %vm828_vm1, %v3786_v37, %v4224_v43  ;;  %v1456_v37 = vsel %vm828_vm1, %v3872_v46, %v4240_v42  ;;  %v3209_v46 = vld [vmem:[%s5474_s2 + $0x8] sm:$0xff] }
 0x166   : > { %1745 = vmatpush.bf16.msra.mxu1 %v3209_v46 }
 0x167   : > { %3104 = vmatmul.msk.bf16.gmra.mxu0 %vm935_vm4, %v4158_v63  ;;  %3152 = vmatmul.msk.bf16.gmra.mxu2 %vm935_vm4, %v4158_v63  ;;  %v2084_v36 = vor.u32 %v2083_v5, %v2079_v61 }
 0x16a   : > { %2066 = vrot.lane.b32.xlu1 %v3965_v33, %s3573_s12  ;;  %v2086_v33 = vshll.u32 %v4287_v21, 16  ;;  %s298_s12 = scalar_lea.vmem [#allocation4], %s5322_s15 }
 0x16b   : > { %s5387_s14 = sshll.u32 %s298_s12, 4  ;;  %s2845_s14 = int_to_ptr.vmem [resolvable:$true] %s5387_s14 }
 0x16c   : > { %v1382_v35 = vpop.permute.xlu2 %1381  ;;  %v1368_v2 = vpop.permute.xlu1 %1367  ;;  %v2088_v20 = vrot.slane %v2086_v33, 1  ;;  %v1533_v33 = vshll.u32 %v4133_v58, 16 }
 0x16d   : > { %v4339_v49 = vsel %vm861_vm2, %v1448_v26, %v1382_v35  ;;  %v4342_v29 = vsel %vm861_vm2, %v1434_v57, %v1368_v2 }
 0x16e   : > { %v2089_v56 = vsel %vm519_vm0, %v2084_v36, %v2088_v20 }
 0x172   : > { %2073 = vrot.lane.b32.xlu1 %v3207_v25, %s5498_s13  ;;  %v1442_v25 = vsel %vm828_vm1, %v3754_v7, %v4242_v3  ;;  %v1428_v7 = vsel %vm828_vm1, %v3750_v62, %v4150_v55  ;;  %v1535_v3 = vrot.slane %v1533_v33, 1  ;;  %s3453_s13 = scalar_lea.hbm %s5476_s4, 2 }
 0x174   : > { %v1386_v12 = vpop.permute.xlu2 %1385  ;;  %v4352_v30 = vpop.f32.mrf.mxu0 }
 0x175   : > { %v4355_v26 = vsel %vm861_vm2, %v1452_v50, %v1386_v12  ;;  %v1372_v35 = vpop.permute.xlu1 %1371  ;;  %v817_v50 = vpop.permute.xlu0 %816  ;;  %v1460_v12 = vsel %vm861_vm2, %v1428_v7, %v4252_v38  ;;  %v1553_v38 = vshll.u32 %v4184_v22, 16 }
 0x176   : > { %v4358_v13 = vsel %vm861_vm2, %v1438_v1, %v1372_v35  ;;  %v4402_v55 = vsel %vm894_vm3, %v4027_v48, %v817_v50  ;;  %v1551_v50 = vshrl.u32 %v4184_v22, 16 }
 0x177   : > { %3105 = vmatmul.msk.bf16.gmra.mxu0 %vm935_vm4, %v4117_v28  ;;  %3153 = vmatmul.msk.bf16.gmra.mxu2 %vm935_vm4, %v4117_v28  ;;  %5510 = vst [vmem:[#allocation14_spill] sm:$0xff] %v4402_v55  ;;  %v1555_v48 = vrot.slane %v1553_v38, 1 }
 0x17a   : > { %v4365_v14 = vpop.f32.mrf.mxu2  ;;  %2090 = vrot.lane.b32.xlu1 %v2089_v56, %s3575_s27  ;;  %v1531_v56 = vshrl.u32 %v4133_v58, 16 }
 0x17c   : > { %v1390_v43 = vpop.permute.xlu2 %1389  ;;  %v4374_v57 = vpop.f32.mrf.mxu0  ;;  %v1536_v58 = vor.u32 %v1535_v3, %v1531_v56  ;;  %v1450_v3 = vsel %vm828_vm1, %v3859_v19, %v4271_v11  ;;  %v1556_v56 = vor.u32 %v1555_v48, %v1551_v50 }
 0x17d   : > { %v4377_v2 = vsel %vm861_vm2, %v1456_v37, %v1390_v43  ;;  %v1376_v61 = vpop.permute.xlu1 %1375  ;;  %v1446_v37 = vsel %vm828_vm1, %v3813_v9, %v4254_v15 }
 0x17e   : > { %v4380_v5 = vsel %vm861_vm2, %v1442_v25, %v1376_v61 }
 0x182   : > { %v4389_v42 = vpop.f32.mrf.mxu2 }
 0x184   : > { %v1396_v36 = vpop.permute.xlu2 %1395  ;;  %v4393_v20 = vpop.f32.mrf.mxu0 }
 0x185   : > { %v1492_v1 = vsel %vm894_vm3, %v1460_v12, %v1396_v36  ;;  %v1380_v35 = vpop.permute.xlu1 %1379 }
 0x186   : > { %v1537_v62 = vshll.u32 %v1492_v1, 16  ;;  %v4405_v43 = vsel %vm861_vm2, %v1446_v37, %v1380_v35  ;;  %v1573_v1 = vshll.u32 %v4228_v39, 16 }
 0x187   : > { %5511 = vst [vmem:[#allocation15_spill] sm:$0xff] %v4405_v43  ;;  %3106 = vmatmul.msk.bf16.gmra.mxu0 %vm935_vm4, %v4402_v55  ;;  %3154 = vmatmul.msk.bf16.gmra.mxu2 %vm935_vm4, %v4402_v55 }
 0x188   : > { %v1539_v25 = vrot.slane %v1537_v62, 1 }
 0x18a   : > { %v4413_v9 = vsel %vm519_vm0, %v1536_v58, %v1539_v25  ;;  %v4415_v15 = vpop.f32.mrf.mxu2  ;;  %v1571_v25 = vshrl.u32 %v4228_v39, 16  ;;  %v1454_v58 = vsel %vm828_vm1, %v3835_v40, %v4285_v17  ;;  %v1426_v40 = vsel %vm828_vm1, %v3703_v23, %v4194_v45 }
 0x18b   : > { %3168 = vmatmul.msk.bf16.vlgmr.msra.gmra.mxu3 %vm935_vm4, %v4413_v9  ;;  %v2441_v45 = vshrl.u32 %v4287_v21, 16 }
 0x18c   : > { %v1400_v61 = vpop.permute.xlu2 %1399  ;;  %v4419_v33 = vpop.f32.mrf.mxu0 }
 0x18d   : > { %v1496_v46 = vsel %vm894_vm3, %v4269_v53, %v1400_v61  ;;  %v1384_v7 = vpop.permute.xlu1 %1383  ;;  %v1575_v53 = vrot.slane %v1573_v1, 1  ;;  %v1458_v1 = vsel %vm861_vm2, %v1426_v40, %v4310_v54  ;;  %2443 = vrot.lane.b32.xlu0 %v2441_v45, %s3575_s27  ;;  %s5392_s27 = sshll.u32 %s304_s24, 4  ;;  %s2859_s27 = int_to_ptr.vmem [resolvable:$true] %s5392_s27 }
 0x18e   : > { %v1557_v12 = vshll.u32 %v1496_v46, 16  ;;  %v4428_v36 = vsel %vm861_vm2, %v1450_v3, %v1384_v7 }
 0x18f   : > { %5512 = vst [vmem:[#allocation16_spill] sm:$0xff] %v4428_v36  ;;  %v1576_v7 = vor.u32 %v1575_v53, %v1571_v25 }
 0x190   : > { %v1559_v35 = vrot.slane %v1557_v12, 1 }
 0x192   : > { %v4432_v37 = vsel %vm519_vm0, %v1556_v56, %v1559_v35  ;;  %v4434_v62 = vpop.f32.mrf.mxu2  ;;  %v1521_v56 = vshrl.u32 %v4064_v10, 16 }
 0x194   : > { %v1404_v38 = vpop.permute.xlu2 %1403  ;;  %v4436_v22 = vpop.f32.mrf.mxu0 }
 0x195   : > { %v1500_v19 = vsel %vm894_vm3, %v4283_v32, %v1404_v38  ;;  %v1388_v11 = vpop.permute.xlu1 %1387  ;;  %v1523_v32 = vshll.u32 %v4064_v10, 16 }
 0x196   : > { %v1577_v48 = vshll.u32 %v1500_v19, 16  ;;  %v4445_v61 = vsel %vm861_vm2, %v1454_v58, %v1388_v11  ;;  %v1543_v19 = vshll.u32 %v4161_v27, 16  ;;  %v1430_v58 = vsel %vm828_vm1, %v3699_v18, %v4200_v60 }
 0x197   : > { %5513 = vst [vmem:[#allocation17_spill] sm:$0xff] %v4445_v61  ;;  %3107 = vmatmul.msk.bf16.gmra.mxu0 %vm935_vm4, %v4172_v59  ;;  %3155 = vmatmul.msk.bf16.gmra.mxu2 %vm935_vm4, %v4172_v59  ;;  %v1525_v12 = vrot.slane %v1523_v32, 1  ;;  %v1541_v32 = vshrl.u32 %v4161_v27, 16  ;;  %v1563_v18 = vshll.u32 %v4204_v6, 16  ;;  %v1131_v61 = vmul.f32 %v4393_v20, %v4393_v20 }
 0x198   : > { %v1579_v46 = vrot.slane %v1577_v48, 1  ;;  %v1545_v48 = vrot.slane %v1543_v19, 1 }
 0x199   : > { %v1526_v38 = vor.u32 %v1525_v12, %v1521_v56  ;;  %v1561_v56 = vshrl.u32 %v4204_v6, 16 }
 0x19a   : > { %v4453_v39 = vsel %vm519_vm0, %v1576_v7, %v1579_v46  ;;  %v4455_v50 = vpop.f32.mrf.mxu2  ;;  %v1462_v46 = vsel %vm861_vm2, %v1430_v58, %v4320_v52  ;;  %v1546_v40 = vor.u32 %v1545_v48, %v1541_v32 }
 0x19c   : > { %v4460_v17 = vpop.f32.mrf.mxu0 }
 0x19d   : > { %v1394_v3 = vpop.permute.xlu1 %1393 }
 0x19e   : > { %v1490_v35 = vsel %vm894_vm3, %v1458_v1, %v1394_v3  ;;  %v1565_v1 = vrot.slane %v1563_v18, 1  ;;  %v1583_v18 = vshll.u32 %v4103_v8, 16 }
 0x19f   : > { %v1527_v53 = vshll.u32 %v1490_v35, 16 }
 0x1a0   : > { %v1566_v19 = vor.u32 %v1565_v1, %v1561_v56 }
 0x1a1   : > { %v1529_v11 = vrot.slane %v1527_v53, 1 }
 0x1a2   : > { %v4467_v25 = vpop.f32.mrf.mxu2 }
 0x1a3   : > { %v1530_v23 = vsel %vm519_vm0, %v1526_v38, %v1529_v11 }
 0x1a4   : > { %v4474_v54 = vpop.f32.mrf.mxu0  ;;  %3118 = vmatmul.msk.bf16.vlgmr.msra.gmra.mxu1 %vm935_vm4, %v1530_v23  ;;  %v823_v23 = vpop.permute.xlu0 %822 }
 0x1a5   : > { %5514 = vst [vmem:[#allocation18_spill] sm:$0xff] %v4474_v54  ;;  %v1398_v10 = vpop.permute.xlu1 %1397  ;;  %v1135_v59 = vmul.f32 %v4474_v54, %v4474_v54 }
 0x1a6   : > { %v1494_v7 = vsel %vm894_vm3, %v1462_v46, %v1398_v10 }
 0x1a7   : > { %v1547_v21 = vshll.u32 %v1494_v7, 16  ;;  %3108 = vmatmul.msk.bf16.gmra.mxu0 %vm935_vm4, %v4129_v51  ;;  %3156 = vmatmul.msk.bf16.gmra.mxu2 %vm935_vm4, %v4129_v51 }
 0x1a9   : > { %v1549_v60 = vrot.slane %v1547_v21, 1 }
 0x1aa   : > { %v4487_v3 = vpop.f32.mrf.mxu2 }
 0x1ab   : > { %v1550_v52 = vsel %vm519_vm0, %v1546_v40, %v1549_v60  ;;  %v1127_v40 = vmul.f32 %v4312_v31, %v4312_v31 }
 0x1ac   : > { %v4490_v12 = vpop.f32.mrf.mxu0  ;;  %3169 = vmatmul.msk.bf16.gmra.mxu3 %vm935_vm4, %v1550_v52 }
 0x1ad   : > { %5515 = vst [vmem:[#allocation19_spill] sm:$0xff] %v4490_v12  ;;  %v1402_v27 = vpop.permute.xlu1 %1401  ;;  %v1159_v47 = vsel %vm861_vm2, %v1127_v40, 0.0  ;;  %v1132_v40 = vmul.f32 %v4419_v33, %v4419_v33 }
 0x1ae   : > { %v1498_v35 = vsel %vm894_vm3, %v4342_v29, %v1402_v27  ;;  %v4509_v29 = vsel %vm894_vm3, %v4039_v24, %v823_v23  ;;  %v1057_v27 = vsel %vm861_vm2, %v4312_v31, 0.0  ;;  %v1585_v23 = vrot.slane %v1583_v18, 1 }
 0x1af   : > { %v1567_v53 = vshll.u32 %v1498_v35, 16  ;;  %5517 = vst [vmem:[#allocation21_spill] sm:$0xff] %v4509_v29  ;;  %v1064_v18 = vsel %vm861_vm2, %v4393_v20, 0.0 }
 0x1b1   : > { %v1569_v38 = vrot.slane %v1567_v53, 1  ;;  %v1060_v53 = vsel %vm861_vm2, %v4352_v30, 0.0 }
 0x1b2   : > { %v4496_v11 = vpop.f32.mrf.mxu2 }
 0x1b3   : > { %v4499_v45 = vsel %vm519_vm0, %v1566_v19, %v1569_v38  ;;  %v1130_v38 = vmul.f32 %v4374_v57, %v4374_v57 }
 0x1b4   : > { %v4501_v58 = vpop.f32.mrf.mxu0  ;;  %3119 = vmatmul.msk.bf16.gmra.mxu1 %vm935_vm4, %v4413_v9 }
 0x1b5   : > { %5516 = vst [vmem:[#allocation20_spill] sm:$0xff] %v4501_v58  ;;  %v4505_v10 = vpop.permute.xlu1 %1405 }
 0x1b7   : > { %3109 = vmatmul.msk.bf16.gmra.mxu0 %vm935_vm4, %v4509_v29  ;;  %3157 = vmatmul.msk.bf16.gmra.mxu2 %vm935_vm4, %v4509_v29  ;;  %v1581_v29 = vshrl.u32 %v4103_v8, 16  ;;  %v2268_v8 = vmul.f32 %v4365_v14, %v4365_v14 }
 0x1ba   : > { %v4515_v6 = vpop.f32.mrf.mxu2 }
 0x1bc   : > { %v4517_v48 = vpop.f32.mrf.mxu0  ;;  %3170 = vmatmul.msk.bf16.gmra.mxu3 %vm935_vm4, %v4432_v37 }
 0x1bd   : > { %v1412_v9 = vpop.permute.xlu1 %1411 }
 0x1be   : > { %v4523_v46 = vsel %vm894_vm3, %v4318_v4, %v1412_v9  ;;  %v1128_v4 = vmul.f32 %v4336_v44, %v4336_v44  ;;  %v1593_v9 = vshll.u32 %v4291_v34, 16 }
 0x1c0   : > { %v1160_v56 = vsel %vm861_vm2, %v1128_v4, 0.0  ;;  %v1062_v4 = vsel %vm861_vm2, %v4374_v57, 0.0 }
 0x1c1   : > { %v1161_v36 = vadd.f32 %v1160_v56, %v1159_v47  ;;  %v1166_v47 = vsel %vm861_vm2, %v1131_v61, 0.0  ;;  %v1066_v56 = vsel %vm861_vm2, %v4419_v33, 0.0 }
 0x1c2   : > { %v4525_v24 = vpop.f32.mrf.mxu2 }
 0x1c4   : > { %v4527_v7 = vpop.f32.mrf.mxu0  ;;  %3120 = vmatmul.msk.bf16.gmra.mxu1 %vm935_vm4, %v1550_v52  ;;  %v1129_v52 = vmul.f32 %v4352_v30, %v4352_v30 }
 0x1c5   : > { %v1416_v32 = vpop.permute.xlu1 %1415 }
 0x1c6   : > { %v4532_v21 = vsel %vm894_vm3, %v4339_v49, %v1416_v32  ;;  %v1058_v49 = vsel %vm861_vm2, %v4336_v44, 0.0 }
 0x1c7   : > { %5518 = vst [vmem:[#allocation22_spill] sm:$0xff] %v4532_v21  ;;  %3110 = vmatmul.msk.bf16.gmra.mxu0 %vm935_vm4, %v4179_v41  ;;  %3158 = vmatmul.msk.bf16.gmra.mxu2 %vm935_vm4, %v4179_v41  ;;  %v1059_v32 = vadd.f32 %v1058_v49, %v1057_v27  ;;  %v1162_v41 = vsel %vm861_vm2, %v1129_v52, 0.0  ;;  %v4577_v49 = vrot.slane %v1593_v9, 1  ;;  %v1068_v9 = vsel %vm861_vm2, %v4436_v22, 0.0 }
 0x1c8   : > { %v1163_v52 = vadd.f32 %v1162_v41, %v1161_v36  ;;  %v1070_v21 = vsel %vm861_vm2, %v4460_v17, 0.0 }
 0x1c9   : > { %v1061_v51 = vadd.f32 %v1060_v53, %v1059_v32  ;;  %v1133_v53 = vmul.f32 %v4436_v22, %v4436_v22  ;;  %v1134_v32 = vmul.f32 %v4460_v17, %v4460_v17 }
 0x1ca   : > { %v4541_v60 = vpop.f32.mrf.mxu2 }
 0x1cb   : > { %v1063_v27 = vadd.f32 %v1062_v4, %v1061_v51  ;;  %v2269_v51 = vmul.f32 %v4389_v42, %v4389_v42 }
 0x1cc   : > { %v4551_v1 = vpop.f32.mrf.mxu0  ;;  %3171 = vmatmul.msk.bf16.gmra.mxu3 %vm935_vm4, %v4499_v45 }
 0x1cd   : > { %5519 = vst [vmem:[#allocation23_spill] sm:$0xff] %v4551_v1  ;;  %v1420_v35 = vpop.permute.xlu1 %1419  ;;  %v1065_v41 = vadd.f32 %v1064_v18, %v1063_v27  ;;  %v1170_v27 = vsel %vm861_vm2, %v1133_v53, 0.0  ;;  %v1172_v53 = vsel %vm861_vm2, %v1134_v32, 0.0  ;;  %v1174_v32 = vsel %vm861_vm2, %v1135_v59, 0.0 }
 0x1ce   : > { %v4562_v19 = vsel %vm894_vm3, %v4355_v26, %v1420_v35  ;;  %v1164_v26 = vsel %vm861_vm2, %v1130_v38, 0.0  ;;  %v2199_v38 = vsel %vm861_vm2, %v4389_v42, 0.0 }
 0x1cf   : > { %5520 = vst [vmem:[#allocation24_spill] sm:$0xff] %v4562_v19  ;;  %v4581_v19 = vor.u32 %v1585_v23, %v1581_v29  ;;  %v1165_v36 = vadd.f32 %v1164_v26, %v1163_v52  ;;  %v1168_v23 = vsel %vm861_vm2, %v1132_v40, 0.0  ;;  %v2198_v26 = vsel %vm861_vm2, %v4365_v14, 0.0 }
 0x1d0   : > { %v1067_v52 = vadd.f32 %v1066_v56, %v1065_v41  ;;  %v2300_v40 = vsel %vm861_vm2, %v2268_v8, 0.0  ;;  %v2201_v8 = vsel %vm861_vm2, %v4415_v15, 0.0 }
 0x1d1   : > { %v1167_v18 = vadd.f32 %v1166_v47, %v1165_v36  ;;  %v2200_v47 = vadd.f32 %v2199_v38, %v2198_v26  ;;  %v1072_v36 = vsel %vm861_vm2, %v4474_v54, 0.0  ;;  %v1074_v26 = vsel %vm861_vm2, %v4490_v12, 0.0 }
 0x1d2   : > { %v4579_v35 = vpop.f32.mrf.mxu2  ;;  %v1069_v56 = vadd.f32 %v1068_v9, %v1067_v52 }
 0x1d3   : > { %v1169_v41 = vadd.f32 %v1168_v23, %v1167_v18  ;;  %v2271_v23 = vmul.f32 %v4434_v62, %v4434_v62  ;;  %v1137_v18 = vmul.f32 %v4501_v58, %v4501_v58  ;;  %v2202_v52 = vadd.f32 %v2201_v8, %v2200_v47 }
 0x1d4   : > { %v4594_v29 = vpop.f32.mrf.mxu0  ;;  %3121 = vmatmul.msk.bf16.gmra.mxu1 %vm935_vm4, %v4432_v37  ;;  %v2270_v37 = vmul.f32 %v4415_v15, %v4415_v15  ;;  %v1071_v38 = vadd.f32 %v1070_v21, %v1069_v56  ;;  %v1076_v56 = vsel %vm861_vm2, %v4501_v58, 0.0  ;;  %v1138_v47 = vmul.f32 %v4517_v48, %v4517_v48 }
 0x1d5   : > { %5521 = vst [vmem:[#allocation25_spill] sm:$0xff] %v4594_v29  ;;  %v1424_v61 = vpop.permute.xlu1 %1423 }
 0x1d6   : > { %v4605_v4 = vsel %vm894_vm3, %v4377_v2, %v1424_v61  ;;  %v2301_v2 = vsel %vm861_vm2, %v2269_v51, 0.0  ;;  %v1136_v61 = vmul.f32 %v4490_v12, %v4490_v12  ;;  %v1171_v51 = vadd.f32 %v1170_v27, %v1169_v41 }
 0x1d7   : > { %5522 = vst [vmem:[#allocation26_spill] sm:$0xff] %v4605_v4  ;;  %3111 = vmatmul.msk.bf16.gmra.mxu0 %vm935_vm4, %v4144_v16  ;;  %3159 = vmatmul.msk.bf16.gmra.mxu2 %vm935_vm4, %v4144_v16  ;;  %v2303_v4 = vsel %vm861_vm2, %v2270_v37, 0.0  ;;  %v2203_v16 = vsel %vm861_vm2, %v4434_v62, 0.0  ;;  %v2302_v37 = vadd.f32 %v2301_v2, %v2300_v40  ;;  %v1073_v54 = vadd.f32 %v1072_v36, %v1071_v38 }
 0x1d8   : > { %v1173_v43 = vadd.f32 %v1172_v53, %v1171_v51  ;;  %v2272_v27 = vmul.f32 %v4455_v50, %v4455_v50  ;;  %v1176_v59 = vsel %vm861_vm2, %v1136_v61, 0.0  ;;  %v2204_v2 = vadd.f32 %v2203_v16, %v2202_v52 }
 0x1d9   : > { %v2304_v40 = vadd.f32 %v2303_v4, %v2302_v37  ;;  %v1075_v8 = vadd.f32 %v1074_v26, %v1073_v54  ;;  %v2305_v53 = vsel %vm861_vm2, %v2271_v23, 0.0  ;;  %v1178_v36 = vsel %vm861_vm2, %v1137_v18, 0.0 }
 0x1da   : > { %v4632_v9 = vpop.f32.mrf.mxu2  ;;  %v1175_v41 = vadd.f32 %v1174_v32, %v1173_v43  ;;  %v1078_v51 = vsel %vm861_vm2, %v4517_v48, 0.0  ;;  %v1139_v61 = vmul.f32 %v4527_v7, %v4527_v7  ;;  %v2205_v38 = vsel %vm861_vm2, %v4455_v50, 0.0 }
 0x1db   : > { %v1077_v12 = vadd.f32 %v1076_v56, %v1075_v8  ;;  %v1502_v16 = vsel %vm894_vm3, %v4358_v13, %v4505_v10  ;;  %v2307_v43 = vsel %vm861_vm2, %v2272_v27, 0.0  ;;  %v1180_v54 = vsel %vm861_vm2, %v1138_v47, 0.0 }
 0x1dc   : > { %v4641_v55 = vpop.f32.mrf.mxu0  ;;  %3172 = vmatmul.msk.bf16.gmra.mxu3 %vm935_vm4, %v4453_v39  ;;  %v1177_v58 = vadd.f32 %v1176_v59, %v1175_v41  ;;  %v1080_v4 = vsel %vm861_vm2, %v4527_v7, 0.0  ;;  %v1140_v23 = vmul.f32 %v4551_v1, %v4551_v1  ;;  %v2306_v32 = vadd.f32 %v2305_v53, %v2304_v40 }
 0x1dd   : > { %v2067_v21 = vpop.permute.xlu1 %2066  ;;  %v2273_v26 = vmul.f32 %v4467_v25, %v4467_v25  ;;  %v1079_v52 = vadd.f32 %v1078_v51, %v1077_v12  ;;  %v1587_v59 = vshll.u32 %v1502_v16, 16  ;;  %v1182_v13 = vsel %vm861_vm2, %v1139_v61, 0.0  ;;  %v1408_v51 = vpop.permute.xlu2 %1407 }
 0x1de   : > { %v1179_v18 = vadd.f32 %v1178_v36, %v1177_v58  ;;  %v1082_v10 = vsel %vm861_vm2, %v4551_v1, 0.0  ;;  %v1141_v27 = vmul.f32 %v4594_v29, %v4594_v29  ;;  %v2206_v56 = vadd.f32 %v2205_v38, %v2204_v2 }
 0x1df   : > { %v2308_v47 = vadd.f32 %v2307_v43, %v2306_v32  ;;  %v1081_v40 = vadd.f32 %v1080_v4, %v1079_v52  ;;  %v2207_v58 = vsel %vm861_vm2, %v4467_v25, 0.0  ;;  %v1184_v53 = vsel %vm861_vm2, %v1140_v23, 0.0 }
 0x1e0   : > { %v1181_v41 = vadd.f32 %v1180_v54, %v1179_v18  ;;  %v1084_v36 = vsel %vm861_vm2, %v4594_v29, 0.0  ;;  %v1142_v2 = vmul.f32 %v4641_v55, %v4641_v55  ;;  %v2309_v61 = vsel %vm861_vm2, %v2273_v26, 0.0  ;;  %v3432_v29 = vld [vmem:[%s3920_s17] sm:$0xff]  ;;  %s5346_s17 = scalar_lea.vmem [#allocation2], %s3021_s16  ;;  %s5389_s16 = sshll.u32 %s2842_s7, 4  ;;  %s2847_s16 = int_to_ptr.hbm [resolvable:$true] %s5389_s16 }
 0x1e1   : > { %v1083_v16 = vadd.f32 %v1082_v10, %v1081_v40  ;;  %v1589_v43 = vrot.slane %v1587_v59, 1  ;;  %v1186_v54 = vsel %vm861_vm2, %v1141_v27, 0.0  ;;  %v1086_v4 = vsel %vm861_vm2, %v4641_v55, 0.0  ;;  %s2810_s7 = scalar_lea.sflag [#allocation5], %s5380_s8  ;;  %s3447_s9 = sshra.s32 %s2847_s16, 4  ;;  %s3448_s9 = int_to_ptr.hbm [resolvable:$true] %s3447_s9 }
 0x1e2   : > { %v4671_v37 = vpop.f32.mrf.mxu2  ;;  %v1183_v38 = vadd.f32 %v1182_v13, %v1181_v41  ;;  %v2274_v32 = vmul.f32 %v4487_v3, %v4487_v3  ;;  %v2093_v1 = vsel %vm828_vm1, %v3432_v29, %v2067_v21  ;;  %v1504_v26 = vsel %vm894_vm3, %v4308_v0, %v1408_v51  ;;  %s3449_s10 = scalar_lea.hbm %s3448_s9, 1  ;;  %p3454_p1 = scmp.lt.s32.totalorder %s3448_s9, %s5476_s4 }
 0x1e3   : > { %v1085_v52 = vadd.f32 %v1084_v36, %v1083_v16  ;;  %v1188_v59 = vsel %vm861_vm2, %v1142_v2, 0.0  ;;  %v2209_v10 = vsel %vm861_vm2, %v4487_v3, 0.0  ;;  %v2310_v27 = vadd.f32 %v2309_v61, %v2308_v47  ;;  %p3450_p12 = scmp.ne.s32.totalorder %s3448_s9, %s3449_s10  ;;  %p3455_p2 = scmp.lt.s32.totalorder %s3453_s13, %s3449_s10 }
 0x1e4   : > { %v1017_v8 = vpop.f32.mrf.mxu0  ;;  %3122 = vmatmul.msk.bf16.gmra.mxu1 %vm935_vm4, %v4499_v45  ;;  %v1185_v18 = vadd.f32 %v1184_v53, %v1183_v38  ;;  %v2275_v29 = vmul.f32 %v4496_v11, %v4496_v11  ;;  %v2211_v47 = vsel %vm861_vm2, %v4496_v11, 0.0  ;;  %v2276_v61 = vmul.f32 %v4515_v6, %v4515_v6 }
 0x1e5   : > { %v2074_v12 = vpop.permute.xlu1 %2073  ;;  %v3284_v45 = vpack.i.bf16 %v1017_v8, %v4312_v31  ;;  %v1143_v23 = vmul.f32 %v1017_v8, %v1017_v8  ;;  %v2208_v31 = vadd.f32 %v2207_v58, %v2206_v56  ;;  %v1088_v13 = vsel %vm861_vm2, %v1017_v8, 0.0  ;;  %p3451_p13 = pnand %p3450_p12, %p3649_p4  ;;  %p3456_p3 = por %p3455_p2, %p3454_p1 }
 0x1e6   : > { %v1187_v41 = vadd.f32 %v1186_v54, %v1185_v18  ;;  %v1087_v40 = vadd.f32 %v1086_v4, %v1085_v52  ;;  %v2095_v0 = vsel %vm861_vm2, %v2093_v1, %v2074_v12  ;;  %v4710_v56 = vsel %vm519_vm0, %v4581_v19, %v1589_v43 }
 0x1e7   : > { %3285 = vxpose.xlu0.b32.start [1/16] (narrow) %v3284_v45, 8  ;;  %v1190_v21 = vsel %vm861_vm2, %v1143_v23, 0.0  ;;  %v2311_v8 = vsel %vm861_vm2, %v2274_v32, 0.0  ;;  %v2210_v38 = vadd.f32 %v2209_v10, %v2208_v31  ;;  %v2313_v54 = vsel %vm861_vm2, %v2275_v29, 0.0  ;;  %p3452_p0 = pneg %p3451_p13 }
 0x1e8   : > { %v1189_v58 = vadd.f32 %v1188_v59, %v1187_v41  ;;  %v1089_v36 = vadd.f32 %v1088_v13, %v1087_v40  ;;  %v2213_v4 = vsel %vm861_vm2, %v4515_v6, 0.0  ;;  %v2277_v23 = vmul.f32 %v4525_v24, %v4525_v24 }
 0x1e9   : > { %v2212_v18 = vadd.f32 %v2211_v47, %v2210_v38  ;;  %v2278_v52 = vmul.f32 %v4541_v60, %v4541_v60  ;;  %v1591_v59 = vshrl.u32 %v4291_v34, 16  ;;  %v2315_v13 = vsel %vm861_vm2, %v2276_v61, 0.0  ;;  %p3457_p5 = pnand %p3456_p3, %p3452_p0 }
 0x1ea   : > { %v4702_v53 = vpop.f32.mrf.mxu2  ;;  %v1191_v16 = vadd.f32 %v1190_v21, %v1189_v58  ;;  %v2215_v10 = vsel %vm861_vm2, %v4525_v24, 0.0  ;;  %v1597_v41 = vshll.u32 %v1504_v26, 16  ;;  %v2219_v26 = vsel %vm861_vm2, %v4579_v35, 0.0 }
 0x1eb   : > { %v2214_v40 = vadd.f32 %v2213_v4, %v2212_v18  ;;  %v1596_v34 = vor.u32 %v4577_v49, %v1591_v59  ;;  %v2221_v4 = vsel %vm861_vm2, %v4632_v9, 0.0 }
 0x1ec   : > { %v1019_v2 = vpop.f32.mrf.mxu0  ;;  %3173 = vmatmul.msk.bf16.gmra.mxu3 %vm935_vm4, %v4710_v56  ;;  %v1599_v49 = vrot.slane %v1597_v41, 1 }
 0x1ed   : > { %v2091_v51 = vpop.permute.xlu1 %2090  ;;  %v3286_v1 = vpack.i.bf16 %v1019_v2, %v4336_v44  ;;  %v1090_v19 = vsel %vm861_vm2, %v1019_v2, 0.0  ;;  %v1144_v12 = vmul.f32 %v1019_v2, %v1019_v2  ;;  %v2312_v44 = vadd.f32 %v2311_v8, %v2310_v27 }
 0x1ee   : > { %v1091_v45 = vadd.f32 %v1090_v19, %v1089_v36  ;;  %v4722_v43 = vsel %vm894_vm3, %v2095_v0, %v2091_v51  ;;  %v2317_v27 = vsel %vm861_vm2, %v2277_v23, 0.0  ;;  %v2217_v0 = vsel %vm861_vm2, %v4541_v60, 0.0 }
 0x1ef   : > { %v1192_v32 = vsel %vm861_vm2, %v1144_v12, 0.0  ;;  %3160 = vmatmul.msk.bf16.gmra.mxu2 %vm935_vm4, %v4722_v43  ;;  %3287 = vxpose.xlu0.b32.cont [2/16] (narrow) %v3286_v1, 8  ;;  %v2314_v29 = vadd.f32 %v2313_v54, %v2312_v44  ;;  %v2279_v8 = vmul.f32 %v4579_v35, %v4579_v35  ;;  %v2216_v58 = vadd.f32 %v2215_v10, %v2214_v40 }
 0x1f0   : > { %v1193_v31 = vadd.f32 %v1192_v32, %v1191_v16  ;;  %v2319_v36 = vsel %vm861_vm2, %v2278_v52, 0.0  ;;  %v2280_v51 = vmul.f32 %v4632_v9, %v4632_v9  ;;  %v4767_v41 = vsel %vm519_vm0, %v1596_v34, %v1599_v49  ;;  %v1410_v34 = vpop.permute.xlu0 %1409 }
 0x1f1   : > { %v2316_v47 = vadd.f32 %v2315_v13, %v2314_v29  ;;  %v2218_v38 = vadd.f32 %v2217_v0, %v2216_v58  ;;  %v2321_v54 = vsel %vm861_vm2, %v2279_v8, 0.0  ;;  %v2225_v29 = vsel %vm861_vm2, %v4702_v53, 0.0 }
 0x1f2   : > { %v4738_v21 = vpop.f32.mrf.mxu2  ;;  %v2323_v52 = vsel %vm861_vm2, %v2280_v51, 0.0  ;;  %v1603_v49 = vshll.u32 %v4158_v63, 16 }
 0x1f3   : > { %v2318_v12 = vadd.f32 %v2317_v27, %v2316_v47  ;;  %v2220_v44 = vadd.f32 %v2219_v26, %v2218_v38  ;;  %v2227_v58 = vsel %vm861_vm2, %v4738_v21, 0.0 }
 0x1f4   : > { %v1022_v2 = vpop.f32.mrf.mxu0  ;;  %3123 = vmatmul.msk.bf16.gmra.mxu1 %vm935_vm4, %v4453_v39  ;;  %v2281_v39 = vmul.f32 %v4671_v37, %v4671_v37 }
 0x1f5   : > { %v3288_v61 = vpack.i.bf16 %v1022_v2, %v4352_v30  ;;  %v1092_v1 = vsel %vm861_vm2, %v1022_v2, 0.0  ;;  %v1145_v19 = vmul.f32 %v1022_v2, %v1022_v2  ;;  %v2320_v32 = vadd.f32 %v2319_v36, %v2318_v12 }
 0x1f6   : > { %v1093_v16 = vadd.f32 %v1092_v1, %v1091_v45  ;;  %v2282_v30 = vmul.f32 %v4702_v53, %v4702_v53  ;;  %v2223_v45 = vsel %vm861_vm2, %v4671_v37, 0.0  ;;  %v2222_v13 = vadd.f32 %v2221_v4, %v2220_v44 }
 0x1f7   : > { %v1194_v23 = vsel %vm861_vm2, %v1145_v19, 0.0  ;;  %3289 = vxpose.xlu0.b32.cont [3/16] (narrow) %v3288_v61, 8  ;;  %v2322_v59 = vadd.f32 %v2321_v54, %v2320_v32  ;;  %v2325_v40 = vsel %vm861_vm2, %v2281_v39, 0.0  ;;  %v1506_v4 = vsel %vm894_vm3, %v4380_v5, %v1410_v34 }
 0x1f8   : > { %v1195_v18 = vadd.f32 %v1194_v23, %v1193_v31  ;;  %v2283_v31 = vmul.f32 %v4738_v21, %v4738_v21  ;;  %v2224_v8 = vadd.f32 %v2223_v45, %v2222_v13  ;;  %v2327_v47 = vsel %vm861_vm2, %v2282_v30, 0.0 }
 0x1f9   : > { %v2324_v0 = vadd.f32 %v2323_v52, %v2322_v59  ;;  %v1607_v52 = vshll.u32 %v1506_v4, 16  ;;  %v1613_v4 = vshll.u32 %v4117_v28, 16 }
 0x1fa   : > { %v2158_v10 = vpop.f32.mrf.mxu2  ;;  %v2226_v1 = vadd.f32 %v2225_v29, %v2224_v8  ;;  %v2329_v12 = vsel %vm861_vm2, %v2283_v31, 0.0 }
 0x1fb   : > { %v3321_v27 = vpack.i.bf16 %v2158_v10, %v4365_v14  ;;  %v2284_v26 = vmul.f32 %v2158_v10, %v2158_v10  ;;  %v2326_v14 = vadd.f32 %v2325_v40, %v2324_v0  ;;  %v2229_v38 = vsel %vm861_vm2, %v2158_v10, 0.0 }
 0x1fc   : > { %v1024_v36 = vpop.f32.mrf.mxu0  ;;  %3174 = vmatmul.msk.bf16.gmra.mxu3 %vm935_vm4, %v4767_v41  ;;  %v1605_v10 = vrot.slane %v1603_v49, 1 }
 0x1fd   : > { %v3290_v2 = vpack.i.bf16 %v1024_v36, %v4374_v57  ;;  %v1094_v51 = vsel %vm861_vm2, %v1024_v36, 0.0  ;;  %v1146_v61 = vmul.f32 %v1024_v36, %v1024_v36  ;;  %3322 = vxpose.xlu1.b32.start [1/16] (narrow) %v3321_v27, 8  ;;  %v2328_v39 = vadd.f32 %v2327_v47, %v2326_v14 }
 0x1fe   : > { %v1095_v19 = vadd.f32 %v1094_v51, %v1093_v16  ;;  %v2228_v57 = vadd.f32 %v2227_v58, %v2226_v1  ;;  %v2331_v32 = vsel %vm861_vm2, %v2284_v26, 0.0  ;;  %v1601_v47 = vshrl.u32 %v4158_v63, 16 }
 0x1ff   : > { %v1196_v54 = vsel %vm861_vm2, %v1146_v61, 0.0  ;;  %3291 = vxpose.xlu0.b32.cont [4/16] (narrow) %v3290_v2, 8  ;;  %v2330_v44 = vadd.f32 %v2329_v12, %v2328_v39  ;;  %v1609_v58 = vrot.slane %v1607_v52, 1 }
 0x200   : > { %v1197_v23 = vadd.f32 %v1196_v54, %v1195_v18  ;;  %v2230_v30 = vadd.f32 %v2229_v38, %v2228_v57  ;;  %v1606_v26 = vor.u32 %v1605_v10, %v1601_v47 }
 0x201   : > { %v2332_v40 = vadd.f32 %v2331_v32, %v2330_v44 }
 0x202   : > { %v2160_v16 = vpop.f32.mrf.mxu2  ;;  %v4801_v61 = vsel %vm519_vm0, %v1606_v26, %v1609_v58 }
 0x203   : > { %v3323_v45 = vpack.i.bf16 %v2160_v16, %v4389_v42  ;;  %v2231_v59 = vsel %vm861_vm2, %v2160_v16, 0.0  ;;  %v2285_v13 = vmul.f32 %v2160_v16, %v2160_v16 }
 0x204   : > { %v2232_v29 = vadd.f32 %v2231_v59, %v2230_v30  ;;  %v1027_v31 = vpop.f32.mrf.mxu0  ;;  %3124 = vmatmul.msk.bf16.gmra.mxu1 %vm935_vm4, %v4710_v56  ;;  %v1615_v30 = vrot.slane %v1613_v4, 1 }
 0x205   : > { %v2333_v5 = vsel %vm861_vm2, %v2285_v13, 0.0  ;;  %v3292_v18 = vpack.i.bf16 %v1027_v31, %v4393_v20  ;;  %v1096_v27 = vsel %vm861_vm2, %v1027_v31, 0.0  ;;  %v1147_v0 = vmul.f32 %v1027_v31, %v1027_v31  ;;  %3324 = vxpose.xlu1.b32.cont [2/16] (narrow) %v3323_v45, 8 }
 0x206   : > { %v2334_v8 = vadd.f32 %v2333_v5, %v2332_v40  ;;  %v1097_v42 = vadd.f32 %v1096_v27, %v1095_v19 }
 0x207   : > { %v1198_v36 = vsel %vm861_vm2, %v1147_v0, 0.0  ;;  %3293 = vxpose.xlu0.b32.cont [5/16] (narrow) %v3292_v18, 8 }
 0x208   : > { %v1199_v34 = vadd.f32 %v1198_v36, %v1197_v23  ;;  %v1617_v23 = vshll.u32 %v4523_v46, 16 }
 0x20a   : > { %v2163_v2 = vpop.f32.mrf.mxu2 }
 0x20b   : > { %v3325_v56 = vpack.i.bf16 %v2163_v2, %v4415_v15  ;;  %v2233_v51 = vsel %vm861_vm2, %v2163_v2, 0.0  ;;  %v2286_v20 = vmul.f32 %v2163_v2, %v2163_v2 }
 0x20c   : > { %v2234_v14 = vadd.f32 %v2233_v51, %v2232_v29  ;;  %v1029_v1 = vpop.f32.mrf.mxu0  ;;  %3175 = vmatmul.msk.bf16.gmra.mxu3 %vm935_vm4, %v4801_v61  ;;  %v1619_v29 = vrot.slane %v1617_v23, 1 }
 0x20d   : > { %v2335_v63 = vsel %vm861_vm2, %v2286_v20, 0.0  ;;  %v3294_v19 = vpack.i.bf16 %v1029_v1, %v4419_v33  ;;  %v1098_v49 = vsel %vm861_vm2, %v1029_v1, 0.0  ;;  %v1148_v12 = vmul.f32 %v1029_v1, %v1029_v1  ;;  %3326 = vxpose.xlu1.b32.cont [3/16] (narrow) %v3325_v56, 8  ;;  %v5523_v20 = vld [vmem:[#allocation14_spill] sm:$0xff]  ;;  %v5524_v1 = vld [vmem:[#allocation15_spill] sm:$0xff] }
 0x20e   : > { %v2336_v15 = vadd.f32 %v2335_v63, %v2334_v8  ;;  %v1099_v38 = vadd.f32 %v1098_v49, %v1097_v42  ;;  %v4827_v58 = vpop.f32.mrf.mxu3 }
 0x20f   : > { %v1200_v54 = vsel %vm861_vm2, %v1148_v12, 0.0  ;;  %3295 = vxpose.xlu0.b32.cont [6/16] (narrow) %v3294_v19, 8 }
 0x210   : > { %v1201_v39 = vadd.f32 %v1200_v54, %v1199_v34 }
 0x212   : > { %v2165_v57 = vpop.f32.mrf.mxu2 }
 0x213   : > { %v3327_v32 = vpack.i.bf16 %v2165_v57, %v4434_v62  ;;  %v2235_v44 = vsel %vm861_vm2, %v2165_v57, 0.0  ;;  %v2287_v33 = vmul.f32 %v2165_v57, %v2165_v57  ;;  %v1611_v62 = vshrl.u32 %v4117_v28, 16  ;;  %v1414_v28 = vpop.permute.xlu2 %1413 }
 0x214   : > { %v2236_v16 = vadd.f32 %v2235_v44, %v2234_v14  ;;  %v1032_v52 = vpop.f32.mrf.mxu0  ;;  %3125 = vmatmul.msk.bf16.gmra.mxu1 %vm935_vm4, %v4767_v41  ;;  %v1623_v14 = vshll.u32 %v5523_v20, 16  ;;  %v1510_v63 = vsel %vm894_vm3, %v5524_v1, %v1414_v28 }
 0x215   : > { %v2337_v45 = vsel %vm861_vm2, %v2287_v33, 0.0  ;;  %v3296_v59 = vpack.i.bf16 %v1032_v52, %v4436_v22  ;;  %v1100_v13 = vsel %vm861_vm2, %v1032_v52, 0.0  ;;  %v1149_v10 = vmul.f32 %v1032_v52, %v1032_v52  ;;  %3328 = vxpose.xlu1.b32.cont [4/16] (narrow) %v3327_v32, 8  ;;  %v5525_v32 = vld [vmem:[#allocation18_spill] sm:$0xff] }
 0x216   : > { %v2338_v46 = vadd.f32 %v2337_v45, %v2336_v15  ;;  %v1101_v40 = vadd.f32 %v1100_v13, %v1099_v38  ;;  %v1616_v18 = vor.u32 %v1615_v30, %v1611_v62  ;;  %v1627_v15 = vshll.u32 %v1510_v63, 16 }
 0x217   : > { %v1202_v31 = vsel %vm861_vm2, %v1149_v10, 0.0  ;;  %3297 = vxpose.xlu0.b32.cont [7/16] (narrow) %v3296_v59, 8  ;;  %v1625_v4 = vrot.slane %v1623_v14, 1  ;;  %v4846_v59 = vpop.f32.mrf.mxu3 }
 0x218   : > { %v1203_v5 = vadd.f32 %v1202_v31, %v1201_v39  ;;  %v4823_v8 = vsel %vm519_vm0, %v1616_v18, %v1619_v29  ;;  %v1629_v45 = vrot.slane %v1627_v15, 1 }
 0x21a   : > { %v2168_v27 = vpop.f32.mrf.mxu2 }
 0x21b   : > { %v3329_v41 = vpack.i.bf16 %v2168_v27, %v4455_v50  ;;  %v2237_v0 = vsel %vm861_vm2, %v2168_v27, 0.0  ;;  %v2288_v22 = vmul.f32 %v2168_v27, %v2168_v27 }
 0x21c   : > { %v2238_v42 = vadd.f32 %v2237_v0, %v2236_v16  ;;  %v1034_v47 = vpop.f32.mrf.mxu0  ;;  %3176 = vmatmul.msk.bf16.gmra.mxu3 %vm935_vm4, %v4823_v8  ;;  %v5526_v0 = vld [vmem:[#allocation19_spill] sm:$0xff] }
 0x21d   : > { %v2339_v36 = vsel %vm861_vm2, %v2288_v22, 0.0  ;;  %v3298_v34 = vpack.i.bf16 %v1034_v47, %v4460_v17  ;;  %v1102_v50 = vsel %vm861_vm2, %v1034_v47, 0.0  ;;  %v1150_v26 = vmul.f32 %v1034_v47, %v1034_v47  ;;  %3330 = vxpose.xlu1.b32.cont [5/16] (narrow) %v3329_v41, 8 }
 0x21e   : > { %v2340_v2 = vadd.f32 %v2339_v36, %v2338_v46  ;;  %v1103_v56 = vadd.f32 %v1102_v50, %v1101_v40 }
 0x21f   : > { %v1204_v51 = vsel %vm861_vm2, %v1150_v26, 0.0  ;;  %3299 = vxpose.xlu0.b32.cont [8/16] (narrow) %v3298_v34, 8  ;;  %v5527_v26 = vld [vmem:[#allocation12_spill] sm:$0xff] }
 0x220   : > { %v1205_v19 = vadd.f32 %v1204_v51, %v1203_v5 }
 0x221   : > { %v4836_v49 = vpop.f32.mrf.mxu1 }
 0x222   : > { %v2170_v12 = vpop.f32.mrf.mxu2 }
 0x223   : > { %v3331_v17 = vpack.i.bf16 %v2170_v12, %v4467_v25  ;;  %v2239_v38 = vsel %vm861_vm2, %v2170_v12, 0.0  ;;  %v2289_v54 = vmul.f32 %v2170_v12, %v2170_v12  ;;  %v1621_v25 = vshrl.u32 %v5523_v20, 16  ;;  %v5528_v20 = vld [vmem:[#allocation22_spill] sm:$0xff] }
 0x224   : > { %v2240_v39 = vadd.f32 %v2239_v38, %v2238_v42  ;;  %v1037_v57 = vpop.f32.mrf.mxu0  ;;  %3126 = vmatmul.msk.bf16.gmra.mxu1 %vm935_vm4, %v4801_v61  ;;  %v1637_v14 = vshll.u32 %v5528_v20, 16  ;;  %v5529_v38 = vld [vmem:[#allocation20_spill] sm:$0xff] }
 0x225   : > { %v2341_v23 = vsel %vm861_vm2, %v2289_v54, 0.0  ;;  %v3300_v44 = vpack.i.bf16 %v1037_v57, %v5525_v32  ;;  %v1104_v33 = vsel %vm861_vm2, %v1037_v57, 0.0  ;;  %v1151_v30 = vmul.f32 %v1037_v57, %v1037_v57  ;;  %3332 = vxpose.xlu1.b32.cont [6/16] (narrow) %v3331_v17, 8 }
 0x226   : > { %v2342_v16 = vadd.f32 %v2341_v23, %v2340_v2  ;;  %v1105_v52 = vadd.f32 %v1104_v33, %v1103_v56  ;;  %v1626_v46 = vor.u32 %v1625_v4, %v1621_v25  ;;  %v1633_v2 = vshll.u32 %v5527_v26, 16 }
 0x227   : > { %v1206_v13 = vsel %vm861_vm2, %v1151_v30, 0.0  ;;  %3301 = vxpose.xlu0.b32.cont [9/16] (narrow) %v3300_v44, 8  ;;  %v1639_v32 = vrot.slane %v1637_v14, 1 }
 0x228   : > { %v1207_v10 = vadd.f32 %v1206_v13, %v1205_v19  ;;  %v4854_v5 = vsel %vm519_vm0, %v1626_v46, %v1629_v45  ;;  %v1635_v17 = vrot.slane %v1633_v2, 1 }
 0x229   : > { %v4849_v61 = vpop.f32.mrf.mxu1 }
 0x22a   : > { %v2173_v40 = vpop.f32.mrf.mxu2 }
 0x22b   : > { %v3333_v62 = vpack.i.bf16 %v2173_v40, %v4487_v3  ;;  %v2241_v29 = vsel %vm861_vm2, %v2173_v40, 0.0  ;;  %v2290_v31 = vmul.f32 %v2173_v40, %v2173_v40 }
 0x22c   : > { %v2242_v18 = vadd.f32 %v2241_v29, %v2240_v39  ;;  %v1039_v27 = vpop.f32.mrf.mxu0  ;;  %3177 = vmatmul.msk.bf16.gmra.mxu3 %vm935_vm4, %v4854_v5  ;;  %v1418_v29 = vpop.permute.xlu2 %1417 }
 0x22d   : > { %v2343_v41 = vsel %vm861_vm2, %v2290_v31, 0.0  ;;  %v3302_v22 = vpack.i.bf16 %v1039_v27, %v5526_v0  ;;  %v1106_v42 = vsel %vm861_vm2, %v1039_v27, 0.0  ;;  %v1152_v47 = vmul.f32 %v1039_v27, %v1039_v27  ;;  %3334 = vxpose.xlu1.b32.cont [7/16] (narrow) %v3333_v62, 8 }
 0x22e   : > { %v2344_v3 = vadd.f32 %v2343_v41, %v2342_v16  ;;  %v1107_v28 = vadd.f32 %v1106_v42, %v1105_v52 }
 0x22f   : > { %v1208_v36 = vsel %vm861_vm2, %v1152_v47, 0.0  ;;  %v4862_v34 = vpop.f32.mrf.mxu3  ;;  %3303 = vxpose.xlu0.b32.cont [10/16] (narrow) %v3302_v22, 8  ;;  %v5530_v47 = vld [vmem:[#allocation16_spill] sm:$0xff] }
 0x230   : > { %v1209_v50 = vadd.f32 %v1208_v36, %v1207_v10  ;;  %v5531_v36 = vld [vmem:[#allocation10_spill] sm:$0xff] }
 0x231   : > { %v4865_v56 = vpop.f32.mrf.mxu1 }
 0x232   : > { %v2175_v51 = vpop.f32.mrf.mxu2 }
 0x233   : > { %v3335_v1 = vpack.i.bf16 %v2175_v51, %v4496_v11  ;;  %v2243_v63 = vsel %vm861_vm2, %v2175_v51, 0.0  ;;  %v2291_v12 = vmul.f32 %v2175_v51, %v2175_v51  ;;  %v1631_v11 = vshrl.u32 %v5527_v26, 16 }
 0x234   : > { %v2244_v19 = vadd.f32 %v2243_v63, %v2242_v18  ;;  %v1042_v15 = vpop.f32.mrf.mxu0  ;;  %3127 = vmatmul.msk.bf16.gmra.mxu1 %vm935_vm4, %v4823_v8 }
 0x235   : > { %v3304_v54 = vpack.i.bf16 %v1042_v15, %v5529_v38  ;;  %v1108_v4 = vsel %vm861_vm2, %v1042_v15, 0.0  ;;  %v1153_v39 = vmul.f32 %v1042_v15, %v1042_v15  ;;  %3336 = vxpose.xlu1.b32.cont [8/16] (narrow) %v3335_v1, 8  ;;  %v2345_v57 = vsel %vm861_vm2, %v2291_v12, 0.0 }
 0x236   : > { %v1109_v23 = vadd.f32 %v1108_v4, %v1107_v28  ;;  %v2346_v44 = vadd.f32 %v2345_v57, %v2344_v3  ;;  %v1636_v52 = vor.u32 %v1635_v17, %v1631_v11  ;;  %v1514_v3 = vsel %vm894_vm3, %v5530_v47, %v1418_v29 }
 0x237   : > { %v1210_v33 = vsel %vm861_vm2, %v1153_v39, 0.0  ;;  %v4877_v30 = vpop.f32.mrf.mxu3  ;;  %3305 = vxpose.xlu0.b32.cont [11/16] (narrow) %v3304_v54, 8  ;;  %v1647_v2 = vshll.u32 %v1514_v3, 16  ;;  %v5534_v3 = vld [vmem:[#allocation24_spill] sm:$0xff] }
 0x238   : > { %v1211_v16 = vadd.f32 %v1210_v33, %v1209_v50  ;;  %v4884_v46 = vsel %vm519_vm0, %v1636_v52, %v1639_v32  ;;  %v1643_v50 = vshll.u32 %v5531_v36, 16 }
 0x239   : > { %v4879_v8 = vpop.f32.mrf.mxu1  ;;  %v1649_v4 = vrot.slane %v1647_v2, 1 }
 0x23a   : > { %v2178_v25 = vpop.f32.mrf.mxu2 }
 0x23b   : > { %v3337_v45 = vpack.i.bf16 %v2178_v25, %v4515_v6  ;;  %v2245_v13 = vsel %vm861_vm2, %v2178_v25, 0.0  ;;  %v2292_v10 = vmul.f32 %v2178_v25, %v2178_v25 }
 0x23c   : > { %v2246_v40 = vadd.f32 %v2245_v13, %v2244_v19  ;;  %v1044_v62 = vpop.f32.mrf.mxu0  ;;  %3178 = vmatmul.msk.bf16.gmra.mxu3 %vm935_vm4, %v4884_v46  ;;  %v1645_v19 = vrot.slane %v1643_v50, 1 }
 0x23d   : > { %v2347_v31 = vsel %vm861_vm2, %v2292_v10, 0.0  ;;  %v3306_v18 = vpack.i.bf16 %v1044_v62, %v4517_v48  ;;  %v1110_v27 = vsel %vm861_vm2, %v1044_v62, 0.0  ;;  %v1154_v41 = vmul.f32 %v1044_v62, %v1044_v62  ;;  %3338 = vxpose.xlu1.b32.cont [9/16] (narrow) %v3337_v45, 8  ;;  %v5532_v10 = vld [vmem:[#allocation23_spill] sm:$0xff] }
 0x23e   : > { %v2348_v6 = vadd.f32 %v2347_v31, %v2346_v44  ;;  %v1111_v0 = vadd.f32 %v1110_v27, %v1109_v23 }
 0x23f   : > { %v1212_v22 = vsel %vm861_vm2, %v1154_v41, 0.0  ;;  %v4892_v42 = vpop.f32.mrf.mxu3  ;;  %3307 = vxpose.xlu0.b32.cont [12/16] (narrow) %v3306_v18, 8 }
 0x240   : > { %v1213_v28 = vadd.f32 %v1212_v22, %v1211_v16 }
 0x241   : > { %v4897_v26 = vpop.f32.mrf.mxu1 }
 0x242   : > { %v2180_v48 = vpop.f32.mrf.mxu2 }
 0x243   : > { %v3339_v51 = vpack.i.bf16 %v2180_v48, %v4525_v24  ;;  %v2247_v20 = vsel %vm861_vm2, %v2180_v48, 0.0  ;;  %v2293_v1 = vmul.f32 %v2180_v48, %v2180_v48  ;;  %v1641_v24 = vshrl.u32 %v5531_v36, 16 }
 0x244   : > { %v2248_v14 = vadd.f32 %v2247_v20, %v2246_v40  ;;  %v1047_v63 = vpop.f32.mrf.mxu0  ;;  %3128 = vmatmul.msk.bf16.gmra.mxu1 %vm935_vm4, %v4854_v5 }
 0x245   : > { %v3308_v12 = vpack.i.bf16 %v1047_v63, %v4527_v7  ;;  %v1112_v15 = vsel %vm861_vm2, %v1047_v63, 0.0  ;;  %v1155_v17 = vmul.f32 %v1047_v63, %v1047_v63  ;;  %3340 = vxpose.xlu1.b32.cont [10/16] (narrow) %v3339_v51, 8  ;;  %v2349_v38 = vsel %vm861_vm2, %v2293_v1, 0.0 }
 0x246   : > { %v1113_v54 = vadd.f32 %v1112_v15, %v1111_v0  ;;  %v2350_v39 = vadd.f32 %v2349_v38, %v2348_v6  ;;  %v1646_v7 = vor.u32 %v1645_v19, %v1641_v24  ;;  %v5533_v6 = vld [vmem:[#allocation21_spill] sm:$0xff] }
 0x247   : > { %v1214_v57 = vsel %vm861_vm2, %v1155_v17, 0.0  ;;  %v4908_v23 = vpop.f32.mrf.mxu3  ;;  %3309 = vxpose.xlu0.b32.cont [13/16] (narrow) %v3308_v12, 8  ;;  %v1653_v0 = vshll.u32 %v5533_v6, 16 }
 0x248   : > { %v1215_v11 = vadd.f32 %v1214_v57, %v1213_v28  ;;  %v4915_v52 = vsel %vm519_vm0, %v1646_v7, %v1649_v4  ;;  %v1657_v28 = vshll.u32 %v5534_v3, 16 }
 0x249   : > { %v4910_v5 = vpop.f32.mrf.mxu1  ;;  %v1655_v20 = vrot.slane %v1653_v0, 1 }
 0x24a   : > { %v2183_v32 = vpop.f32.mrf.mxu2  ;;  %v1659_v17 = vrot.slane %v1657_v28, 1 }
 0x24b   : > { %v3341_v44 = vpack.i.bf16 %v2183_v32, %v4541_v60  ;;  %v2249_v33 = vsel %vm861_vm2, %v2183_v32, 0.0  ;;  %v2294_v16 = vmul.f32 %v2183_v32, %v2183_v32 }
 0x24c   : > { %v2250_v25 = vadd.f32 %v2249_v33, %v2248_v14  ;;  %v1049_v45 = vpop.f32.mrf.mxu0  ;;  %3179 = vmatmul.msk.bf16.gmra.mxu3 %vm935_vm4, %v4915_v52  ;;  %v5535_v14 = vld [vmem:[#allocation25_spill] sm:$0xff] }
 0x24d   : > { %v2351_v13 = vsel %vm861_vm2, %v2294_v16, 0.0  ;;  %v3310_v40 = vpack.i.bf16 %v1049_v45, %v5532_v10  ;;  %v1114_v62 = vsel %vm861_vm2, %v1049_v45, 0.0  ;;  %v1156_v29 = vmul.f32 %v1049_v45, %v1049_v45  ;;  %3342 = vxpose.xlu1.b32.cont [11/16] (narrow) %v3341_v44, 8 }
 0x24e   : > { %v2352_v60 = vadd.f32 %v2351_v13, %v2350_v39  ;;  %v1115_v31 = vadd.f32 %v1114_v62, %v1113_v54 }
 0x24f   : > { %v1216_v18 = vsel %vm861_vm2, %v1156_v29, 0.0  ;;  %v4923_v27 = vpop.f32.mrf.mxu3  ;;  %3311 = vxpose.xlu0.b32.cont [14/16] (narrow) %v3310_v40, 8 }
 0x250   : > { %v1217_v41 = vadd.f32 %v1216_v18, %v1215_v11 }
 0x251   : > { %v4926_v22 = vpop.f32.mrf.mxu1 }
 0x252   : > { %v2185_v47 = vpop.f32.mrf.mxu2 }
 0x253   : > { %v3343_v36 = vpack.i.bf16 %v2185_v47, %v4579_v35  ;;  %v2251_v50 = vsel %vm861_vm2, %v2185_v47, 0.0  ;;  %v2295_v2 = vmul.f32 %v2185_v47, %v2185_v47  ;;  %v1651_v35 = vshrl.u32 %v5533_v6, 16  ;;  %v5537_v6 = vld [vmem:[#allocation13_spill] sm:$0xff] }
 0x254   : > { %v2252_v48 = vadd.f32 %v2251_v50, %v2250_v25  ;;  %v1052_v51 = vpop.f32.mrf.mxu0  ;;  %3129 = vmatmul.msk.bf16.gmra.mxu1 %vm935_vm4, %v4884_v46  ;;  %v1422_v25 = vpop.permute.xlu2 %1421  ;;  %v1663_v0 = vshll.u32 %v5537_v6, 16 }
 0x255   : > { %v3312_v1 = vpack.i.bf16 %v1052_v51, %v5535_v14  ;;  %v1116_v63 = vsel %vm861_vm2, %v1052_v51, 0.0  ;;  %v1157_v19 = vmul.f32 %v1052_v51, %v1052_v51  ;;  %3344 = vxpose.xlu1.b32.cont [12/16] (narrow) %v3343_v36, 8  ;;  %v2353_v12 = vsel %vm861_vm2, %v2295_v2, 0.0 }
 0x256   : > { %v1117_v15 = vadd.f32 %v1116_v63, %v1115_v31  ;;  %v2354_v38 = vadd.f32 %v2353_v12, %v2352_v60  ;;  %v1656_v46 = vor.u32 %v1655_v20, %v1651_v35  ;;  %v5536_v31 = vld [vmem:[#allocation17_spill] sm:$0xff]  ;;  %v1661_v20 = vshrl.u32 %v5537_v6, 16  ;;  %v2438_v12 = vpop.permute.xlu0 %2437  ;;  %v5538_v35 = vld [vmem:[#allocation11_spill] sm:$0xff] }
 0x257   : > { %v1218_v54 = vsel %vm861_vm2, %v1157_v19, 0.0  ;;  %v4938_v24 = vpop.f32.mrf.mxu3  ;;  %3313 = vxpose.xlu0.b32.cont [15/16] (narrow) %v3312_v1, 8  ;;  %v1518_v18 = vsel %vm894_vm3, %v5536_v31, %v1422_v25  ;;  %v2453_v25 = vshll.u32 %v4722_v43, 16  ;;  %v5540_v6 = vld [vmem:[#allocation9_spill] sm:$0xff] }
 0x258   : > { %v1219_v4 = vadd.f32 %v1218_v54, %v1217_v41  ;;  %v1660_v44 = vsel %vm519_vm0, %v1656_v46, %v1659_v17  ;;  %v1667_v3 = vshll.u32 %v1518_v18, 16  ;;  %v1673_v17 = vshll.u32 %v5538_v35, 16 }
 0x259   : > { %v4940_v39 = vpop.f32.mrf.mxu1  ;;  %v2455_v31 = vrot.slane %v2453_v25, 1 }
 0x25a   : > { %v2188_v57 = vpop.f32.mrf.mxu2  ;;  %v1669_v14 = vrot.slane %v1667_v3, 1 }
 0x25b   : > { %v3345_v11 = vpack.i.bf16 %v2188_v57, %v4632_v9  ;;  %v2253_v7 = vsel %vm861_vm2, %v2188_v57, 0.0  ;;  %v2296_v32 = vmul.f32 %v2188_v57, %v2188_v57 }
 0x25c   : > { %v2254_v33 = vadd.f32 %v2253_v7, %v2252_v48  ;;  %v1054_v16 = vpop.f32.mrf.mxu0  ;;  %3180 = vmatmul.msk.bf16.gmra.mxu3 %vm935_vm4, %v1660_v44  ;;  %v1665_v48 = vrot.slane %v1663_v0, 1 }
 0x25d   : > { %v2355_v45 = vsel %vm861_vm2, %v2296_v32, 0.0  ;;  %v3314_v13 = vpack.i.bf16 %v1054_v16, %v4641_v55  ;;  %v1118_v10 = vsel %vm861_vm2, %v1054_v16, 0.0  ;;  %v1158_v40 = vmul.f32 %v1054_v16, %v1054_v16  ;;  %3346 = vxpose.xlu1.b32.cont [13/16] (narrow) %v3345_v11, 8 }
 0x25e   : > { %v2356_v62 = vadd.f32 %v2355_v45, %v2354_v38  ;;  %v4949_v9 = vadd.f32 %v1118_v10, %v1117_v15  ;;  %v1666_v19 = vor.u32 %v1665_v48, %v1661_v20  ;;  %v2440_v57 = vpop.permute.xlu0 %2439  ;;  %v1675_v16 = vrot.slane %v1673_v17, 1 }
 0x25f   : > { %v1220_v29 = vsel %vm861_vm2, %v1158_v40, 0.0  ;;  %v4952_v60 = vpop.f32.mrf.mxu3  ;;  %3315 = vxpose.xlu0.b32.end [16/16] (narrow) %v3314_v13, 8  ;;  %v1671_v13 = vshrl.u32 %v5538_v35, 16 }
 0x260   : > { %v4956_v41 = vadd.f32 %v1220_v29, %v1219_v4  ;;  %v4972_v15 = vsel %vm519_vm0, %v1666_v19, %v1669_v14  ;;  %v5539_v4 = vld [vmem:[#allocation26_spill] sm:$0xff]  ;;  %v2563_v19 = vsel %vm861_vm2, %v4846_v59, 0.0 }
 0x261   : > { %v4959_v55 = vpop.f32.mrf.mxu1  ;;  %v1677_v46 = vshll.u32 %v5539_v4, 16  ;;  %v1676_v29 = vor.u32 %v1675_v16, %v1671_v13  ;;  %v1899_v4 = vmul.f32 %v4865_v56, %v4865_v56  ;;  %v2565_v16 = vsel %vm861_vm2, %v4862_v34, 0.0 }
 0x262   : > { %v2190_v47 = vpop.f32.mrf.mxu2  ;;  %v1900_v13 = vmul.f32 %v4879_v8, %v4879_v8 }
 0x263   : > { %v3347_v28 = vpack.i.bf16 %v2190_v47, %v4671_v37  ;;  %v2255_v36 = vsel %vm861_vm2, %v2190_v47, 0.0  ;;  %v2297_v50 = vmul.f32 %v2190_v47, %v2190_v47  ;;  %v1679_v10 = vrot.slane %v1677_v46, 1 }
 0x264   : > { %3130 = vmatmul.msk.bf16.gmra.mxu1 %vm935_vm4, %v4915_v52  ;;  %v2256_v2 = vadd.f32 %v2255_v36, %v2254_v33  ;;  %v2633_v47 = vmul.f32 %v4846_v59, %v4846_v59 }
 0x265   : > { %3348 = vxpose.xlu1.b32.cont [14/16] (narrow) %v3347_v28, 8  ;;  %v2357_v51 = vsel %vm861_vm2, %v2297_v50, 0.0  ;;  %v5000_v36 = vsel %vm519_vm0, %v1676_v29, %v1679_v10  ;;  %v1898_v50 = vmul.f32 %v4849_v61, %v4849_v61 }
 0x266   : > { %v2358_v1 = vadd.f32 %v2357_v51, %v2356_v62  ;;  %v2444_v14 = vpop.permute.xlu0 %2443  ;;  %v2665_v17 = vsel %vm861_vm2, %v2633_v47, 0.0 }
 0x267   : > { %v4967_v63 = vpop.f32.mrf.mxu3 }
 0x269   : > { %v4969_v37 = vpop.f32.mrf.mxu1 }
 0x26c   : > { %3181 = vmatmul.msk.bf16.gmra.mxu3 %vm935_vm4, %v4972_v15 }
 0x26f   : > { %v4976_v52 = vpop.f32.mrf.mxu3 }
 0x271   : > { %v4979_v38 = vpop.f32.mrf.mxu1 }
 0x272   : > { %v2193_v54 = vpop.f32.mrf.mxu2 }
 0x273   : > { %v3349_v11 = vpack.i.bf16 %v2193_v54, %v4702_v53  ;;  %v2257_v7 = vsel %vm861_vm2, %v2193_v54, 0.0  ;;  %v2298_v33 = vmul.f32 %v2193_v54, %v2193_v54  ;;  %v2451_v53 = vshrl.u32 %v4722_v43, 16 }
 0x274   : > { %v2258_v32 = vadd.f32 %v2257_v7, %v2256_v2  ;;  %3131 = vmatmul.msk.bf16.gmra.mxu1 %vm935_vm4, %v1660_v44  ;;  %v2446_v44 = vsel %vm828_vm1, %v5540_v6, %v2438_v12  ;;  %v2632_v43 = vmul.f32 %v4827_v58, %v4827_v58  ;;  %v1897_v12 = vmul.f32 %v4836_v49, %v4836_v49 }
 0x275   : > { %3350 = vxpose.xlu1.b32.cont [15/16] (narrow) %v3349_v11, 8  ;;  %v2359_v45 = vsel %vm861_vm2, %v2298_v33, 0.0  ;;  %v5010_v51 = vor.u32 %v2455_v31, %v2451_v53  ;;  %v2448_v20 = vsel %vm861_vm2, %v2446_v44, %v2440_v57  ;;  %v1828_v54 = vsel %vm861_vm2, %v4849_v61, 0.0 }
 0x276   : > { %v2360_v40 = vadd.f32 %v2359_v45, %v2358_v1  ;;  %v2562_v1 = vsel %vm861_vm2, %v4827_v58, 0.0  ;;  %v2664_v11 = vsel %vm861_vm2, %v2632_v43, 0.0  ;;  %v1827_v7 = vsel %vm861_vm2, %v4836_v49, 0.0 }
 0x277   : > { %v4988_v62 = vpop.f32.mrf.mxu3  ;;  %v2450_v33 = vsel %vm894_vm3, %v2448_v20, %v2444_v14  ;;  %v2635_v45 = vmul.f32 %v4877_v30, %v4877_v30  ;;  %v2564_v29 = vadd.f32 %v2563_v19, %v2562_v1  ;;  %v2666_v53 = vadd.f32 %v2665_v17, %v2664_v11 }
 0x278   : > { %v1829_v31 = vadd.f32 %v1828_v54, %v1827_v7  ;;  %v1830_v6 = vsel %vm861_vm2, %v4865_v56, 0.0  ;;  %v1932_v44 = vsel %vm861_vm2, %v1899_v4, 0.0  ;;  %v2457_v47 = vshll.u32 %v2450_v33, 16 }
 0x279   : > { %v4991_v18 = vpop.f32.mrf.mxu1  ;;  %v1934_v20 = vsel %vm861_vm2, %v1900_v13, 0.0  ;;  %v1901_v14 = vmul.f32 %v4897_v26, %v4897_v26  ;;  %v1902_v54 = vmul.f32 %v4910_v5, %v4910_v5  ;;  %v2638_v13 = vmul.f32 %v4923_v27, %v4923_v27 }
 0x27a   : > { %v2195_v0 = vpop.f32.mrf.mxu2  ;;  %v1831_v1 = vadd.f32 %v1830_v6, %v1829_v31  ;;  %v2459_v4 = vrot.slane %v2457_v47, 1  ;;  %v1903_v6 = vmul.f32 %v4926_v22, %v4926_v22  ;;  %v2639_v47 = vmul.f32 %v4938_v24, %v4938_v24 }
 0x27b   : > { %v3351_v3 = vpack.i.bf16 %v2195_v0, %v4738_v21  ;;  %v2259_v28 = vsel %vm861_vm2, %v2195_v0, 0.0  ;;  %v2299_v2 = vmul.f32 %v2195_v0, %v2195_v0  ;;  %v2634_v21 = vmul.f32 %v4862_v34, %v4862_v34 }
 0x27c   : > { %v5006_v48 = vadd.f32 %v2259_v28, %v2258_v32  ;;  %3182 = vmatmul.msk.bf16.gmra.mxu3 %vm935_vm4, %v5000_v36  ;;  %v1930_v32 = vsel %vm861_vm2, %v1898_v50, 0.0  ;;  %v2636_v0 = vmul.f32 %v4892_v42, %v4892_v42  ;;  %v2567_v50 = vsel %vm861_vm2, %v4877_v30, 0.0 }
 0x27d   : > { %3352 = vxpose.xlu1.b32.end [16/16] (narrow) %v3351_v3, 8  ;;  %v2361_v35 = vsel %vm861_vm2, %v2299_v2, 0.0  ;;  %v2667_v25 = vsel %vm861_vm2, %v2634_v21, 0.0  ;;  %v2566_v3 = vadd.f32 %v2565_v16, %v2564_v29  ;;  %v2669_v2 = vsel %vm861_vm2, %v2635_v45, 0.0 }
 0x27e   : > { %v5027_v46 = vadd.f32 %v2361_v35, %v2360_v40  ;;  %v1929_v40 = vsel %vm861_vm2, %v1897_v12, 0.0  ;;  %v2668_v28 = vadd.f32 %v2667_v25, %v2666_v53  ;;  %v1832_v21 = vsel %vm861_vm2, %v4879_v8, 0.0 }
 0x27f   : > { %v5029_v57 = vpop.f32.mrf.mxu3  ;;  %v1931_v43 = vadd.f32 %v1930_v32, %v1929_v40  ;;  %v2569_v12 = vsel %vm861_vm2, %v4892_v42, 0.0  ;;  %v2637_v35 = vmul.f32 %v4908_v23, %v4908_v23  ;;  %v2568_v17 = vadd.f32 %v2567_v50, %v2566_v3 }
 0x280   : > { %v2670_v7 = vadd.f32 %v2669_v2, %v2668_v28  ;;  %v1833_v32 = vadd.f32 %v1832_v21, %v1831_v1  ;;  %v1834_v25 = vsel %vm861_vm2, %v4897_v26, 0.0  ;;  %v1936_v45 = vsel %vm861_vm2, %v1901_v14, 0.0 }
 0x281   : > { %v5043_v10 = vpop.f32.mrf.mxu1  ;;  %v1933_v19 = vadd.f32 %v1932_v44, %v1931_v43  ;;  %v2570_v16 = vadd.f32 %v2569_v12, %v2568_v17  ;;  %v2571_v53 = vsel %vm861_vm2, %v4908_v23, 0.0  ;;  %v2673_v31 = vsel %vm861_vm2, %v2637_v35, 0.0 }
 0x282   : > { %v1836_v44 = vsel %vm861_vm2, %v4910_v5, 0.0  ;;  %v2460_v3 = vsel %vm519_vm0, %v5010_v51, %v2459_v4  ;;  %v1835_v28 = vadd.f32 %v1834_v25, %v1833_v32  ;;  %v2573_v50 = vsel %vm861_vm2, %v4923_v27, 0.0 }
 0x283   : > { %v1935_v33 = vadd.f32 %v1934_v20, %v1933_v19  ;;  %v1904_v2 = vmul.f32 %v4940_v39, %v4940_v39  ;;  %v2572_v21 = vadd.f32 %v2571_v53, %v2570_v16  ;;  %v2675_v20 = vsel %vm861_vm2, %v2638_v13, 0.0 }
 0x284   : > { %3132 = vmatmul.msk.bf16.gmra.mxu1 %vm935_vm4, %v4972_v15  ;;  %v2671_v15 = vsel %vm861_vm2, %v2636_v0, 0.0  ;;  %v1938_v0 = vsel %vm861_vm2, %v1902_v54, 0.0  ;;  %v1838_v14 = vsel %vm861_vm2, %v4926_v22, 0.0  ;;  %v2640_v1 = vmul.f32 %v4952_v60, %v4952_v60 }
 0x285   : > { %v2672_v29 = vadd.f32 %v2671_v15, %v2670_v7  ;;  %v1937_v43 = vadd.f32 %v1936_v45, %v1935_v33  ;;  %v1837_v19 = vadd.f32 %v1836_v44, %v1835_v28  ;;  %v1940_v35 = vsel %vm861_vm2, %v1903_v6, 0.0 }
 0x286   : > { %v2574_v17 = vadd.f32 %v2573_v50, %v2572_v21  ;;  %v2575_v15 = vsel %vm861_vm2, %v4938_v24, 0.0  ;;  %v2677_v54 = vsel %vm861_vm2, %v2639_v47, 0.0  ;;  %v1905_v4 = vmul.f32 %v4959_v55, %v4959_v55 }
 0x287   : > { %v5068_v11 = vpop.f32.mrf.mxu3  ;;  %v2674_v51 = vadd.f32 %v2673_v31, %v2672_v29  ;;  %v1939_v12 = vadd.f32 %v1938_v0, %v1937_v43  ;;  %v1839_v33 = vadd.f32 %v1838_v14, %v1837_v19  ;;  %v1840_v16 = vsel %vm861_vm2, %v4940_v39, 0.0 }
 0x288   : > { %v1942_v25 = vsel %vm861_vm2, %v1904_v2, 0.0  ;;  %v2577_v13 = vsel %vm861_vm2, %v4952_v60, 0.0  ;;  %v2679_v29 = vsel %vm861_vm2, %v2640_v1, 0.0  ;;  %v2641_v53 = vmul.f32 %v4967_v63, %v4967_v63 }
 0x289   : > { %v5075_v40 = vpop.f32.mrf.mxu1  ;;  %v2676_v32 = vadd.f32 %v2675_v20, %v2674_v51  ;;  %v1941_v45 = vadd.f32 %v1940_v35, %v1939_v12  ;;  %v2576_v6 = vadd.f32 %v2575_v15, %v2574_v17  ;;  %v1842_v0 = vsel %vm861_vm2, %v4959_v55, 0.0 }
 0x28a   : > { %v1906_v47 = vmul.f32 %v4969_v37, %v4969_v37  ;;  %v1944_v43 = vsel %vm861_vm2, %v1905_v4, 0.0  ;;  %v2642_v50 = vmul.f32 %v4976_v52, %v4976_v52  ;;  %v2579_v20 = vsel %vm861_vm2, %v4967_v63, 0.0 }
 0x28b   : > { %v2678_v44 = vadd.f32 %v2677_v54, %v2676_v32  ;;  %v1943_v28 = vadd.f32 %v1942_v25, %v1941_v45  ;;  %v2578_v2 = vadd.f32 %v2577_v13, %v2576_v6  ;;  %v1907_v14 = vmul.f32 %v4979_v38, %v4979_v38 }
 0x28c   : > { %3183 = vmatmul.msk.bf16.gmra.mxu3 %vm935_vm4, %v2460_v3  ;;  %v1841_v3 = vadd.f32 %v1840_v16, %v1839_v33  ;;  %v2681_v51 = vsel %vm861_vm2, %v2641_v53, 0.0  ;;  %v1844_v19 = vsel %vm861_vm2, %v4969_v37, 0.0  ;;  %v2643_v12 = vmul.f32 %v4988_v62, %v4988_v62 }
 0x28d   : > { %v2680_v21 = vadd.f32 %v2679_v29, %v2678_v44  ;;  %v1945_v35 = vadd.f32 %v1944_v43, %v1943_v28  ;;  %v1946_v17 = vsel %vm861_vm2, %v1906_v47, 0.0  ;;  %v2581_v15 = vsel %vm861_vm2, %v4976_v52, 0.0 }
 0x28e   : > { %v1843_v1 = vadd.f32 %v1842_v0, %v1841_v3  ;;  %v1908_v54 = vmul.f32 %v4991_v18, %v4991_v18  ;;  %v2580_v4 = vadd.f32 %v2579_v20, %v2578_v2  ;;  %v1846_v32 = vsel %vm861_vm2, %v4979_v38, 0.0 }
 0x28f   : > { %v5105_v7 = vpop.f32.mrf.mxu3  ;;  %v2644_v33 = vmul.f32 %v5029_v57, %v5029_v57  ;;  %v2682_v25 = vadd.f32 %v2681_v51, %v2680_v21  ;;  %v1948_v13 = vsel %vm861_vm2, %v1907_v14, 0.0  ;;  %v1909_v29 = vmul.f32 %v5043_v10, %v5043_v10 }
 0x290   : > { %v1845_v45 = vadd.f32 %v1844_v19, %v1843_v1  ;;  %v1947_v53 = vadd.f32 %v1946_v17, %v1945_v35  ;;  %v2582_v6 = vadd.f32 %v2581_v15, %v2580_v4  ;;  %v2583_v44 = vsel %vm861_vm2, %v4988_v62, 0.0 }
 0x291   : > { %v5115_v31 = vpop.f32.mrf.mxu1  ;;  %v2685_v0 = vsel %vm861_vm2, %v2643_v12, 0.0  ;;  %v1848_v43 = vsel %vm861_vm2, %v4991_v18, 0.0  ;;  %v2585_v21 = vsel %vm861_vm2, %v5029_v57, 0.0  ;;  %v2687_v20 = vsel %vm861_vm2, %v2644_v33, 0.0 }
 0x292   : > { %v1847_v28 = vadd.f32 %v1846_v32, %v1845_v45  ;;  %v1949_v2 = vadd.f32 %v1948_v13, %v1947_v53  ;;  %v2645_v14 = vmul.f32 %v5068_v11, %v5068_v11  ;;  %v2584_v1 = vadd.f32 %v2583_v44, %v2582_v6 }
 0x293   : > { %v1850_v19 = vsel %vm861_vm2, %v5043_v10, 0.0  ;;  %v1952_v12 = vsel %vm861_vm2, %v1909_v29, 0.0  ;;  %v1910_v15 = vmul.f32 %v5075_v40, %v5075_v40  ;;  %v2587_v32 = vsel %vm861_vm2, %v5068_v11, 0.0 }
 0x294   : > { %3133 = vmatmul.msk.bf16.gmra.mxu1 %vm935_vm4, %v5000_v36  ;;  %v2683_v36 = vsel %vm861_vm2, %v2642_v50, 0.0  ;;  %v1950_v50 = vsel %vm861_vm2, %v1908_v54, 0.0  ;;  %v1849_v35 = vadd.f32 %v1848_v43, %v1847_v28  ;;  %v2646_v54 = vmul.f32 %v5105_v7, %v5105_v7 }
 0x295   : > { %v2684_v3 = vadd.f32 %v2683_v36, %v2682_v25  ;;  %v1951_v17 = vadd.f32 %v1950_v50, %v1949_v2  ;;  %v2586_v4 = vadd.f32 %v2585_v21, %v2584_v1  ;;  %v2689_v45 = vsel %vm861_vm2, %v2645_v14, 0.0 }
 0x296   : > { %v1851_v33 = vadd.f32 %v1850_v19, %v1849_v35  ;;  %v1911_v13 = vmul.f32 %v5115_v31, %v5115_v31  ;;  %v1852_v53 = vsel %vm861_vm2, %v5075_v40, 0.0  ;;  %v2589_v6 = vsel %vm861_vm2, %v5105_v7, 0.0 }
 0x297   : > { %v5145_v16 = vpop.f32.mrf.mxu3  ;;  %v2686_v51 = vadd.f32 %v2685_v0, %v2684_v3  ;;  %v1953_v25 = vadd.f32 %v1952_v12, %v1951_v17  ;;  %v2588_v3 = vadd.f32 %v2587_v32, %v2586_v4  ;;  %v1954_v28 = vsel %vm861_vm2, %v1910_v15, 0.0 }
 0x298   : > { %5541 = vst [vmem:[#allocation14_spill] sm:$0xff] %v5145_v16  ;;  %v2647_v44 = vmul.f32 %v5145_v16, %v5145_v16  ;;  %v2691_v43 = vsel %vm861_vm2, %v2646_v54, 0.0  ;;  %v1854_v50 = vsel %vm861_vm2, %v5115_v31, 0.0  ;;  %v2591_v21 = vsel %vm861_vm2, %v5145_v16, 0.0 }
 0x299   : > { %v5153_v47 = vpop.f32.mrf.mxu1  ;;  %v2688_v36 = vadd.f32 %v2687_v20, %v2686_v51  ;;  %v1853_v51 = vadd.f32 %v1852_v53, %v1851_v33  ;;  %v2590_v19 = vadd.f32 %v2589_v6, %v2588_v3  ;;  %v1956_v12 = vsel %vm861_vm2, %v1911_v13, 0.0 }
 0x29a   : > { %v1912_v20 = vmul.f32 %v5153_v47, %v5153_v47  ;;  %v2693_v35 = vsel %vm861_vm2, %v2647_v44, 0.0  ;;  %v1856_v17 = vsel %vm861_vm2, %v5153_v47, 0.0  ;;  %v1955_v4 = vadd.f32 %v1954_v28, %v1953_v25 }
 0x29b   : > { %v1855_v16 = vadd.f32 %v1854_v50, %v1853_v51 }
 0x29d   : > { %v1857_v53 = vadd.f32 %v1856_v17, %v1855_v16 }
 0x29f   : > { %v2522_v29 = vpop.f32.mrf.mxu3 }
 0x2a0   : > { %v3395_v0 = vpack.i.bf16 %v2522_v29, %v4827_v58  ;;  %v2648_v14 = vmul.f32 %v2522_v29, %v2522_v29  ;;  %v2690_v58 = vadd.f32 %v2689_v45, %v2688_v36  ;;  %v2593_v15 = vsel %vm861_vm2, %v2522_v29, 0.0 }
 0x2a1   : > { %v1787_v2 = vpop.f32.mrf.mxu1  ;;  %v1957_v45 = vadd.f32 %v1956_v12, %v1955_v4 }
 0x2a2   : > { %3396 = vxpose.xlu0.b32.start [1/16] (narrow) %v3395_v0, 8  ;;  %v3358_v1 = vpack.i.bf16 %v1787_v2, %v4836_v49  ;;  %v1913_v54 = vmul.f32 %v1787_v2, %v1787_v2  ;;  %v2692_v32 = vadd.f32 %v2691_v43, %v2690_v58  ;;  %v2592_v0 = vadd.f32 %v2591_v21, %v2590_v19 }
 0x2a3   : > { %v1958_v49 = vsel %vm861_vm2, %v1912_v20, 0.0  ;;  %v2695_v36 = vsel %vm861_vm2, %v2648_v14, 0.0  ;;  %v1858_v33 = vsel %vm861_vm2, %v1787_v2, 0.0 }
 0x2a4   : > { %3359 = vxpose.xlu2.b32.start [1/16] (narrow) %v3358_v1, 8  ;;  %v2694_v13 = vadd.f32 %v2693_v35, %v2692_v32  ;;  %v2594_v6 = vadd.f32 %v2593_v15, %v2592_v0  ;;  %v1960_v3 = vsel %vm861_vm2, %v1913_v54, 0.0  ;;  %v1959_v43 = vadd.f32 %v1958_v49, %v1957_v45 }
 0x2a5   : > { %v1859_v21 = vadd.f32 %v1858_v33, %v1857_v53 }
 0x2a6   : > { %v2696_v50 = vadd.f32 %v2695_v36, %v2694_v13  ;;  %v1961_v51 = vadd.f32 %v1960_v3, %v1959_v43 }
 0x2a7   : > { %v2524_v44 = vpop.f32.mrf.mxu3 }
 0x2a8   : > { %v3397_v29 = vpack.i.bf16 %v2524_v44, %v4846_v59  ;;  %v2595_v25 = vsel %vm861_vm2, %v2524_v44, 0.0  ;;  %v2649_v28 = vmul.f32 %v2524_v44, %v2524_v44 }
 0x2a9   : > { %v2596_v20 = vadd.f32 %v2595_v25, %v2594_v6  ;;  %v1789_v1 = vpop.f32.mrf.mxu1 }
 0x2aa   : > { %v2697_v14 = vsel %vm861_vm2, %v2649_v28, 0.0  ;;  %v3360_v2 = vpack.i.bf16 %v1789_v1, %v4849_v61  ;;  %v1860_v16 = vsel %vm861_vm2, %v1789_v1, 0.0  ;;  %v1914_v58 = vmul.f32 %v1789_v1, %v1789_v1  ;;  %3398 = vxpose.xlu0.b32.cont [2/16] (narrow) %v3397_v29, 8 }
 0x2ab   : > { %v2698_v19 = vadd.f32 %v2697_v14, %v2696_v50  ;;  %v1861_v12 = vadd.f32 %v1860_v16, %v1859_v21 }
 0x2ac   : > { %v1962_v59 = vsel %vm861_vm2, %v1914_v58, 0.0  ;;  %3361 = vxpose.xlu2.b32.cont [2/16] (narrow) %v3360_v2, 8 }
 0x2ad   : > { %v1963_v35 = vadd.f32 %v1962_v59, %v1961_v51 }
 0x2af   : > { %v2527_v17 = vpop.f32.mrf.mxu3 }
 0x2b0   : > { %v3399_v15 = vpack.i.bf16 %v2527_v17, %v4862_v34  ;;  %v2597_v54 = vsel %vm861_vm2, %v2527_v17, 0.0  ;;  %v2650_v4 = vmul.f32 %v2527_v17, %v2527_v17 }
 0x2b1   : > { %v2598_v32 = vadd.f32 %v2597_v54, %v2596_v20  ;;  %v1792_v0 = vpop.f32.mrf.mxu1 }
 0x2b2   : > { %v2699_v61 = vsel %vm861_vm2, %v2650_v4, 0.0  ;;  %v3362_v49 = vpack.i.bf16 %v1792_v0, %v4865_v56  ;;  %v1862_v36 = vsel %vm861_vm2, %v1792_v0, 0.0  ;;  %v1915_v33 = vmul.f32 %v1792_v0, %v1792_v0  ;;  %3400 = vxpose.xlu0.b32.cont [3/16] (narrow) %v3399_v15, 8 }
 0x2b3   : > { %v2700_v45 = vadd.f32 %v2699_v61, %v2698_v19  ;;  %v1863_v13 = vadd.f32 %v1862_v36, %v1861_v12 }
 0x2b4   : > { %v1964_v53 = vsel %vm861_vm2, %v1915_v33, 0.0  ;;  %3363 = vxpose.xlu2.b32.cont [3/16] (narrow) %v3362_v49, 8 }
 0x2b5   : > { %v1965_v6 = vadd.f32 %v1964_v53, %v1963_v35 }
 0x2b7   : > { %v2529_v34 = vpop.f32.mrf.mxu3 }
 0x2b8   : > { %v3401_v44 = vpack.i.bf16 %v2529_v34, %v4877_v30  ;;  %v2599_v3 = vsel %vm861_vm2, %v2529_v34, 0.0  ;;  %v2651_v29 = vmul.f32 %v2529_v34, %v2529_v34 }
 0x2b9   : > { %v2600_v25 = vadd.f32 %v2599_v3, %v2598_v32  ;;  %v1794_v28 = vpop.f32.mrf.mxu1 }
 0x2ba   : > { %v2701_v56 = vsel %vm861_vm2, %v2651_v29, 0.0  ;;  %v3364_v43 = vpack.i.bf16 %v1794_v28, %v4879_v8  ;;  %v1864_v50 = vsel %vm861_vm2, %v1794_v28, 0.0  ;;  %v1916_v21 = vmul.f32 %v1794_v28, %v1794_v28  ;;  %3402 = vxpose.xlu0.b32.cont [4/16] (narrow) %v3401_v44, 8 }
 0x2bb   : > { %v2702_v20 = vadd.f32 %v2701_v56, %v2700_v45  ;;  %v1865_v1 = vadd.f32 %v1864_v50, %v1863_v13 }
 0x2bc   : > { %v1966_v14 = vsel %vm861_vm2, %v1916_v21, 0.0  ;;  %3365 = vxpose.xlu2.b32.cont [4/16] (narrow) %v3364_v43, 8 }
 0x2bd   : > { %v1967_v2 = vadd.f32 %v1966_v14, %v1965_v6 }
 0x2bf   : > { %v2532_v30 = vpop.f32.mrf.mxu3 }
 0x2c0   : > { %v3403_v16 = vpack.i.bf16 %v2532_v30, %v4892_v42  ;;  %v2601_v58 = vsel %vm861_vm2, %v2532_v30, 0.0  ;;  %v2652_v51 = vmul.f32 %v2532_v30, %v2532_v30 }
 0x2c1   : > { %v2602_v19 = vadd.f32 %v2601_v58, %v2600_v25  ;;  %v1797_v12 = vpop.f32.mrf.mxu1 }
 0x2c2   : > { %v2703_v8 = vsel %vm861_vm2, %v2652_v51, 0.0  ;;  %v3366_v59 = vpack.i.bf16 %v1797_v12, %v4897_v26  ;;  %v1866_v35 = vsel %vm861_vm2, %v1797_v12, 0.0  ;;  %v1917_v17 = vmul.f32 %v1797_v12, %v1797_v12  ;;  %3404 = vxpose.xlu0.b32.cont [5/16] (narrow) %v3403_v16, 8 }
 0x2c3   : > { %v2704_v15 = vadd.f32 %v2703_v8, %v2702_v20  ;;  %v5223_v54 = vadd.f32 %v1866_v35, %v1865_v1 }
 0x2c4   : > { %v1968_v4 = vsel %vm861_vm2, %v1917_v17, 0.0  ;;  %3367 = vxpose.xlu2.b32.cont [5/16] (narrow) %v3366_v59, 8 }
 0x2c5   : > { %v5226_v42 = vadd.f32 %v1968_v4, %v1967_v2 }
 0x2c7   : > { %v2534_v32 = vpop.f32.mrf.mxu3 }
 0x2c8   : > { %v3405_v0 = vpack.i.bf16 %v2534_v32, %v4908_v23  ;;  %v2603_v61 = vsel %vm861_vm2, %v2534_v32, 0.0  ;;  %v2653_v49 = vmul.f32 %v2534_v32, %v2534_v32 }
 0x2c9   : > { %v2604_v36 = vadd.f32 %v2603_v61, %v2602_v19  ;;  %v1799_v26 = vpop.f32.mrf.mxu1 }
 0x2ca   : > { %v2705_v33 = vsel %vm861_vm2, %v2653_v49, 0.0  ;;  %v3368_v45 = vpack.i.bf16 %v1799_v26, %v4910_v5  ;;  %3406 = vxpose.xlu0.b32.cont [6/16] (narrow) %v3405_v0, 8  ;;  %v1918_v1 = vmul.f32 %v1799_v26, %v1799_v26  ;;  %v1868_v16 = vsel %vm861_vm2, %v1799_v26, 0.0 }
 0x2cb   : > { %v2706_v13 = vadd.f32 %v2705_v33, %v2704_v15  ;;  %v1869_v35 = vadd.f32 %v1868_v16, %v5223_v54 }
 0x2cc   : > { %3369 = vxpose.xlu2.b32.cont [6/16] (narrow) %v3368_v45, 8  ;;  %v1970_v58 = vsel %vm861_vm2, %v1918_v1, 0.0 }
 0x2cd   : > { %v1971_v17 = vadd.f32 %v1970_v58, %v5226_v42 }
 0x2cf   : > { %v2537_v53 = vpop.f32.mrf.mxu3 }
 0x2d0   : > { %v3407_v6 = vpack.i.bf16 %v2537_v53, %v4923_v27  ;;  %v2654_v14 = vmul.f32 %v2537_v53, %v2537_v53  ;;  %v2605_v51 = vsel %vm861_vm2, %v2537_v53, 0.0 }
 0x2d1   : > { %v1802_v34 = vpop.f32.mrf.mxu1  ;;  %v2606_v15 = vadd.f32 %v2605_v51, %v2604_v36 }
 0x2d2   : > { %v3370_v44 = vpack.i.bf16 %v1802_v34, %v4926_v22  ;;  %3408 = vxpose.xlu0.b32.cont [7/16] (narrow) %v3407_v6, 8  ;;  %v1919_v30 = vmul.f32 %v1802_v34, %v1802_v34  ;;  %v2707_v19 = vsel %vm861_vm2, %v2654_v14, 0.0  ;;  %v1870_v8 = vsel %vm861_vm2, %v1802_v34, 0.0 }
 0x2d3   : > { %v2708_v0 = vadd.f32 %v2707_v19, %v2706_v13  ;;  %v1871_v33 = vadd.f32 %v1870_v8, %v1869_v35 }
 0x2d4   : > { %3371 = vxpose.xlu2.b32.cont [7/16] (narrow) %v3370_v44, 8  ;;  %v1972_v59 = vsel %vm861_vm2, %v1919_v30, 0.0 }
 0x2d5   : > { %v1973_v45 = vadd.f32 %v1972_v59, %v1971_v17  ;;  %v2363_v59 = vrot.slane %v5027_v46, 4 }
 0x2d7   : > { %v2539_v23 = vpop.f32.mrf.mxu3 }
 0x2d8   : > { %v3409_v3 = vpack.i.bf16 %v2539_v23, %v4938_v24  ;;  %v2655_v12 = vmul.f32 %v2539_v23, %v2539_v23  ;;  %v2607_v61 = vsel %vm861_vm2, %v2539_v23, 0.0 }
 0x2d9   : > { %v1804_v29 = vpop.f32.mrf.mxu1 }
 0x2da   : > { %v3372_v25 = vpack.i.bf16 %v1804_v29, %v4940_v39  ;;  %3410 = vxpose.xlu0.b32.cont [8/16] (narrow) %v3409_v3, 8  ;;  %v2709_v53 = vsel %vm861_vm2, %v2655_v12, 0.0  ;;  %v1872_v6 = vsel %vm861_vm2, %v1804_v29, 0.0 }
 0x2dc   : > { %3373 = vxpose.xlu2.b32.cont [8/16] (narrow) %v3372_v25, 8  ;;  %v1873_v25 = vadd.f32 %v1872_v6, %v1871_v33 }
 0x2df   : > { %v2542_v5 = vpop.f32.mrf.mxu3 }
 0x2e0   : > { %v3411_v28 = vpack.i.bf16 %v2542_v5, %v4952_v60  ;;  %v2656_v4 = vmul.f32 %v2542_v5, %v2542_v5  ;;  %v2609_v36 = vsel %vm861_vm2, %v2542_v5, 0.0 }
 0x2e1   : > { %v1807_v56 = vpop.f32.mrf.mxu1 }
 0x2e2   : > { %v3374_v43 = vpack.i.bf16 %v1807_v56, %v4959_v55  ;;  %3412 = vxpose.xlu0.b32.cont [9/16] (narrow) %v3411_v28, 8  ;;  %v1921_v49 = vmul.f32 %v1807_v56, %v1807_v56  ;;  %v2711_v44 = vsel %vm861_vm2, %v2656_v4, 0.0  ;;  %v1874_v23 = vsel %vm861_vm2, %v1807_v56, 0.0 }
 0x2e3   : > { %v1875_v56 = vadd.f32 %v1874_v23, %v1873_v25 }
 0x2e4   : > { %3375 = vxpose.xlu2.b32.cont [9/16] (narrow) %v3374_v43, 8  ;;  %v1976_v28 = vsel %vm861_vm2, %v1921_v49, 0.0  ;;  %v2261_v43 = vrot.slane %v5006_v48, 4 }
 0x2e6   : > { %v5317_v19 = vadd.f32 %v2261_v43, %v5006_v48 }
 0x2e7   : > { %v5238_v27 = vpop.f32.mrf.mxu3 }
 0x2e8   : > { %v3413_v22 = vpack.i.bf16 %v5238_v27, %v4967_v63  ;;  %v1120_v63 = vrot.slane %v4949_v9, 4  ;;  %v2657_v13 = vmul.f32 %v5238_v27, %v5238_v27 }
 0x2e9   : > { %v5242_v50 = vpop.f32.mrf.mxu1 }
 0x2ea   : > { %v3376_v24 = vpack.i.bf16 %v5242_v50, %v4969_v37  ;;  %3414 = vxpose.xlu0.b32.cont [10/16] (narrow) %v3413_v22, 8  ;;  %v1922_v3 = vmul.f32 %v5242_v50, %v5242_v50 }
 0x2ec   : > { %3377 = vxpose.xlu2.b32.cont [10/16] (narrow) %v3376_v24, 8  ;;  %v2611_v24 = vsel %vm861_vm2, %v5238_v27, 0.0 }
 0x2ef   : > { %v5246_v39 = vpop.f32.mrf.mxu3 }
 0x2f0   : > { %v3415_v60 = vpack.i.bf16 %v5246_v39, %v4976_v52  ;;  %v5262_v52 = vadd.f32 %v1120_v63, %v4949_v9  ;;  %v2658_v5 = vmul.f32 %v5246_v39, %v5246_v39  ;;  %v1876_v63 = vsel %vm861_vm2, %v5242_v50, 0.0 }
 0x2f1   : > { %v5250_v55 = vpop.f32.mrf.mxu1  ;;  %v2613_v14 = vsel %vm861_vm2, %v5246_v39, 0.0  ;;  %v1877_v12 = vadd.f32 %v1876_v63, %v1875_v56 }
 0x2f2   : > { %v3378_v21 = vpack.i.bf16 %v5250_v55, %v4979_v38  ;;  %3416 = vxpose.xlu0.b32.cont [11/16] (narrow) %v3415_v60, 8  ;;  %v1122_v9 = vrot.slane %v5262_v52, 2  ;;  %v1923_v30 = vmul.f32 %v5250_v55, %v5250_v55  ;;  %v2715_v27 = vsel %vm861_vm2, %v2658_v5, 0.0 }
 0x2f3   : > { %v1878_v58 = vsel %vm861_vm2, %v5250_v55, 0.0 }
 0x2f4   : > { %3379 = vxpose.xlu2.b32.cont [11/16] (narrow) %v3378_v21, 8  ;;  %v2713_v21 = vsel %vm861_vm2, %v2657_v13, 0.0  ;;  %v1879_v55 = vadd.f32 %v1878_v58, %v1877_v12 }
 0x2f7   : > { %v5255_v20 = vpop.f32.mrf.mxu3 }
 0x2f8   : > { %v3417_v37 = vpack.i.bf16 %v5255_v20, %v4988_v62  ;;  %v1222_v62 = vrot.slane %v4956_v41, 4  ;;  %v2659_v48 = vmul.f32 %v5255_v20, %v5255_v20  ;;  %v2615_v33 = vsel %vm861_vm2, %v5255_v20, 0.0 }
 0x2f9   : > { %v5259_v2 = vpop.f32.mrf.mxu1 }
 0x2fa   : > { %v3380_v38 = vpack.i.bf16 %v5259_v2, %v4991_v18  ;;  %3418 = vxpose.xlu0.b32.cont [12/16] (narrow) %v3417_v37, 8  ;;  %v1920_v18 = vmul.f32 %v1804_v29, %v1804_v29  ;;  %v2710_v29 = vadd.f32 %v2709_v53, %v2708_v0  ;;  %v1978_v37 = vsel %vm861_vm2, %v1922_v3, 0.0 }
 0x2fb   : > { %v5314_v50 = vadd.f32 %v1222_v62, %v4956_v41  ;;  %v1980_v41 = vsel %vm861_vm2, %v1923_v30, 0.0  ;;  %v3316_v62 = vpop.trf.xlu0  ;;  %v1924_v4 = vmul.f32 %v5259_v2, %v5259_v2  ;;  %v2717_v53 = vsel %vm861_vm2, %v2659_v48, 0.0 }
 0x2fc   : > { %3381 = vxpose.xlu2.b32.cont [12/16] (narrow) %v3380_v38, 8  ;;  %v1974_v42 = vsel %vm861_vm2, %v1920_v18, 0.0  ;;  %v2712_v60 = vadd.f32 %v2711_v44, %v2710_v29  ;;  %v3320_v0 = vunpack.i.h.bf16 %v3316_v62  ;;  %v1880_v6 = vsel %vm861_vm2, %v5259_v2, 0.0 }
 0x2fd   : > { %v1982_v20 = vsel %vm861_vm2, %v1924_v4, 0.0 }
 0x2fe   : > { %v2714_v39 = vadd.f32 %v2713_v21, %v2712_v60 }
 0x2ff   : > { %v5276_v32 = vpop.f32.mrf.mxu3 }
 0x300   : > { %v3419_v26 = vpack.i.bf16 %v5276_v32, %v5029_v57  ;;  %v2608_v57 = vadd.f32 %v2607_v61, %v2606_v15  ;;  %v3353_v15 = vpop.trf.xlu1  ;;  %v3317_v61 = vunpack.i.l.bf16 %v3316_v62 }
 0x301   : > { %v5283_v54 = vpop.f32.mrf.mxu1  ;;  %v3357_v49 = vunpack.i.h.bf16 %v3353_v15 }
 0x302   : > { %v3382_v34 = vpack.i.bf16 %v5283_v54, %v5043_v10  ;;  %3420 = vxpose.xlu0.b32.cont [13/16] (narrow) %v3419_v26, 8  ;;  %v1975_v10 = vadd.f32 %v1974_v42, %v1973_v45  ;;  %v2610_v22 = vadd.f32 %v2609_v36, %v2608_v57  ;;  %v3354_v45 = vunpack.i.l.bf16 %v3353_v15 }
 0x303   : > { %v1925_v42 = vmul.f32 %v5283_v54, %v5283_v54  ;;  %v1293_v13 = vpack.c.bf16 %v3320_v0, %v3317_v61  ;;  %v1882_v2 = vsel %vm861_vm2, %v5283_v54, 0.0 }
 0x304   : > { %3383 = vxpose.xlu2.b32.cont [13/16] (narrow) %v3382_v34, 8  ;;  %v1977_v1 = vadd.f32 %v1976_v28, %v1975_v10  ;;  %v2612_v16 = vadd.f32 %v2611_v24, %v2610_v22  ;;  %v2617_v34 = vsel %vm861_vm2, %v5276_v32, 0.0  ;;  %v2434_v23 = vpack.c.bf16 %v3357_v49, %v3354_v45 }
 0x305   : > { %1294 = vst [vmem:[%s5346_s17] sm:$0xff] %v1293_v13  ;;  %v1881_v10 = vadd.f32 %v1880_v6, %v1879_v55  ;;  %v1984_v24 = vsel %vm861_vm2, %v1925_v42, 0.0  ;;  %v2263_v45 = vrot.slane %v5317_v19, 2 }
 0x306   : > { %v1979_v18 = vadd.f32 %v1978_v37, %v1977_v1  ;;  %v2614_v35 = vadd.f32 %v2613_v14, %v2612_v16  ;;  %3161 = vst [vmem:[%s5346_s17 + $0x10] sm:$0xff] %v2434_v23 }
 0x307   : > { %v2554_v38 = vpop.f32.mrf.mxu3  ;;  %v1883_v37 = vadd.f32 %v1882_v2, %v1881_v10 }
 0x308   : > { %v3421_v51 = vpack.i.bf16 %v2554_v38, %v5068_v11  ;;  %v2716_v11 = vadd.f32 %v2715_v27, %v2714_v39  ;;  %v1981_v26 = vadd.f32 %v1980_v41, %v1979_v18  ;;  %v2661_v57 = vmul.f32 %v2554_v38, %v2554_v38  ;;  %v5542_v18 = vld [vmem:[#allocation14_spill] sm:$0xff] }
 0x309   : > { %v1819_v8 = vpop.f32.mrf.mxu1  ;;  %v2616_v3 = vadd.f32 %v2615_v33, %v2614_v35  ;;  %v1224_v33 = vrot.slane %v5314_v50, 2 }
 0x30a   : > { %v3384_v17 = vpack.i.bf16 %v1819_v8, %v5075_v40  ;;  %3422 = vxpose.xlu0.b32.cont [14/16] (narrow) %v3421_v51, 8  ;;  %v2660_v40 = vmul.f32 %v5276_v32, %v5276_v32  ;;  %v2619_v32 = vsel %vm861_vm2, %v2554_v38, 0.0  ;;  %v1926_v28 = vmul.f32 %v1819_v8, %v1819_v8 }
 0x30b   : > { %v2718_v43 = vadd.f32 %v2717_v53, %v2716_v11  ;;  %v2618_v22 = vadd.f32 %v2617_v34, %v2616_v3  ;;  %v2721_v54 = vsel %vm861_vm2, %v2661_v57, 0.0  ;;  %v1884_v60 = vsel %vm861_vm2, %v1819_v8, 0.0 }
 0x30c   : > { %3385 = vxpose.xlu2.b32.cont [14/16] (narrow) %v3384_v17, 8  ;;  %v2719_v29 = vsel %vm861_vm2, %v2660_v40, 0.0  ;;  %v1983_v63 = vadd.f32 %v1982_v20, %v1981_v26  ;;  %v1986_v30 = vsel %vm861_vm2, %v1926_v28, 0.0  ;;  %v1885_v51 = vadd.f32 %v1884_v60, %v1883_v37 }
 0x30d   : > { %v2720_v1 = vadd.f32 %v2719_v29, %v2718_v43  ;;  %v2620_v14 = vadd.f32 %v2619_v32, %v2618_v22  ;;  %v1225_v20 = vadd.f32 %v1224_v33, %v5314_v50  ;;  %v2264_v29 = vadd.f32 %v2263_v45, %v5317_v19 }
 0x30e   : > { %v1985_v27 = vadd.f32 %v1984_v24, %v1983_v63 }
 0x30f   : > { %v2557_v36 = vpop.f32.mrf.mxu3  ;;  %v2722_v58 = vadd.f32 %v2721_v54, %v2720_v1 }
 0x310   : > { %v3423_v44 = vpack.i.bf16 %v2557_v36, %v5105_v7  ;;  %v2662_v5 = vmul.f32 %v2557_v36, %v2557_v36  ;;  %v2621_v56 = vsel %vm861_vm2, %v2557_v36, 0.0  ;;  %v1987_v55 = vadd.f32 %v1986_v30, %v1985_v27 }
 0x311   : > { %v1822_v25 = vpop.f32.mrf.mxu1  ;;  %v2622_v39 = vadd.f32 %v2621_v56, %v2620_v14 }
 0x312   : > { %v3386_v7 = vpack.i.bf16 %v1822_v25, %v5115_v31  ;;  %3424 = vxpose.xlu0.b32.cont [15/16] (narrow) %v3423_v44, 8  ;;  %v1927_v21 = vmul.f32 %v1822_v25, %v1822_v25  ;;  %v2364_v31 = vadd.f32 %v2363_v59, %v5027_v46  ;;  %v2723_v38 = vsel %vm861_vm2, %v2662_v5, 0.0 }
 0x313   : > { %v1886_v16 = vsel %vm861_vm2, %v1822_v25, 0.0  ;;  %v2724_v46 = vadd.f32 %v2723_v38, %v2722_v58 }
 0x314   : > { %3387 = vxpose.xlu2.b32.cont [15/16] (narrow) %v3386_v7, 8  ;;  %v1988_v8 = vsel %vm861_vm2, %v1927_v21, 0.0  ;;  %v1887_v59 = vadd.f32 %v1886_v16, %v1885_v51  ;;  %v2365_v34 = vrot.slane %v2364_v31, 2 }
 0x315   : > { %v1989_v40 = vadd.f32 %v1988_v8, %v1987_v55 }
 0x316   : > { %v2366_v5 = vadd.f32 %v2365_v34, %v2364_v31 }
 0x317   : > { %v2559_v12 = vpop.f32.mrf.mxu3 }
 0x318   : > { %v3425_v35 = vpack.i.bf16 %v2559_v12, %v5542_v18  ;;  %v2623_v17 = vsel %vm861_vm2, %v2559_v12, 0.0  ;;  %v2663_v11 = vmul.f32 %v2559_v12, %v2559_v12  ;;  %v2367_v60 = vrot.slane %v2366_v5, 1 }
 0x319   : > { %v2624_v41 = vadd.f32 %v2623_v17, %v2622_v39  ;;  %v1824_v48 = vpop.f32.mrf.mxu1 }
 0x31a   : > { %v2725_v62 = vsel %vm861_vm2, %v2663_v11, 0.0  ;;  %v3388_v15 = vpack.i.bf16 %v1824_v48, %v5153_v47  ;;  %v1888_v4 = vsel %vm861_vm2, %v1824_v48, 0.0  ;;  %v1928_v0 = vmul.f32 %v1824_v48, %v1824_v48  ;;  %3426 = vxpose.xlu0.b32.end [16/16] (narrow) %v3425_v35, 8 }
 0x31b   : > { %v2625_v61 = vrot.slane %v2624_v41, 4  ;;  %v2726_v49 = vadd.f32 %v2725_v62, %v2724_v46  ;;  %v1889_v26 = vadd.f32 %v1888_v4, %v1887_v59  ;;  %v1123_v47 = vadd.f32 %v1122_v9, %v5262_v52 }
 0x31c   : > { %v1990_v53 = vsel %vm861_vm2, %v1928_v0, 0.0  ;;  %3389 = vxpose.xlu2.b32.end [16/16] (narrow) %v3388_v15, 8  ;;  %v1226_v52 = vrot.slane %v1225_v20, 1  ;;  %v2265_v9 = vrot.slane %v2264_v29, 1  ;;  %v2368_v30 = vadd.f32 %v2367_v60, %v2366_v5 }
 0x31d   : > { %v2626_v6 = vadd.f32 %v2625_v61, %v2624_v41  ;;  %v2727_v42 = vrot.slane %v2726_v49, 4  ;;  %v1890_v36 = vrot.slane %v1889_v26, 4  ;;  %v1991_v13 = vadd.f32 %v1990_v53, %v1989_v40 }
 0x31e   : > { %v1124_v28 = vrot.slane %v1123_v47, 1  ;;  %v1227_v63 = vadd.f32 %v1226_v52, %v1225_v20  ;;  %v2266_v1 = vadd.f32 %v2265_v9, %v2264_v29 }
 0x31f   : > { %v2627_v57 = vrot.slane %v2626_v6, 2  ;;  %v2728_v44 = vadd.f32 %v2727_v42, %v2726_v49  ;;  %v1891_v23 = vadd.f32 %v1890_v36, %v1889_v26  ;;  %v1992_v3 = vrot.slane %v1991_v13, 4 }
 0x320   : > { %v1125_v50 = vadd.f32 %v1124_v28, %v1123_v47 }
 0x321   : > { %v2729_v2 = vrot.slane %v2728_v44, 2  ;;  %v1892_v25 = vrot.slane %v1891_v23, 2  ;;  %v1993_v32 = vadd.f32 %v1992_v3, %v1991_v13  ;;  %v2628_v7 = vadd.f32 %v2627_v57, %v2626_v6 }
 0x323   : > { %v1893_v43 = vadd.f32 %v1892_v25, %v1891_v23  ;;  %v1994_v10 = vrot.slane %v1993_v32, 2  ;;  %v2730_v22 = vadd.f32 %v2729_v2, %v2728_v44  ;;  %v2629_v19 = vrot.slane %v2628_v7, 1 }
 0x325   : > { %v1894_v24 = vrot.slane %v1893_v43, 1  ;;  %v1995_v54 = vadd.f32 %v1994_v10, %v1993_v32  ;;  %v2731_v37 = vrot.slane %v2730_v22, 1  ;;  %v2630_v38 = vadd.f32 %v2629_v19, %v2628_v7 }
 0x327   : > { %v1895_v56 = vadd.f32 %v1894_v24, %v1893_v43  ;;  %v1996_v21 = vrot.slane %v1995_v54, 1  ;;  %v2732_v58 = vadd.f32 %v2731_v37, %v2730_v22 }
 0x329   : > { %v1896_v14 = vadd.f32 %v1895_v56, %v1125_v50  ;;  %v1997_v31 = vadd.f32 %v1996_v21, %v1995_v54 }
 0x32b   : > { %v1998_v16 = vadd.f32 %v1997_v31, %v1227_v63  ;;  %v2267_v27 = vadd.f32 %v2266_v1, %v1896_v14 }
 0x32d   : > { %v2631_v51 = vadd.f32 %v2630_v38, %v2267_v27  ;;  %v2369_v39 = vadd.f32 %v2368_v30, %v1998_v16 }
 0x32f   : > { %2802 = vst.msk [vmem:[%s298_s12] sm:$0x1] %vm2801_vm5, %v2631_v51  ;;  %v2733_v12 = vadd.f32 %v2732_v58, %v2369_v39 }
 0x330   : > { %3460 = shalt.err (!%p3457_p5)
}
 0x331   : > { %3216 = dma.vmem_to_hbm [thread:$0]  (%p3649_p4), %s2845_s14, 16, %s2847_s16, %s2810_s7   ;;  %2803 = vst.msk [vmem:[%s304_s24] sm:$0x1] %vm2801_vm5, %v2733_v12 }
 0x332   : > { %s3475_s8 = sshra.s32 %s2861_s29, 4  ;;  %s3481_s13 = scalar_lea.hbm %s5477_s5, 2  ;;  %s3476_s8 = int_to_ptr.hbm [resolvable:$true] %s3475_s8 }
 0x333   : > { %s3477_s25 = scalar_lea.hbm %s3476_s8, 1  ;;  %p3482_p10 = scmp.lt.s32.totalorder %s3476_s8, %s5477_s5 }
 0x334   : > { %p3478_p6 = scmp.ne.s32.totalorder %s3476_s8, %s3477_s25  ;;  %p3483_p11 = scmp.lt.s32.totalorder %s3481_s13, %s3477_s25 }
 0x336   : > { %p3479_p7 = pnand %p3478_p6, %p3649_p4  ;;  %p3484_p12 = por %p3483_p11, %p3482_p10 }
 0x338   : > { %p3480_p9 = pneg %p3479_p7 }
 0x33a   : > { %p3485_p13 = pnand %p3484_p12, %p3480_p9 }
 0x33c   : > { %3488 = shalt.err (!%p3485_p13)
}
 0x33d   : > { %3217 = dma.vmem_to_hbm [thread:$0]  (%p3649_p4), %s2859_s27, 16, %s2861_s29, %s2810_s7   ;;  %v3390_v8 = vpop.trf.xlu2 }
 0x33e   : > { %v3394_v18 = vunpack.i.h.bf16 %v3390_v8  ;;  %v3391_v35 = vunpack.i.l.bf16 %v3390_v8  ;;  %s3212_s14 = sshll.u32 %s3563_s21, 5  ;;  %s2827_s11 = sshll.u32 %s5346_s17, 4  ;;  %s2828_s11 = int_to_ptr.vmem [resolvable:$true] %s2827_s11 }
 0x33f   : > { %s2826_s10 = scalar_lea.hbm %s5475_s3, %s3212_s14  ;;  %s2805_s27 = scalar_lea.sflag [#allocation3], %s5322_s15 }
 0x340   : > { %v2063_v17 = vpack.c.bf16 %v3394_v18, %v3391_v35  ;;  %s2829_s8 = sshll.u32 %s2826_s10, 4  ;;  %s3509_s0 = scalar_lea.hbm %s5475_s3, 64  ;;  %s2830_s8 = int_to_ptr.hbm [resolvable:$true] %s2829_s8 }
 0x341   : > { %s3503_s29 = sshra.s32 %s2830_s8, 4  ;;  %s3504_s29 = int_to_ptr.hbm [resolvable:$true] %s3503_s29 }
 0x342   : > { %3134 = vst [vmem:[%s5346_s17 + $0x8] sm:$0xff] %v2063_v17  ;;  %s3505_s7 = scalar_lea.hbm %s3504_s29, 32  ;;  %p3510_p3 = scmp.lt.s32.totalorder %s3504_s29, %s5475_s3 }
 0x343   : > { %p3506_p0 = scmp.ne.s32.totalorder %s3504_s29, %s3505_s7  ;;  %p3511_p5 = scmp.lt.s32.totalorder %s3509_s0, %s3505_s7 }
 0x345   : > { %p3507_p1 = pnand %p3506_p0, %p3649_p4  ;;  %p3512_p6 = por %p3511_p5, %p3510_p3 }
 0x346   : > { %v3427_v11 = vpop.trf.xlu0 }
 0x347   : > { %v3431_v55 = vunpack.i.h.bf16 %v3427_v11  ;;  %v3428_v46 = vunpack.i.l.bf16 %v3427_v11  ;;  %p3508_p2 = pneg %p3507_p1 }
 0x349   : > { %v2798_v59 = vpack.c.bf16 %v3431_v55, %v3428_v46  ;;  %p3513_p7 = pnand %p3512_p6, %p3508_p2 }
 0x34b   : > { %3184 = vst [vmem:[%s5346_s17 + $0x18] sm:$0xff] %v2798_v59 }
 0x34c   : > { %3516 = shalt.err (!%p3513_p7)
}
 0x34d   : > { %s3576_s15 = smov 128   ;;  %s5543_s17 = smov 8  }
 0x34e   : > { %3215 = dma.vmem_to_hbm [thread:$0]  (%p3649_p4), %s2828_s11, 512, %s2830_s8, %s2805_s27, %s3576_s15, %s3576_s15, %s5543_s17  }
 0x34f PF: > { %p3231_p9 = scmp.ge.s32.totalorder %s3571_s23, 2  ;;  %s2872_s12 = sand.u32 1, %s3551_s18  }
 0x350   : > { %s2873_s9 = scalar_lea.sflag [#allocation3], %s2872_s12 }
 0x351   : > { %p3222_p10 = pnand %p3231_p9, %p3658_p8 }
 0x353   : > { %p3223_p11 = pneg %p3222_p10 }
 0x355   : > { %3542 = dma.done.wait (%p3223_p11), %s2873_s9, 512  }
 0x356   : > { %3544 = vsyncadd (%p3223_p11), %s2873_s9, 4294966784  ;;  %s5544_s14 = sadd.s32 4294967294, %s3571_s23  }
 0x357   : > { %s2882_s16 = sand.u32 1, %s5544_s14  }
 0x358   : > { %s2883_s24 = scalar_lea.sflag [#allocation5], %s2882_s16 }
 0x359   : > { %3546 = dma.done.wait (%p3223_p11), %s2883_s24, 32  }
 0x35a   : > { %3548 = vsyncadd (%p3223_p11), %s2883_s24, 4294967264  ;;  %s22_s23 = sadd.s32 1, %s3571_s23   ;;  %s5545_s18 = smov %s3555_s19 }
 0x35b   : > { %p19_p4 = scmp.ge.s32.totalorder %s22_s23, 4   ;;  %s5546_s19 = smov %s3559_s20 }
 0x35c   : > { %s5547_s20 = smov %s3664_s6  ;;  %s5548_s21 = smov %s3567_s22 }
 0x35d   : > { %s5549_s22 = smov %s5551_s26  ;;  %21 = sbr.rel (!%p19_p4) target bundleno = 9 (0x9), region = 108 }
 0x362   :  { %2897 = vsyncpa [#allocation3], 1 }
 0x363   :  { %2899 = vsyncpa [#allocation3 + $0x1], 1 }
 0x364   :  { %2900 = vsyncpa [#allocation5], 1 }
 0x365   :  { %2902 = vsyncpa [#allocation5 + $0x1], 1 }

</bundles_post_ra>
